<compile_context>
chip_gen: v6e
topology: v6e:2x2x1
jax: 0.10.0
libtpu: 0.0.40
codegen_flags: <defaults>
</compile_context>

<pallas_src>
import functools

import jax
import jax.numpy as jnp
from jax.experimental import pallas as pl
from jax.experimental.pallas import tpu as pltpu

EPS = 1e-5
LANE = 128
PADL = 8        # column offset of the image inside the pad scratch (keeps stores aligned)


def _rup(n, m=LANE):
    return ((n + m - 1) // m) * m


def _strip_rows(H, W, pool):
    # aim for ~256 im2col rows per strip (matches v6e/v7x MXU M dimension)
    rs = max(1, 256 // W)
    rs = min(rs, H)
    if pool:
        rs = max(2, rs & ~1)
    while H % rs:
        rs -= 2 if pool else 1
    return rs


# ----------------------------------------------------------------------------
# Fused Conv3x3(pad=1, no bias) + folded BatchNorm2d + ReLU [+ MaxPool2d(2,2)]
# grid = (batch, row-strips).  One im2col matmul per strip.
# ----------------------------------------------------------------------------
def _conv_kernel(x_ref, w_ref, s_ref, b_ref, o_ref, xp_ref, col_ref,
                 *pool_scratch, rs, pool):
    H, W, Cin = x_ref.shape
    Cout = o_ref.shape[-1]
    s = pl.program_id(1)

    # Zero-padded f32 copy of the image, built once per image in VMEM.
    # Image sits at rows [1, H+1), columns [PADL, PADL+W) -> aligned store.
    @pl.when(s == 0)
    def _pad():
        xp_ref[...] = jnp.zeros_like(xp_ref)
        xp_ref[pl.ds(1, H), pl.ds(PADL, W), :] = x_ref[...].astype(jnp.float32)

    # im2col patch for this strip: (rs*W, 9*Cin) bf16, 128-aligned column blocks.
    r0 = s * rs
    for kh in range(3):
        for kw in range(3):
            t = kh * 3 + kw
            tap = xp_ref[pl.ds(r0 + kh, rs), pl.ds(PADL - 1 + kw, W), :]
            col_ref[:, t * Cin:(t + 1) * Cin] = (
                tap.reshape(rs * W, Cin).astype(jnp.bfloat16))

    # One MXU matmul with K = 9*Cin, f32 accumulation; BN + ReLU epilogue in f32.
    acc = jnp.dot(col_ref[...], w_ref[...], preferred_element_type=jnp.float32)
    y = jnp.maximum(acc * s_ref[...] + b_ref[...], 0.0)            # (rs*W, Cout)

    if pool:                                                       # fused MaxPool2d(2,2)
        yb_ref, = pool_scratch
        Wo = W // 2
        yb_ref[...] = y.reshape(rs, W, Cout)
        a = yb_ref[:, pl.ds(0, Wo, stride=2), :]                   # even columns
        b = yb_ref[:, pl.ds(1, Wo, stride=2), :]                   # odd columns
        wm = jnp.maximum(a, b).reshape(rs // 2, 2, Wo, Cout)       # split row pairs
        o_ref[...] = jnp.maximum(wm[:, 0], wm[:, 1]).astype(o_ref.dtype)
    else:
        o_ref[...] = y.reshape(rs, W, Cout).astype(o_ref.dtype)


def conv3x3_bn_relu(x, w_flat, scale, bias, pool):
    # x: (N, H, W, Cin) bf16 with Cin % 128 == 0; w_flat: (9*Cin, Cout) bf16.
    N, H, W, Cin = x.shape
    Cout = w_flat.shape[-1]
    if pool:
        assert H % 2 == 0 and W % 2 == 0
    rs = _strip_rows(H, W, pool)
    S = H // rs
    rso = rs // 2 if pool else rs
    Ho = H // 2 if pool else H
    Wo = W // 2 if pool else W

    scratch = [
        pltpu.VMEM((H + 2, W + 2 * PADL, Cin), jnp.float32),   # zero-padded image
        pltpu.VMEM((rs * W, 9 * Cin), jnp.bfloat16),           # im2col patch matrix
    ]
    if pool:
        scratch.append(pltpu.VMEM((rs, W, Cout), jnp.float32)) # pre-pool strip

    return pl.pallas_call(
        functools.partial(_conv_kernel, rs=rs, pool=pool),
        out_shape=jax.ShapeDtypeStruct((N, Ho, Wo, Cout), jnp.bfloat16),
        grid=(N, S),
        in_specs=[
            pl.BlockSpec((None, H, W, Cin), lambda n, s: (n, 0, 0, 0)),
            pl.BlockSpec((9 * Cin, Cout), lambda n, s: (0, 0)),
            pl.BlockSpec((1, Cout), lambda n, s: (0, 0)),
            pl.BlockSpec((1, Cout), lambda n, s: (0, 0)),
        ],
        out_specs=pl.BlockSpec((None, rso, Wo, Cout), lambda n, s: (n, s, 0, 0)),
        scratch_shapes=scratch,
        compiler_params=pltpu.CompilerParams(
            dimension_semantics=("parallel", "arbitrary")),
    )(x, w_flat, scale, bias)


# ----------------------------------------------------------------------------
# Head: global AvgPool + Linear(C,512) + BatchNorm1d(512, eval) + ReLU +
#       Linear(512, num_class).  Whole problem fits in VMEM (single block).
# ----------------------------------------------------------------------------
def _head_kernel(f_ref, w1_ref, b1_ref, s_ref, t_ref, w2_ref, b2_ref, o_ref):
    pooled = jnp.mean(f_ref[...].astype(jnp.float32), axis=1)          # (N, Cp)
    h = jnp.dot(pooled.astype(jnp.bfloat16), w1_ref[...],
                preferred_element_type=jnp.float32) + b1_ref[...]
    h = jnp.maximum(h * s_ref[...] + t_ref[...], 0.0)                  # BN1d + ReLU
    o_ref[...] = (jnp.dot(h.astype(jnp.bfloat16), w2_ref[...],
                          preferred_element_type=jnp.float32)
                  + b2_ref[...]).astype(o_ref.dtype)


def classifier_head(feat, w1, b1, bn_scale, bn_bias, w2, b2):
    N, Hf, Wf, Cp = feat.shape
    f = feat.reshape(N, Hf * Wf, Cp)                                   # free reshape
    nc = w2.shape[1]
    return pl.pallas_call(
        _head_kernel,
        out_shape=jax.ShapeDtypeStruct((N, nc), jnp.float32),
    )(f, w1, b1, bn_scale, bn_bias, w2, b2)


# ----------------------------------------------------------------------------
# Parameter init (deterministic), mirroring vgg.initialize_weights(), with
# channel padding to multiples of 128 (pad channels carry exact zeros).
# ----------------------------------------------------------------------------
def init_params(key, cfg, num_class):
    layers = []
    in_c = 3
    i = 0
    while i < len(cfg):
        v = cfg[i]
        assert v != 'M', "TODO(synk): MaxPool without a preceding conv is not supported"
        pool = (i + 1 < len(cfg)) and (cfg[i + 1] == 'M')
        in_p, out_p = _rup(in_c), _rup(v)
        key, k1 = jax.random.split(key)
        fan_out = v * 9                                         # kaiming_normal fan_out
        w = jax.random.normal(k1, (3, 3, in_c, v), jnp.float32) * jnp.sqrt(2.0 / fan_out)
        wp = jnp.zeros((3, 3, in_p, out_p), jnp.float32).at[:, :, :in_c, :v].set(w)
        w_flat = wp.reshape(9 * in_p, out_p).astype(jnp.bfloat16)
        # BatchNorm2d folded (eval, fresh stats); pad channels get scale=0 -> stay 0.
        scale = jnp.zeros((1, out_p), jnp.float32).at[0, :v].set(1.0 / jnp.sqrt(1.0 + EPS))
        bias = jnp.zeros((1, out_p), jnp.float32)
        layers.append((w_flat, scale, bias, pool))
        in_c = v
        i += 2 if pool else 1

    cp = _rup(cfg[-2])
    key, k1, k2 = jax.random.split(key, 3)
    w1 = jax.random.normal(k1, (cfg[-2], 512), jnp.float32) * 0.01      # Linear(cfg[-2], 512)
    w1p = jnp.zeros((cp, 512), jnp.float32).at[:cfg[-2], :].set(w1).astype(jnp.bfloat16)
    b1 = jnp.zeros((1, 512), jnp.float32)
    bn_s = jnp.full((1, 512), 1.0 / jnp.sqrt(1.0 + EPS), jnp.float32)   # BatchNorm1d(512), eval
    bn_b = jnp.zeros((1, 512), jnp.float32)
    w2 = (jax.random.normal(k2, (512, num_class), jnp.float32) * 0.01).astype(jnp.bfloat16)
    b2 = jnp.zeros((1, num_class), jnp.float32)
    return layers, (w1p, b1, bn_s, bn_b, w2, b2)


def vgg_forward(x_nchw, layers, head):
    x = jnp.transpose(x_nchw, (0, 2, 3, 1))                            # NCHW -> NHWC
    N, H, W, C = x.shape
    x = jnp.pad(x, ((0, 0), (0, 0), (0, 0), (0, _rup(C) - C))).astype(jnp.bfloat16)
    for (w_flat, scale, bias, pool) in layers:
        x = conv3x3_bn_relu(x, w_flat, scale, bias, pool)
    return classifier_head(x, *head)


if __name__ == "__main__":
    # Small cfg (the module accepts a custom cfg); same structure as vgg_cfg
    # with reduced channel counts / depth for a small, fast demo.
    cfg = [16, 16, 'M', 32, 32, 'M', 64, 64, 'M']
    num_class = 10

    key = jax.random.PRNGKey(0)
    key, kx = jax.random.split(key)
    x = jax.random.normal(kx, (2, 3, 32, 32), jnp.float32)             # NCHW, like PyTorch

    layers, head = init_params(key, cfg, num_class)
    y = vgg_forward(x, layers, head)
    y = jax.block_until_ready(y)
    assert y.shape == (2, num_class) and y.dtype == jnp.float32
    print("KERNEL_OK")
</pallas_src>

<mosaic_0001>
module attributes {stable_mosaic.version = 11 : i64} {
  func.func @_conv_kernel(%arg0: i32, %arg1: i32, %arg2: memref<1x32x32x128xbf16, #tpu.memory_space<vmem>>, %arg3: memref<1152x128xbf16, #tpu.memory_space<vmem>>, %arg4: memref<1x128xf32, #tpu.memory_space<vmem>>, %arg5: memref<1x128xf32, #tpu.memory_space<vmem>>, %arg6: memref<1x8x32x128xbf16, #tpu.memory_space<vmem>>, %arg7: memref<34x48x128xf32, #tpu.memory_space<vmem>>, %arg8: memref<256x1152xbf16, #tpu.memory_space<vmem>>) attributes {dimension_semantics = [#tpu.dimension_semantics<parallel>, #tpu.dimension_semantics<arbitrary>], iteration_bounds = array<i64: 2, 4>, scalar_prefetch = 0 : i64, scratch_operands = 2 : i64, tpu.core_type = #tpu.core_type<tc>, window_params = [{transform_indices = @transform_0, window_bounds = array<i64: 1, 32, 32, 128>}, {pipeline_mode = #tpu.pipeline_mode<synchronous>, transform_indices = @transform_1, window_bounds = array<i64: 1152, 128>}, {pipeline_mode = #tpu.pipeline_mode<synchronous>, transform_indices = @transform_2, window_bounds = array<i64: 1, 128>}, {pipeline_mode = #tpu.pipeline_mode<synchronous>, transform_indices = @transform_3, window_bounds = array<i64: 1, 128>}, {transform_indices = @transform_4, window_bounds = array<i64: 1, 8, 32, 128>}]} {
    %c0_i32 = arith.constant 0 : i32
    %0 = arith.cmpi eq, %arg1, %c0_i32 : i32
    %1 = arith.extui %0 : i1 to i32
    %c0_i32_0 = arith.constant 0 : i32
    %2 = arith.cmpi ne, %1, %c0_i32_0 : i32
    scf.if %2 {
      %cst_45 = arith.constant 0.000000e+00 : f32
      %74 = vector.broadcast %cst_45 : f32 to vector<34x48x128xf32>
      %c0_46 = arith.constant 0 : index
      %c0_47 = arith.constant 0 : index
      %c0_48 = arith.constant 0 : index
      %75 = vector.load %arg7[%c0_46, %c0_47, %c0_48] : memref<34x48x128xf32, #tpu.memory_space<vmem>>, vector<34x48x128xf32>
      tpu.vector_store %arg7[%c0_46, %c0_47, %c0_48], %74 {strides = array<i32>} : memref<34x48x128xf32, #tpu.memory_space<vmem>>, vector<34x48x128xf32>,
      %c0_49 = arith.constant 0 : index
      %c0_50 = arith.constant 0 : index
      %c0_51 = arith.constant 0 : index
      %c0_52 = arith.constant 0 : index
      %76 = vector.load %arg2[%c0_49, %c0_50, %c0_51, %c0_52] : memref<1x32x32x128xbf16, #tpu.memory_space<vmem>>, vector<1x32x32x128xbf16>
      %77 = vector.shape_cast %76 : vector<1x32x32x128xbf16> to vector<32x32x128xbf16>
      %78 = arith.extf %77 : vector<32x32x128xbf16> to vector<32x32x128xf32>
      %c1 = arith.constant 1 : index
      %c8_53 = arith.constant 8 : index
      %c0_54 = arith.constant 0 : index
      %79 = vector.load %arg7[%c1, %c8_53, %c0_54] : memref<34x48x128xf32, #tpu.memory_space<vmem>>, vector<32x32x128xf32>
      tpu.vector_store %arg7[%c1, %c8_53, %c0_54], %78 {strides = array<i32>} : memref<34x48x128xf32, #tpu.memory_space<vmem>>, vector<32x32x128xf32>,
    } else {
    }
    %c8_i32 = arith.constant 8 : i32
    %3 = arith.muli %arg1, %c8_i32 : i32
    %c0_i32_1 = arith.constant 0 : i32
    %4 = arith.addi %3, %c0_i32_1 : i32
    %5 = arith.index_cast %4 : i32 to index
    %c7 = arith.constant 7 : index
    %c0 = arith.constant 0 : index
    %6 = vector.load %arg7[%5, %c7, %c0] : memref<34x48x128xf32, #tpu.memory_space<vmem>>, vector<8x32x128xf32>
    %7 = vector.shape_cast %6 : vector<8x32x128xf32> to vector<256x128xf32>
    %8 = arith.truncf %7 : vector<256x128xf32> to vector<256x128xbf16>
    %c0_2 = arith.constant 0 : index
    %c0_3 = arith.constant 0 : index
    %9 = vector.load %arg8[%c0_2, %c0_3] : memref<256x1152xbf16, #tpu.memory_space<vmem>>, vector<256x128xbf16>
    tpu.vector_store %arg8[%c0_2, %c0_3], %8 {strides = array<i32>} : memref<256x1152xbf16, #tpu.memory_space<vmem>>, vector<256x128xbf16>,
    %c0_i32_4 = arith.constant 0 : i32
    %10 = arith.addi %3, %c0_i32_4 : i32
    %11 = arith.index_cast %10 : i32 to index
    %c8 = arith.constant 8 : index
    %c0_5 = arith.constant 0 : index
    %12 = vector.load %arg7[%11, %c8, %c0_5] : memref<34x48x128xf32, #tpu.memory_space<vmem>>, vector<8x32x128xf32>
    %13 = vector.shape_cast %12 : vector<8x32x128xf32> to vector<256x128xf32>
    %14 = arith.truncf %13 : vector<256x128xf32> to vector<256x128xbf16>
    %c0_6 = arith.constant 0 : index
    %c128 = arith.constant 128 : index
    %15 = vector.load %arg8[%c0_6, %c128] : memref<256x1152xbf16, #tpu.memory_space<vmem>>, vector<256x128xbf16>
    tpu.vector_store %arg8[%c0_6, %c128], %14 {strides = array<i32>} : memref<256x1152xbf16, #tpu.memory_space<vmem>>, vector<256x128xbf16>,
    %c0_i32_7 = arith.constant 0 : i32
    %16 = arith.addi %3, %c0_i32_7 : i32
    %17 = arith.index_cast %16 : i32 to index
    %c9 = arith.constant 9 : index
    %c0_8 = arith.constant 0 : index
    %18 = vector.load %arg7[%17, %c9, %c0_8] : memref<34x48x128xf32, #tpu.memory_space<vmem>>, vector<8x32x128xf32>
    %19 = vector.shape_cast %18 : vector<8x32x128xf32> to vector<256x128xf32>
    %20 = arith.truncf %19 : vector<256x128xf32> to vector<256x128xbf16>
    %c0_9 = arith.constant 0 : index
    %c256 = arith.constant 256 : index
    %21 = vector.load %arg8[%c0_9, %c256] : memref<256x1152xbf16, #tpu.memory_space<vmem>>, vector<256x128xbf16>
    tpu.vector_store %arg8[%c0_9, %c256], %20 {strides = array<i32>} : memref<256x1152xbf16, #tpu.memory_space<vmem>>, vector<256x128xbf16>,
    %c1_i32 = arith.constant 1 : i32
    %22 = arith.addi %3, %c1_i32 : i32
    %23 = arith.index_cast %22 : i32 to index
    %c7_10 = arith.constant 7 : index
    %c0_11 = arith.constant 0 : index
    %24 = vector.load %arg7[%23, %c7_10, %c0_11] : memref<34x48x128xf32, #tpu.memory_space<vmem>>, vector<8x32x128xf32>
    %25 = vector.shape_cast %24 : vector<8x32x128xf32> to vector<256x128xf32>
    %26 = arith.truncf %25 : vector<256x128xf32> to vector<256x128xbf16>
    %c0_12 = arith.constant 0 : index
    %c384 = arith.constant 384 : index
    %27 = vector.load %arg8[%c0_12, %c384] : memref<256x1152xbf16, #tpu.memory_space<vmem>>, vector<256x128xbf16>
    tpu.vector_store %arg8[%c0_12, %c384], %26 {strides = array<i32>} : memref<256x1152xbf16, #tpu.memory_space<vmem>>, vector<256x128xbf16>,
    %c1_i32_13 = arith.constant 1 : i32
    %28 = arith.addi %3, %c1_i32_13 : i32
    %29 = arith.index_cast %28 : i32 to index
    %c8_14 = arith.constant 8 : index
    %c0_15 = arith.constant 0 : index
    %30 = vector.load %arg7[%29, %c8_14, %c0_15] : memref<34x48x128xf32, #tpu.memory_space<vmem>>, vector<8x32x128xf32>
    %31 = vector.shape_cast %30 : vector<8x32x128xf32> to vector<256x128xf32>
    %32 = arith.truncf %31 : vector<256x128xf32> to vector<256x128xbf16>
    %c0_16 = arith.constant 0 : index
    %c512 = arith.constant 512 : index
    %33 = vector.load %arg8[%c0_16, %c512] : memref<256x1152xbf16, #tpu.memory_space<vmem>>, vector<256x128xbf16>
    tpu.vector_store %arg8[%c0_16, %c512], %32 {strides = array<i32>} : memref<256x1152xbf16, #tpu.memory_space<vmem>>, vector<256x128xbf16>,
    %c1_i32_17 = arith.constant 1 : i32
    %34 = arith.addi %3, %c1_i32_17 : i32
    %35 = arith.index_cast %34 : i32 to index
    %c9_18 = arith.constant 9 : index
    %c0_19 = arith.constant 0 : index
    %36 = vector.load %arg7[%35, %c9_18, %c0_19] : memref<34x48x128xf32, #tpu.memory_space<vmem>>, vector<8x32x128xf32>
    %37 = vector.shape_cast %36 : vector<8x32x128xf32> to vector<256x128xf32>
    %38 = arith.truncf %37 : vector<256x128xf32> to vector<256x128xbf16>
    %c0_20 = arith.constant 0 : index
    %c640 = arith.constant 640 : index
    %39 = vector.load %arg8[%c0_20, %c640] : memref<256x1152xbf16, #tpu.memory_space<vmem>>, vector<256x128xbf16>
    tpu.vector_store %arg8[%c0_20, %c640], %38 {strides = array<i32>} : memref<256x1152xbf16, #tpu.memory_space<vmem>>, vector<256x128xbf16>,
    %c2_i32 = arith.constant 2 : i32
    %40 = arith.addi %3, %c2_i32 : i32
    %41 = arith.index_cast %40 : i32 to index
    %c7_21 = arith.constant 7 : index
    %c0_22 = arith.constant 0 : index
    %42 = vector.load %arg7[%41, %c7_21, %c0_22] : memref<34x48x128xf32, #tpu.memory_space<vmem>>, vector<8x32x128xf32>
    %43 = vector.shape_cast %42 : vector<8x32x128xf32> to vector<256x128xf32>
    %44 = arith.truncf %43 : vector<256x128xf32> to vector<256x128xbf16>
    %c0_23 = arith.constant 0 : index
    %c768 = arith.constant 768 : index
    %45 = vector.load %arg8[%c0_23, %c768] : memref<256x1152xbf16, #tpu.memory_space<vmem>>, vector<256x128xbf16>
    tpu.vector_store %arg8[%c0_23, %c768], %44 {strides = array<i32>} : memref<256x1152xbf16, #tpu.memory_space<vmem>>, vector<256x128xbf16>,
    %c2_i32_24 = arith.constant 2 : i32
    %46 = arith.addi %3, %c2_i32_24 : i32
    %47 = arith.index_cast %46 : i32 to index
    %c8_25 = arith.constant 8 : index
    %c0_26 = arith.constant 0 : index
    %48 = vector.load %arg7[%47, %c8_25, %c0_26] : memref<34x48x128xf32, #tpu.memory_space<vmem>>, vector<8x32x128xf32>
    %49 = vector.shape_cast %48 : vector<8x32x128xf32> to vector<256x128xf32>
    %50 = arith.truncf %49 : vector<256x128xf32> to vector<256x128xbf16>
    %c0_27 = arith.constant 0 : index
    %c896 = arith.constant 896 : index
    %51 = vector.load %arg8[%c0_27, %c896] : memref<256x1152xbf16, #tpu.memory_space<vmem>>, vector<256x128xbf16>
    tpu.vector_store %arg8[%c0_27, %c896], %50 {strides = array<i32>} : memref<256x1152xbf16, #tpu.memory_space<vmem>>, vector<256x128xbf16>,
    %c2_i32_28 = arith.constant 2 : i32
    %52 = arith.addi %3, %c2_i32_28 : i32
    %53 = arith.index_cast %52 : i32 to index
    %c9_29 = arith.constant 9 : index
    %c0_30 = arith.constant 0 : index
    %54 = vector.load %arg7[%53, %c9_29, %c0_30] : memref<34x48x128xf32, #tpu.memory_space<vmem>>, vector<8x32x128xf32>
    %55 = vector.shape_cast %54 : vector<8x32x128xf32> to vector<256x128xf32>
    %56 = arith.truncf %55 : vector<256x128xf32> to vector<256x128xbf16>
    %c0_31 = arith.constant 0 : index
    %c1024 = arith.constant 1024 : index
    %57 = vector.load %arg8[%c0_31, %c1024] : memref<256x1152xbf16, #tpu.memory_space<vmem>>, vector<256x128xbf16>
    tpu.vector_store %arg8[%c0_31, %c1024], %56 {strides = array<i32>} : memref<256x1152xbf16, #tpu.memory_space<vmem>>, vector<256x128xbf16>,
    %c0_32 = arith.constant 0 : index
    %c0_33 = arith.constant 0 : index
    %58 = vector.load %arg8[%c0_32, %c0_33] : memref<256x1152xbf16, #tpu.memory_space<vmem>>, vector<256x1152xbf16>
    %c0_34 = arith.constant 0 : index
    %c0_35 = arith.constant 0 : index
    %59 = vector.load %arg3[%c0_34, %c0_35] : memref<1152x128xbf16, #tpu.memory_space<vmem>>, vector<1152x128xbf16>
    %cst = arith.constant dense<0.000000e+00> : vector<256x128xf32>
    %60 = tpu.matmul %58, %59, %cst {dimension_numbers = #tpu.dot_dimension_numbers<[1], [0], [0], [1], [0, 0, 1, 1], [], []>} : vector<256x1152xbf16>, vector<1152x128xbf16>, vector<256x128xf32> -> vector<256x128xf32>
    %c0_36 = arith.constant 0 : index
    %c0_37 = arith.constant 0 : index
    %61 = vector.load %arg4[%c0_36, %c0_37] : memref<1x128xf32, #tpu.memory_space<vmem>>, vector<1x128xf32>
    %62 = vector.broadcast %61 : vector<1x128xf32> to vector<256x128xf32>
    %63 = arith.mulf %60, %62 : vector<256x128xf32>
    %c0_38 = arith.constant 0 : index
    %c0_39 = arith.constant 0 : index
    %64 = vector.load %arg5[%c0_38, %c0_39] : memref<1x128xf32, #tpu.memory_space<vmem>>, vector<1x128xf32>
    %65 = vector.broadcast %64 : vector<1x128xf32> to vector<256x128xf32>
    %66 = arith.addf %63, %65 : vector<256x128xf32>
    %cst_40 = arith.constant 0.000000e+00 : f32
    %67 = vector.broadcast %cst_40 : f32 to vector<256x128xf32>
    %68 = arith.maximumf %66, %67 : vector<256x128xf32>
    %69 = vector.shape_cast %68 : vector<256x128xf32> to vector<8x32x128xf32>
    %70 = arith.truncf %69 : vector<8x32x128xf32> to vector<8x32x128xbf16>
    %c0_41 = arith.constant 0 : index
    %c0_42 = arith.constant 0 : index
    %c0_43 = arith.constant 0 : index
    %c0_44 = arith.constant 0 : index
    %71 = vector.load %arg6[%c0_41, %c0_42, %c0_43, %c0_44] : memref<1x8x32x128xbf16, #tpu.memory_space<vmem>>, vector<1x8x32x128xbf16>
    %72 = vector.shape_cast %71 : vector<1x8x32x128xbf16> to vector<8x32x128xbf16>
    %73 = vector.shape_cast %70 : vector<8x32x128xbf16> to vector<1x8x32x128xbf16>
    tpu.vector_store %arg6[%c0_41, %c0_42, %c0_43, %c0_44], %73 {strides = array<i32>} : memref<1x8x32x128xbf16, #tpu.memory_space<vmem>>, vector<1x8x32x128xbf16>,
    return
  }
  func.func @transform_0(%arg0: i32, %arg1: i32) -> (i32, i32, i32, i32) {
    %c0_i32 = arith.constant 0 : i32
    %c0_i32_0 = arith.constant 0 : i32
    %c0_i32_1 = arith.constant 0 : i32
    %c0_i32_2 = arith.constant 0 : i32
    return %arg0, %c0_i32, %c0_i32_0, %c0_i32_1 : i32, i32, i32, i32
  }
  func.func @transform_1(%arg0: i32, %arg1: i32) -> (i32, i32) {
    %c0_i32 = arith.constant 0 : i32
    %c0_i32_0 = arith.constant 0 : i32
    %c0_i32_1 = arith.constant 0 : i32
    return %c0_i32, %c0_i32_0 : i32, i32
  }
  func.func @transform_2(%arg0: i32, %arg1: i32) -> (i32, i32) {
    %c0_i32 = arith.constant 0 : i32
    %c0_i32_0 = arith.constant 0 : i32
    %c0_i32_1 = arith.constant 0 : i32
    return %c0_i32, %c0_i32_0 : i32, i32
  }
  func.func @transform_3(%arg0: i32, %arg1: i32) -> (i32, i32) {
    %c0_i32 = arith.constant 0 : i32
    %c0_i32_0 = arith.constant 0 : i32
    %c0_i32_1 = arith.constant 0 : i32
    return %c0_i32, %c0_i32_0 : i32, i32
  }
  func.func @transform_4(%arg0: i32, %arg1: i32) -> (i32, i32, i32, i32) {
    %c0_i32 = arith.constant 0 : i32
    %c0_i32_0 = arith.constant 0 : i32
    %c0_i32_1 = arith.constant 0 : i32
    return %arg0, %arg1, %c0_i32, %c0_i32_0 : i32, i32, i32, i32
  }
}

</mosaic_0001>

<bundles_post_ra>
// kernel: tpu_custom_call.1
= control target key start
LH: loop header
LB: loop body
LE: loop exit
PB: predicated region body
PF: predicated region fallthrough
CT: control target
= control target key end

     0   :  { %s8991_s0 = inlined_call_operand.hbm [shape: bf16[2,32,32,128], index: 0, kind: input, shape index: {}]   ;;  %s8992_s1 = inlined_call_operand.hbm [shape: bf16[1152,128], index: 1, kind: input, shape index: {}]   ;;  %s8993_s2 = inlined_call_operand.vmem [shape: f32[1,128], index: 2, kind: input, shape index: {}]   ;;  %s8994_s3 = inlined_call_operand.vmem [shape: f32[1,128], index: 3, kind: input, shape index: {}]   ;;  %s8995_s4 = inlined_call_operand.hbm [shape: bf16[2,32,32,128], index: 4, kind: output, shape index: {}]  }
   0x1   :  { %9007 = sst [smem:[#allocation28_spill]] %s8992_s1 }
   0x2   :  { %9008 = sst [smem:[#allocation29_spill]] %s8995_s4 }
   0x3   :  { %9 = vsyncpa [#allocation5], 0 }
   0x4   :  { %11 = vsyncpa [#allocation5 + $0x1], 0 }
   0x5   :  { %12 = vsyncpa [#allocation8], 0 }
   0x6   :  { %13 = vsyncpa [#allocation6], 0 }
   0x7   :  { %15 = vsyncpa [#allocation6 + $0x1], 0  ;;  %s7887_s15 = smov 0   ;;  %s7889_s16 = smov 0  }
   0x8   :  { %s7891_s17 = smov 0   ;;  %s7893_s18 = smov 0  }
   0x9   :  { %s7895_s19 = smov 0   ;;  %s7897_s20 = smov 0  }
   0xa   :  { %s7899_s21 = smov 0   ;;  %s7901_s22 = smov 0  }
   0xb   :  { %s7903_s23 = smov 0   ;;  %s7905_s24 = smov 0  }
   0xc   :  { %s7907_s25 = smov 0  }
   0xd LB: > { %9009 = sst [smem:[#allocation13_spill]] %s7812_s15  ;;  %s5248_s26 = sadd.s32 4294967295, %s7852_s25   ;;  %s7852_s25 = sphi %s7907_s25, %s21_s25   ;;  %s7848_s24 = sphi %s7905_s24, %s9060_s24   ;;  %s7844_s23 = sphi %s7903_s23, %s9051_s23   ;;  %s7840_s22 = sphi %s7901_s22, %s9059_s22   ;;  %s7836_s21 = sphi %s7899_s21, %s9050_s21   ;;  %s7832_s20 = sphi %s7897_s20, %s9058_s20   ;;  %s7828_s19 = sphi %s7895_s19, %s9057_s19   ;;  %s7824_s18 = sphi %s7893_s18, %s9056_s18   ;;  %s7820_s17 = sphi %s7891_s17, %s9055_s17   ;;  %s7816_s16 = sphi %s7889_s16, %s9054_s16   ;;  %s7812_s15 = sphi %s7887_s15, %s9053_s15  }
   0xe   : > { %9010 = sst [smem:[#allocation14_spill]] %s7844_s23  ;;  %s5249_s27 = sadd.s32 4294967294, %s7852_s25  }
   0xf   : > { %p53_p0 = scmp.ne.s32.totalorder %s7828_s19, %s7824_s18  ;;  %p7943_p1 = scmp.eq.s32.totalorder %s5248_s26, 0 }
  0x10   : > { %p141_p2 = scmp.ne.s32.totalorder %s7820_s17, %s7816_s16  ;;  %p142_p4 = scmp.eq.s32.totalorder %s5248_s26, 7 }
  0x11   : > { %p7952_p3 = por %p7943_p1, %p53_p0  ;;  %p147_p5 = scmp.ne.s32.totalorder %s7816_s16, %s7812_s15 }
  0x12   : > { %p148_p6 = scmp.eq.s32.totalorder %s5249_s27, 7  ;;  %p7958_p7 = por %p142_p4, %p141_p2 }
  0x13   : > { %p5250_p8 = scmp.ge.s32.totalorder %s7852_s25, 1  ;;  %p155_p10 = scmp.lt.s32.totalorder %s7852_s25, 9 }
  0x14   : > { %s9013_s5 = scalar_select %p7958_p7, 1, 0 }
  0x15   : > { %p7963_p9 = por %p148_p6, %p147_p5  ;;  %p7968_p11 = pnand %p5250_p8, %p155_p10 }
  0x16   : > { %9014 = sst [smem:[#allocation15_spill]] %s9013_s5  ;;  %s7854_s8 = smov [#allocation7]  }
  0x17   : > { %s9015_s6 = scalar_select %p7963_p9, 1, 0 }
  0x18   : > { %s167_s9 = sshll.u32 %s7854_s8, 4  ;;  %p7284_p12 = pneg %p7968_p11  ;;  %s168_s9 = int_to_ptr.vmem [resolvable:$true] %s167_s9 }
  0x19   : > { %9016 = sst [smem:[#allocation16_spill]] %s9015_s6  ;;  %s7685_s10 = scalar_lea.vmem %s168_s9, 9216 }
  0x1a   : > { %p7285_p13 = pnand %p7284_p12, %p7943_p1  ;;  %p7686_p2 = scmp.ne.s32.totalorder %s168_s9, %s7685_s10 }
  0x1b   : > { %p7693_p6 = scmp.lt.s32.totalorder %s168_s9, %s168_s9  ;;  %p7694_p9 = scmp.lt.s32.totalorder %s7685_s10, %s7685_s10 }
  0x1c   : > { %p7676_p0 = pneg %p7285_p13 }
  0x1d   : > { %p7695_p7 = por %p7694_p9, %p7693_p6 }
  0x1e   : > { %p7688_p4 = pnand %p7686_p2, %p7676_p0 }
  0x20   : > { %p7689_p5 = pneg %p7688_p4 }
  0x22   : > { %p7696_p8 = pnand %p7695_p7, %p7689_p5 }
  0x24   : > { %7699 = shalt.err (!%p7696_p8)
}
  0x25   : > { %s8997_s11 = smov 64   ;;  %s8998_s12 = smov 4  }
  0x26   : > { %s9018_s1 = sld [smem:[#allocation28_spill]]  ;;  %s30_s18 = sadd.s32 1, %s7844_s23 }
  0x27   : > { %p31_p7 = scmp.ge.s32.totalorder %s30_s18, 4  ;;  %s33_s26 = sadd.s32 1, %s7848_s24 }
  0x28   : > { %s40_s27 = sadd.s32 1, %s7832_s20  ;;  %p47_p9 = scmp.ne.s32.totalorder %s7832_s20, %s7828_s19 }
  0x29   : > { %s9062_s18 = smov (%p31_p7, %s30_s18), 0  ;;  %s9064_s26 = smov (!%p31_p7, %s33_s26), %s7848_s24 }
  0x2a   : > { %9019 = sst [smem:[#allocation17_spill]] %s9062_s18  ;;  %p48_p10 = scmp.eq.s32.totalorder %s7852_s25, 0 }
  0x2b   : > { %s127_s8 = ssub.s32 %s7844_s23, %s9062_s18  ;;  %p35_p12 = scmp.ge.s32.totalorder %s9064_s26, 2 }
  0x2c   : > { %7287 = dma.hbm_to_vmem [thread:$0]  (!%p7285_p13), %s9018_s1, 9216, %s168_s9, [#allocation8], %s8997_s11, %s8997_s11, %s8998_s12  }
  0x2d   : > { %p7297_p0 = scmp.lt.s32.totalorder %s7852_s25, 8  ;;  %p7994_p13 = por %p48_p10, %p47_p9 }
  0x2e   : > { %s187_s10 = sand.u32 1, %s7832_s20   ;;  %s9066_s26 = smov (%p35_p12, %s9064_s26), 0 }
  0x2f   : > { %9021 = sst [smem:[#allocation18_spill]] %s9066_s26  ;;  %s5253_s13 = sshll.u32 %s187_s10, 9 }
  0x30   : > { %s37_s14 = ssub.s32 %s7848_s24, %s9066_s26  ;;  %s6004_s12 = sshll.u32 %s7848_s24, 13 }
  0x31   : > { %p38_p2 = scmp.eq.s32.totalorder %s37_s14, 0  ;;  %s128_s11 = sor.u32 %s127_s8, %s37_s14 }
  0x32   : > { %p129_p4 = scmp.eq.s32.totalorder %s128_s11, 0  ;;  %s9022_s1 = sadd.s32 1, %s7820_s17 }
  0x33   : > { %s8005_s29 = scalar_select %p38_p2, %s7832_s20, %s40_s27  }
  0x34   : > { %s8010_s18 = scalar_select %p129_p4, %s7820_s17, %s9022_s1  }
  0x35   : > { %s197_s15 = scalar_lea.hbm %s8991_s0, %s6004_s12  ;;  %s191_s4 = scalar_lea.vmem [#allocation4], %s5253_s13 }
  0x36   : > { %s198_s5 = sshll.u32 %s191_s4, 4  ;;  %p8019_p5 = pnand %p7297_p0, %p7994_p13  ;;  %s199_s5 = int_to_ptr.vmem [resolvable:$true] %s198_s5 }
  0x37   : > { %s188_s11 = scalar_lea.sflag [#allocation5], %s187_s10  ;;  %s7713_s27 = scalar_lea.vmem %s199_s5, 8192 }
  0x38   : > { %p7702_p6 = pneg %p8019_p5  ;;  %p7714_p8 = scmp.ne.s32.totalorder %s199_s5, %s7713_s27 }
  0x39   : > { %s7857_s1 = smov [#allocation4]  }
  0x3a   : > { %p7716_p7 = pnand %p7714_p8, %p7702_p6  ;;  %s7718_s23 = sshll.u32 %s7857_s1, 4  ;;  %s7719_s23 = int_to_ptr.vmem [resolvable:$false] %s7718_s23 }
  0x3b   : > { %s7720_s6 = scalar_lea.vmem %s7719_s23, 16384  ;;  %p7721_p10 = scmp.lt.s32.totalorder %s199_s5, %s7719_s23 }
  0x3c   : > { %p7717_p9 = pneg %p7716_p7  ;;  %p7722_p12 = scmp.lt.s32.totalorder %s7720_s6, %s7713_s27 }
  0x3e   : > { %p7723_p2 = por %p7722_p12, %p7721_p10 }
  0x40   : > { %p7724_p4 = pnand %p7723_p2, %p7717_p9 }
  0x42   : > { %7727 = shalt.err (!%p7724_p4)
}
  0x43   : > { %s9024_s4 = smov 4   ;;  %s9025_s12 = smov 64  }
  0x44   : > { %7291 = dma.hbm_to_vmem [thread:$0]  (!%p8019_p5), %s197_s15, 8192, %s199_s5, %s188_s11, %s9025_s12, %s9025_s12, %s9024_s4  }
  0x45   : > { %210 = sbr.rel (%p7968_p11) target bundleno = 730 (0x2da), region = 36 }
  0x4a   : > { %s212_s8 = sand.u32 1, %s7828_s19  }
  0x4b   : > { %s5257_s9 = sshll.u32 %s212_s8, 9  ;;  %s213_s10 = scalar_lea.sflag [#allocation5], %s212_s8 }
  0x4c   : > { %s8033_s13 = scalar_lea.vmem [#allocation4], %s5257_s9 }
  0x4d   : > { %7799 = dma.done.wait (%p7952_p3), %s213_s10, 8192  }
  0x4e   : > { %7801 = vsyncadd (%p7952_p3), %s213_s10, 4294959104 }
  0x4f   : > { %7803 = dma.done.wait (%p7943_p1), [#allocation8], 9216  }
  0x50   : > { %7805 = vsyncadd (%p7943_p1), [#allocation8], 4294958080  ;;  %s242_s15 = sand.u32 1, %s7816_s16   ;;  %p5260_p11 = scmp.ne.s32.totalorder %s7836_s21, 0 }
  0x51   : > { %s5259_s5 = sshll.u32 %s242_s15, 7 }
  0x52   : > { %s8046_s7 = scalar_lea.vmem [#allocation9], %s5259_s5  ;;  %250 = sbr.rel (%p5260_p11) target bundleno = 190 (0xbe), region = 48 }
  0x57   : > { %v8050_v0 = vld [vmem:[%s8033_s13] sm:$0xff]   ;;  %v8053_v1 = vld [vmem:[%s8033_s13 + $0x8] sm:$0xff]   ;;  %v8056_v2 = vld [vmem:[%s8033_s13 + $0x10] sm:$0xff]   ;;  %v7858_v3 = vmov 0.0  }
  0x58   : > { %251 = vst [vmem:[#allocation2] sm:$0xff] %v7858_v3  ;;  %252 = vst [vmem:[#allocation2 + $0x8] sm:$0xff] %v7858_v3  ;;  %v6328_v4 = vunpack.c.l.bf16 %v8050_v0  ;;  %v6329_v5 = vunpack.c.h.bf16 %v8050_v0  ;;  %v6332_v6 = vunpack.c.l.bf16 %v8053_v1  ;;  %v6333_v7 = vunpack.c.h.bf16 %v8053_v1  ;;  %v6664_v8 = vld [vmem:[%s8033_s13 + $0x18] sm:$0xff]   ;;  %v6665_v9 = vld [vmem:[%s8033_s13 + $0x20] sm:$0xff]  }
  0x59   : > { %253 = vst [vmem:[#allocation2 + $0x10] sm:$0xff] %v7858_v3  ;;  %254 = vst [vmem:[#allocation2 + $0x18] sm:$0xff] %v7858_v3  ;;  %v6666_v10 = vld [vmem:[%s8033_s13 + $0x28] sm:$0xff]   ;;  %v6336_v11 = vunpack.c.l.bf16 %v8056_v2  ;;  %v6337_v12 = vunpack.c.h.bf16 %v8056_v2  ;;  %v6340_v13 = vunpack.c.l.bf16 %v6664_v8  ;;  %v6341_v14 = vunpack.c.h.bf16 %v6664_v8  ;;  %v6667_v15 = vld [vmem:[%s8033_s13 + $0x30] sm:$0xff]  }
  0x5a   : > { %255 = vst [vmem:[#allocation2 + $0x20] sm:$0xff] %v7858_v3  ;;  %256 = vst [vmem:[#allocation2 + $0x28] sm:$0xff] %v7858_v3  ;;  %v6668_v16 = vld [vmem:[%s8033_s13 + $0x38] sm:$0xff]   ;;  %v6669_v17 = vld [vmem:[%s8033_s13 + $0x40] sm:$0xff]   ;;  %v6344_v18 = vunpack.c.l.bf16 %v6665_v9  ;;  %v6345_v19 = vunpack.c.h.bf16 %v6665_v9  ;;  %v6348_v20 = vunpack.c.l.bf16 %v6666_v10  ;;  %v6349_v21 = vunpack.c.h.bf16 %v6666_v10 }
  0x5b   : > { %257 = vst [vmem:[#allocation2 + $0x30] sm:$0xff] %v7858_v3  ;;  %262 = vst [vmem:[#allocation2 + $0x58] sm:$0xff] %v7858_v3  ;;  %v6670_v22 = vld [vmem:[%s8033_s13 + $0x48] sm:$0xff]   ;;  %v6671_v23 = vld [vmem:[%s8033_s13 + $0x50] sm:$0xff]   ;;  %v6352_v25 = vunpack.c.l.bf16 %v6667_v15  ;;  %v6353_v26 = vunpack.c.h.bf16 %v6667_v15  ;;  %v6356_v27 = vunpack.c.l.bf16 %v6668_v16  ;;  %v6357_v28 = vunpack.c.h.bf16 %v6668_v16 }
  0x5c   : > { %263 = vst [vmem:[#allocation2 + $0x60] sm:$0xff] %v7858_v3  ;;  %268 = vst [vmem:[#allocation2 + $0x88] sm:$0xff] %v7858_v3  ;;  %v6672_v24 = vld [vmem:[%s8033_s13 + $0x58] sm:$0xff]   ;;  %v6673_v29 = vld [vmem:[%s8033_s13 + $0x60] sm:$0xff]   ;;  %v6360_v31 = vunpack.c.l.bf16 %v6669_v17  ;;  %v6361_v32 = vunpack.c.h.bf16 %v6669_v17  ;;  %v6364_v33 = vunpack.c.l.bf16 %v6670_v22  ;;  %v6365_v34 = vunpack.c.h.bf16 %v6670_v22 }
  0x5d   : > { %269 = vst [vmem:[#allocation2 + $0x90] sm:$0xff] %v7858_v3  ;;  %274 = vst [vmem:[#allocation2 + $0xb8] sm:$0xff] %v7858_v3  ;;  %v6674_v30 = vld [vmem:[%s8033_s13 + $0x68] sm:$0xff]   ;;  %v6675_v35 = vld [vmem:[%s8033_s13 + $0x70] sm:$0xff]   ;;  %v6368_v37 = vunpack.c.l.bf16 %v6671_v23  ;;  %v6369_v38 = vunpack.c.h.bf16 %v6671_v23  ;;  %v6372_v39 = vunpack.c.l.bf16 %v6672_v24  ;;  %v6373_v40 = vunpack.c.h.bf16 %v6672_v24 }
  0x5e   : > { %275 = vst [vmem:[#allocation2 + $0xc0] sm:$0xff] %v7858_v3  ;;  %280 = vst [vmem:[#allocation2 + $0xe8] sm:$0xff] %v7858_v3  ;;  %v6676_v36 = vld [vmem:[%s8033_s13 + $0x78] sm:$0xff]   ;;  %v6677_v41 = vld [vmem:[%s8033_s13 + $0x80] sm:$0xff]   ;;  %v6376_v43 = vunpack.c.l.bf16 %v6673_v29  ;;  %v6377_v44 = vunpack.c.h.bf16 %v6673_v29  ;;  %v6380_v45 = vunpack.c.l.bf16 %v6674_v30  ;;  %v6381_v46 = vunpack.c.h.bf16 %v6674_v30 }
  0x5f   : > { %281 = vst [vmem:[#allocation2 + $0xf0] sm:$0xff] %v7858_v3  ;;  %286 = vst [vmem:[#allocation2 + $0x118] sm:$0xff] %v7858_v3  ;;  %v6678_v42 = vld [vmem:[%s8033_s13 + $0x88] sm:$0xff]   ;;  %v6679_v47 = vld [vmem:[%s8033_s13 + $0x90] sm:$0xff]   ;;  %v6384_v49 = vunpack.c.l.bf16 %v6675_v35  ;;  %v6385_v50 = vunpack.c.h.bf16 %v6675_v35  ;;  %v6388_v51 = vunpack.c.l.bf16 %v6676_v36  ;;  %v6389_v52 = vunpack.c.h.bf16 %v6676_v36 }
  0x60   : > { %287 = vst [vmem:[#allocation2 + $0x120] sm:$0xff] %v7858_v3  ;;  %292 = vst [vmem:[#allocation2 + $0x148] sm:$0xff] %v7858_v3  ;;  %v6680_v48 = vld [vmem:[%s8033_s13 + $0x98] sm:$0xff]   ;;  %v6681_v53 = vld [vmem:[%s8033_s13 + $0xa0] sm:$0xff]   ;;  %v6392_v55 = vunpack.c.l.bf16 %v6677_v41  ;;  %v6393_v56 = vunpack.c.h.bf16 %v6677_v41  ;;  %v6396_v57 = vunpack.c.l.bf16 %v6678_v42  ;;  %v6397_v58 = vunpack.c.h.bf16 %v6678_v42 }
  0x61   : > { %293 = vst [vmem:[#allocation2 + $0x150] sm:$0xff] %v7858_v3  ;;  %298 = vst [vmem:[#allocation2 + $0x178] sm:$0xff] %v7858_v3  ;;  %v6682_v54 = vld [vmem:[%s8033_s13 + $0xa8] sm:$0xff]   ;;  %v6683_v59 = vld [vmem:[%s8033_s13 + $0xb0] sm:$0xff]   ;;  %v6400_v61 = vunpack.c.l.bf16 %v6679_v47  ;;  %v6401_v62 = vunpack.c.h.bf16 %v6679_v47  ;;  %v6404_v63 = vunpack.c.l.bf16 %v6680_v48  ;;  %v6405_v0 = vunpack.c.h.bf16 %v6680_v48 }
  0x62   : > { %299 = vst [vmem:[#allocation2 + $0x180] sm:$0xff] %v7858_v3  ;;  %304 = vst [vmem:[#allocation2 + $0x1a8] sm:$0xff] %v7858_v3  ;;  %v6684_v60 = vld [vmem:[%s8033_s13 + $0xb8] sm:$0xff]   ;;  %v6685_v1 = vld [vmem:[%s8033_s13 + $0xc0] sm:$0xff]   ;;  %v6416_v9 = vunpack.c.l.bf16 %v6683_v59  ;;  %v6417_v10 = vunpack.c.h.bf16 %v6683_v59 }
  0x63   : > { %305 = vst [vmem:[#allocation2 + $0x1b0] sm:$0xff] %v7858_v3  ;;  %310 = vst [vmem:[#allocation2 + $0x1d8] sm:$0xff] %v7858_v3  ;;  %v6686_v2 = vld [vmem:[%s8033_s13 + $0xc8] sm:$0xff]   ;;  %v6688_v8 = vld [vmem:[%s8033_s13 + $0xd8] sm:$0xff]   ;;  %v6424_v15 = vunpack.c.l.bf16 %v6685_v1  ;;  %v6425_v16 = vunpack.c.h.bf16 %v6685_v1 }
  0x64   : > { %311 = vst [vmem:[#allocation2 + $0x1e0] sm:$0xff] %v7858_v3  ;;  %316 = vst [vmem:[#allocation2 + $0x208] sm:$0xff] %v7858_v3  ;;  %v6428_v17 = vunpack.c.l.bf16 %v6686_v2  ;;  %v6436_v23 = vunpack.c.l.bf16 %v6688_v8  ;;  %v6437_v24 = vunpack.c.h.bf16 %v6688_v8 }
  0x65   : > { %317 = vst [vmem:[#allocation2 + $0x210] sm:$0xff] %v7858_v3  ;;  %322 = vst [vmem:[#allocation2 + $0x238] sm:$0xff] %v7858_v3 }
  0x66   : > { %323 = vst [vmem:[#allocation2 + $0x240] sm:$0xff] %v7858_v3  ;;  %328 = vst [vmem:[#allocation2 + $0x268] sm:$0xff] %v7858_v3 }
  0x67   : > { %329 = vst [vmem:[#allocation2 + $0x270] sm:$0xff] %v7858_v3  ;;  %334 = vst [vmem:[#allocation2 + $0x298] sm:$0xff] %v7858_v3 }
  0x68   : > { %335 = vst [vmem:[#allocation2 + $0x2a0] sm:$0xff] %v7858_v3  ;;  %340 = vst [vmem:[#allocation2 + $0x2c8] sm:$0xff] %v7858_v3 }
  0x69   : > { %341 = vst [vmem:[#allocation2 + $0x2d0] sm:$0xff] %v7858_v3  ;;  %346 = vst [vmem:[#allocation2 + $0x2f8] sm:$0xff] %v7858_v3 }
  0x6a   : > { %347 = vst [vmem:[#allocation2 + $0x300] sm:$0xff] %v7858_v3  ;;  %352 = vst [vmem:[#allocation2 + $0x328] sm:$0xff] %v7858_v3 }
  0x6b   : > { %353 = vst [vmem:[#allocation2 + $0x330] sm:$0xff] %v7858_v3  ;;  %358 = vst [vmem:[#allocation2 + $0x358] sm:$0xff] %v7858_v3 }
  0x6c   : > { %359 = vst [vmem:[#allocation2 + $0x360] sm:$0xff] %v7858_v3  ;;  %364 = vst [vmem:[#allocation2 + $0x388] sm:$0xff] %v7858_v3 }
  0x6d   : > { %365 = vst [vmem:[#allocation2 + $0x390] sm:$0xff] %v7858_v3  ;;  %370 = vst [vmem:[#allocation2 + $0x3b8] sm:$0xff] %v7858_v3 }
  0x6e   : > { %371 = vst [vmem:[#allocation2 + $0x3c0] sm:$0xff] %v7858_v3  ;;  %376 = vst [vmem:[#allocation2 + $0x3e8] sm:$0xff] %v7858_v3 }
  0x6f   : > { %377 = vst [vmem:[#allocation2 + $0x3f0] sm:$0xff] %v7858_v3  ;;  %382 = vst [vmem:[#allocation2 + $0x418] sm:$0xff] %v7858_v3 }
  0x70   : > { %383 = vst [vmem:[#allocation2 + $0x420] sm:$0xff] %v7858_v3  ;;  %388 = vst [vmem:[#allocation2 + $0x448] sm:$0xff] %v7858_v3 }
  0x71   : > { %389 = vst [vmem:[#allocation2 + $0x450] sm:$0xff] %v7858_v3  ;;  %394 = vst [vmem:[#allocation2 + $0x478] sm:$0xff] %v7858_v3 }
  0x72   : > { %395 = vst [vmem:[#allocation2 + $0x480] sm:$0xff] %v7858_v3  ;;  %400 = vst [vmem:[#allocation2 + $0x4a8] sm:$0xff] %v7858_v3 }
  0x73   : > { %401 = vst [vmem:[#allocation2 + $0x4b0] sm:$0xff] %v7858_v3  ;;  %406 = vst [vmem:[#allocation2 + $0x4d8] sm:$0xff] %v7858_v3 }
  0x74   : > { %407 = vst [vmem:[#allocation2 + $0x4e0] sm:$0xff] %v7858_v3  ;;  %412 = vst [vmem:[#allocation2 + $0x508] sm:$0xff] %v7858_v3 }
  0x75   : > { %413 = vst [vmem:[#allocation2 + $0x510] sm:$0xff] %v7858_v3  ;;  %418 = vst [vmem:[#allocation2 + $0x538] sm:$0xff] %v7858_v3 }
  0x76   : > { %419 = vst [vmem:[#allocation2 + $0x540] sm:$0xff] %v7858_v3  ;;  %424 = vst [vmem:[#allocation2 + $0x568] sm:$0xff] %v7858_v3 }
  0x77   : > { %425 = vst [vmem:[#allocation2 + $0x570] sm:$0xff] %v7858_v3  ;;  %430 = vst [vmem:[#allocation2 + $0x598] sm:$0xff] %v7858_v3 }
  0x78   : > { %431 = vst [vmem:[#allocation2 + $0x5a0] sm:$0xff] %v7858_v3  ;;  %436 = vst [vmem:[#allocation2 + $0x5c8] sm:$0xff] %v7858_v3 }
  0x79   : > { %437 = vst [vmem:[#allocation2 + $0x5d0] sm:$0xff] %v7858_v3  ;;  %442 = vst [vmem:[#allocation2 + $0x5f8] sm:$0xff] %v7858_v3 }
  0x7a   : > { %443 = vst [vmem:[#allocation2 + $0x600] sm:$0xff] %v7858_v3  ;;  %448 = vst [vmem:[#allocation2 + $0x628] sm:$0xff] %v7858_v3 }
  0x7b   : > { %449 = vst [vmem:[#allocation2 + $0x630] sm:$0xff] %v7858_v3  ;;  %450 = vst [vmem:[#allocation2 + $0x638] sm:$0xff] %v7858_v3 }
  0x7c   : > { %451 = vst [vmem:[#allocation2 + $0x640] sm:$0xff] %v7858_v3  ;;  %452 = vst [vmem:[#allocation2 + $0x648] sm:$0xff] %v7858_v3 }
  0x7d   : > { %453 = vst [vmem:[#allocation2 + $0x650] sm:$0xff] %v7858_v3  ;;  %454 = vst [vmem:[#allocation2 + $0x658] sm:$0xff] %v7858_v3  ;;  %v6408_v3 = vunpack.c.l.bf16 %v6681_v53 }
  0x7e   : > { %712 = vst [vmem:[#allocation2 + $0x38] sm:$0xff] %v6328_v4  ;;  %713 = vst [vmem:[#allocation2 + $0x40] sm:$0xff] %v6329_v5  ;;  %v6409_v4 = vunpack.c.h.bf16 %v6681_v53  ;;  %v6412_v5 = vunpack.c.l.bf16 %v6682_v54 }
  0x7f   : > { %714 = vst [vmem:[#allocation2 + $0x48] sm:$0xff] %v6332_v6  ;;  %715 = vst [vmem:[#allocation2 + $0x50] sm:$0xff] %v6333_v7  ;;  %v6413_v6 = vunpack.c.h.bf16 %v6682_v54  ;;  %v6687_v7 = vld [vmem:[%s8033_s13 + $0xd0] sm:$0xff]  }
  0x80   : > { %716 = vst [vmem:[#allocation2 + $0x68] sm:$0xff] %v6336_v11  ;;  %717 = vst [vmem:[#allocation2 + $0x70] sm:$0xff] %v6337_v12  ;;  %v6420_v11 = vunpack.c.l.bf16 %v6684_v60  ;;  %v6421_v12 = vunpack.c.h.bf16 %v6684_v60  ;;  %v6433_v22 = vunpack.c.h.bf16 %v6687_v7 }
  0x81   : > { %718 = vst [vmem:[#allocation2 + $0x78] sm:$0xff] %v6340_v13  ;;  %719 = vst [vmem:[#allocation2 + $0x80] sm:$0xff] %v6341_v14  ;;  %v6689_v13 = vld [vmem:[%s8033_s13 + $0xe0] sm:$0xff]   ;;  %v6690_v14 = vld [vmem:[%s8033_s13 + $0xe8] sm:$0xff]  }
  0x82   : > { %720 = vst [vmem:[#allocation2 + $0x98] sm:$0xff] %v6344_v18  ;;  %721 = vst [vmem:[#allocation2 + $0xa0] sm:$0xff] %v6345_v19  ;;  %v6429_v18 = vunpack.c.h.bf16 %v6686_v2  ;;  %v6691_v19 = vld [vmem:[%s8033_s13 + $0xf0] sm:$0xff]   ;;  %v6444_v29 = vunpack.c.l.bf16 %v6690_v14  ;;  %v6445_v30 = vunpack.c.h.bf16 %v6690_v14 }
  0x83   : > { %722 = vst [vmem:[#allocation2 + $0xa8] sm:$0xff] %v6348_v20  ;;  %723 = vst [vmem:[#allocation2 + $0xb0] sm:$0xff] %v6349_v21  ;;  %v6692_v20 = vld [vmem:[%s8033_s13 + $0xf8] sm:$0xff]   ;;  %v6432_v21 = vunpack.c.l.bf16 %v6687_v7 }
  0x84   : > { %724 = vst [vmem:[#allocation2 + $0xc8] sm:$0xff] %v6352_v25  ;;  %725 = vst [vmem:[#allocation2 + $0xd0] sm:$0xff] %v6353_v26  ;;  %v6693_v25 = vld [vmem:[%s8033_s13 + $0x100] sm:$0xff]   ;;  %v6694_v26 = vld [vmem:[%s8033_s13 + $0x108] sm:$0xff]   ;;  %v6452_v35 = vunpack.c.l.bf16 %v6692_v20  ;;  %v6453_v36 = vunpack.c.h.bf16 %v6692_v20 }
  0x85   : > { %726 = vst [vmem:[#allocation2 + $0xd8] sm:$0xff] %v6356_v27  ;;  %727 = vst [vmem:[#allocation2 + $0xe0] sm:$0xff] %v6357_v28  ;;  %v6440_v27 = vunpack.c.l.bf16 %v6689_v13  ;;  %v6441_v28 = vunpack.c.h.bf16 %v6689_v13  ;;  %v6460_v41 = vunpack.c.l.bf16 %v6694_v26  ;;  %v6461_v42 = vunpack.c.h.bf16 %v6694_v26 }
  0x86   : > { %728 = vst [vmem:[#allocation2 + $0xf8] sm:$0xff] %v6360_v31  ;;  %729 = vst [vmem:[#allocation2 + $0x100] sm:$0xff] %v6361_v32  ;;  %v6695_v31 = vld [vmem:[%s8033_s13 + $0x110] sm:$0xff]   ;;  %v6696_v32 = vld [vmem:[%s8033_s13 + $0x118] sm:$0xff]  }
  0x87   : > { %730 = vst [vmem:[#allocation2 + $0x108] sm:$0xff] %v6364_v33  ;;  %731 = vst [vmem:[#allocation2 + $0x110] sm:$0xff] %v6365_v34  ;;  %v6448_v33 = vunpack.c.l.bf16 %v6691_v19  ;;  %v6449_v34 = vunpack.c.h.bf16 %v6691_v19  ;;  %v6468_v47 = vunpack.c.l.bf16 %v6696_v32  ;;  %v6469_v48 = vunpack.c.h.bf16 %v6696_v32 }
  0x88   : > { %732 = vst [vmem:[#allocation2 + $0x128] sm:$0xff] %v6368_v37  ;;  %733 = vst [vmem:[#allocation2 + $0x130] sm:$0xff] %v6369_v38  ;;  %v6697_v37 = vld [vmem:[%s8033_s13 + $0x120] sm:$0xff]   ;;  %v6698_v38 = vld [vmem:[%s8033_s13 + $0x128] sm:$0xff]  }
  0x89   : > { %734 = vst [vmem:[#allocation2 + $0x138] sm:$0xff] %v6372_v39  ;;  %735 = vst [vmem:[#allocation2 + $0x140] sm:$0xff] %v6373_v40  ;;  %v6456_v39 = vunpack.c.l.bf16 %v6693_v25  ;;  %v6457_v40 = vunpack.c.h.bf16 %v6693_v25  ;;  %v6476_v53 = vunpack.c.l.bf16 %v6698_v38  ;;  %v6477_v54 = vunpack.c.h.bf16 %v6698_v38 }
  0x8a   : > { %736 = vst [vmem:[#allocation2 + $0x158] sm:$0xff] %v6376_v43  ;;  %737 = vst [vmem:[#allocation2 + $0x160] sm:$0xff] %v6377_v44  ;;  %v6699_v43 = vld [vmem:[%s8033_s13 + $0x130] sm:$0xff]   ;;  %v6700_v44 = vld [vmem:[%s8033_s13 + $0x138] sm:$0xff]  }
  0x8b   : > { %738 = vst [vmem:[#allocation2 + $0x168] sm:$0xff] %v6380_v45  ;;  %739 = vst [vmem:[#allocation2 + $0x170] sm:$0xff] %v6381_v46  ;;  %v6464_v45 = vunpack.c.l.bf16 %v6695_v31  ;;  %v6465_v46 = vunpack.c.h.bf16 %v6695_v31  ;;  %v6484_v59 = vunpack.c.l.bf16 %v6700_v44  ;;  %v6485_v60 = vunpack.c.h.bf16 %v6700_v44 }
  0x8c   : > { %740 = vst [vmem:[#allocation2 + $0x188] sm:$0xff] %v6384_v49  ;;  %741 = vst [vmem:[#allocation2 + $0x190] sm:$0xff] %v6385_v50  ;;  %v6701_v49 = vld [vmem:[%s8033_s13 + $0x140] sm:$0xff]   ;;  %v6702_v50 = vld [vmem:[%s8033_s13 + $0x148] sm:$0xff]  }
  0x8d   : > { %742 = vst [vmem:[#allocation2 + $0x198] sm:$0xff] %v6388_v51  ;;  %743 = vst [vmem:[#allocation2 + $0x1a0] sm:$0xff] %v6389_v52  ;;  %v6472_v51 = vunpack.c.l.bf16 %v6697_v37  ;;  %v6473_v52 = vunpack.c.h.bf16 %v6697_v37  ;;  %v6492_v1 = vunpack.c.l.bf16 %v6702_v50  ;;  %v6493_v2 = vunpack.c.h.bf16 %v6702_v50 }
  0x8e   : > { %744 = vst [vmem:[#allocation2 + $0x1b8] sm:$0xff] %v6392_v55  ;;  %745 = vst [vmem:[#allocation2 + $0x1c0] sm:$0xff] %v6393_v56  ;;  %v6703_v55 = vld [vmem:[%s8033_s13 + $0x150] sm:$0xff]   ;;  %v6704_v56 = vld [vmem:[%s8033_s13 + $0x158] sm:$0xff]  }
  0x8f   : > { %746 = vst [vmem:[#allocation2 + $0x1c8] sm:$0xff] %v6396_v57  ;;  %747 = vst [vmem:[#allocation2 + $0x1d0] sm:$0xff] %v6397_v58  ;;  %v6480_v57 = vunpack.c.l.bf16 %v6699_v43  ;;  %v6481_v58 = vunpack.c.h.bf16 %v6699_v43  ;;  %v6500_v7 = vunpack.c.l.bf16 %v6704_v56  ;;  %v6501_v8 = vunpack.c.h.bf16 %v6704_v56 }
  0x90   : > { %748 = vst [vmem:[#allocation2 + $0x1e8] sm:$0xff] %v6400_v61  ;;  %749 = vst [vmem:[#allocation2 + $0x1f0] sm:$0xff] %v6401_v62  ;;  %v6705_v61 = vld [vmem:[%s8033_s13 + $0x160] sm:$0xff]   ;;  %v6706_v62 = vld [vmem:[%s8033_s13 + $0x168] sm:$0xff]  }
  0x91   : > { %750 = vst [vmem:[#allocation2 + $0x1f8] sm:$0xff] %v6404_v63  ;;  %751 = vst [vmem:[#allocation2 + $0x200] sm:$0xff] %v6405_v0  ;;  %v6488_v63 = vunpack.c.l.bf16 %v6701_v49  ;;  %v6489_v0 = vunpack.c.h.bf16 %v6701_v49  ;;  %v6508_v13 = vunpack.c.l.bf16 %v6706_v62  ;;  %v6509_v14 = vunpack.c.h.bf16 %v6706_v62 }
  0x92   : > { %752 = vst [vmem:[#allocation2 + $0x218] sm:$0xff] %v6408_v3  ;;  %753 = vst [vmem:[#allocation2 + $0x220] sm:$0xff] %v6409_v4  ;;  %v6707_v3 = vld [vmem:[%s8033_s13 + $0x170] sm:$0xff]   ;;  %v6708_v4 = vld [vmem:[%s8033_s13 + $0x178] sm:$0xff]  }
  0x93   : > { %754 = vst [vmem:[#allocation2 + $0x228] sm:$0xff] %v6412_v5  ;;  %755 = vst [vmem:[#allocation2 + $0x230] sm:$0xff] %v6413_v6  ;;  %v6496_v5 = vunpack.c.l.bf16 %v6703_v55  ;;  %v6497_v6 = vunpack.c.h.bf16 %v6703_v55  ;;  %v6516_v19 = vunpack.c.l.bf16 %v6708_v4  ;;  %v6517_v20 = vunpack.c.h.bf16 %v6708_v4 }
  0x94   : > { %756 = vst [vmem:[#allocation2 + $0x248] sm:$0xff] %v6416_v9  ;;  %757 = vst [vmem:[#allocation2 + $0x250] sm:$0xff] %v6417_v10  ;;  %v6709_v9 = vld [vmem:[%s8033_s13 + $0x180] sm:$0xff]   ;;  %v6710_v10 = vld [vmem:[%s8033_s13 + $0x188] sm:$0xff]  }
  0x95   : > { %758 = vst [vmem:[#allocation2 + $0x258] sm:$0xff] %v6420_v11  ;;  %759 = vst [vmem:[#allocation2 + $0x260] sm:$0xff] %v6421_v12  ;;  %v6504_v11 = vunpack.c.l.bf16 %v6705_v61  ;;  %v6505_v12 = vunpack.c.h.bf16 %v6705_v61  ;;  %v6524_v25 = vunpack.c.l.bf16 %v6710_v10  ;;  %v6525_v26 = vunpack.c.h.bf16 %v6710_v10 }
  0x96   : > { %760 = vst [vmem:[#allocation2 + $0x278] sm:$0xff] %v6424_v15  ;;  %761 = vst [vmem:[#allocation2 + $0x280] sm:$0xff] %v6425_v16  ;;  %v6711_v15 = vld [vmem:[%s8033_s13 + $0x190] sm:$0xff]   ;;  %v6712_v16 = vld [vmem:[%s8033_s13 + $0x198] sm:$0xff]  }
  0x97   : > { %762 = vst [vmem:[#allocation2 + $0x288] sm:$0xff] %v6428_v17  ;;  %763 = vst [vmem:[#allocation2 + $0x290] sm:$0xff] %v6429_v18  ;;  %v6512_v17 = vunpack.c.l.bf16 %v6707_v3  ;;  %v6513_v18 = vunpack.c.h.bf16 %v6707_v3  ;;  %v6532_v31 = vunpack.c.l.bf16 %v6712_v16  ;;  %v6533_v32 = vunpack.c.h.bf16 %v6712_v16 }
  0x98   : > { %764 = vst [vmem:[#allocation2 + $0x2a8] sm:$0xff] %v6432_v21  ;;  %765 = vst [vmem:[#allocation2 + $0x2b0] sm:$0xff] %v6433_v22  ;;  %v6713_v21 = vld [vmem:[%s8033_s13 + $0x1a0] sm:$0xff]   ;;  %v6714_v22 = vld [vmem:[%s8033_s13 + $0x1a8] sm:$0xff]  }
  0x99   : > { %766 = vst [vmem:[#allocation2 + $0x2b8] sm:$0xff] %v6436_v23  ;;  %767 = vst [vmem:[#allocation2 + $0x2c0] sm:$0xff] %v6437_v24  ;;  %v6520_v23 = vunpack.c.l.bf16 %v6709_v9  ;;  %v6521_v24 = vunpack.c.h.bf16 %v6709_v9  ;;  %v6540_v37 = vunpack.c.l.bf16 %v6714_v22  ;;  %v6541_v38 = vunpack.c.h.bf16 %v6714_v22 }
  0x9a   : > { %768 = vst [vmem:[#allocation2 + $0x2d8] sm:$0xff] %v6440_v27  ;;  %769 = vst [vmem:[#allocation2 + $0x2e0] sm:$0xff] %v6441_v28  ;;  %v6715_v27 = vld [vmem:[%s8033_s13 + $0x1b0] sm:$0xff]   ;;  %v6716_v28 = vld [vmem:[%s8033_s13 + $0x1b8] sm:$0xff]  }
  0x9b   : > { %770 = vst [vmem:[#allocation2 + $0x2e8] sm:$0xff] %v6444_v29  ;;  %771 = vst [vmem:[#allocation2 + $0x2f0] sm:$0xff] %v6445_v30  ;;  %v6528_v29 = vunpack.c.l.bf16 %v6711_v15  ;;  %v6529_v30 = vunpack.c.h.bf16 %v6711_v15  ;;  %v6548_v43 = vunpack.c.l.bf16 %v6716_v28  ;;  %v6549_v44 = vunpack.c.h.bf16 %v6716_v28 }
  0x9c   : > { %772 = vst [vmem:[#allocation2 + $0x308] sm:$0xff] %v6448_v33  ;;  %773 = vst [vmem:[#allocation2 + $0x310] sm:$0xff] %v6449_v34  ;;  %v6717_v33 = vld [vmem:[%s8033_s13 + $0x1c0] sm:$0xff]   ;;  %v6718_v34 = vld [vmem:[%s8033_s13 + $0x1c8] sm:$0xff]  }
  0x9d   : > { %774 = vst [vmem:[#allocation2 + $0x318] sm:$0xff] %v6452_v35  ;;  %775 = vst [vmem:[#allocation2 + $0x320] sm:$0xff] %v6453_v36  ;;  %v6536_v35 = vunpack.c.l.bf16 %v6713_v21  ;;  %v6537_v36 = vunpack.c.h.bf16 %v6713_v21  ;;  %v6556_v49 = vunpack.c.l.bf16 %v6718_v34  ;;  %v6557_v50 = vunpack.c.h.bf16 %v6718_v34 }
  0x9e   : > { %776 = vst [vmem:[#allocation2 + $0x338] sm:$0xff] %v6456_v39  ;;  %777 = vst [vmem:[#allocation2 + $0x340] sm:$0xff] %v6457_v40  ;;  %v6719_v39 = vld [vmem:[%s8033_s13 + $0x1d0] sm:$0xff]   ;;  %v6720_v40 = vld [vmem:[%s8033_s13 + $0x1d8] sm:$0xff]  }
  0x9f   : > { %778 = vst [vmem:[#allocation2 + $0x348] sm:$0xff] %v6460_v41  ;;  %779 = vst [vmem:[#allocation2 + $0x350] sm:$0xff] %v6461_v42  ;;  %v6544_v41 = vunpack.c.l.bf16 %v6715_v27  ;;  %v6545_v42 = vunpack.c.h.bf16 %v6715_v27  ;;  %v6564_v55 = vunpack.c.l.bf16 %v6720_v40  ;;  %v6565_v56 = vunpack.c.h.bf16 %v6720_v40 }
  0xa0   : > { %780 = vst [vmem:[#allocation2 + $0x368] sm:$0xff] %v6464_v45  ;;  %781 = vst [vmem:[#allocation2 + $0x370] sm:$0xff] %v6465_v46  ;;  %v6721_v45 = vld [vmem:[%s8033_s13 + $0x1e0] sm:$0xff]   ;;  %v6722_v46 = vld [vmem:[%s8033_s13 + $0x1e8] sm:$0xff]  }
  0xa1   : > { %782 = vst [vmem:[#allocation2 + $0x378] sm:$0xff] %v6468_v47  ;;  %783 = vst [vmem:[#allocation2 + $0x380] sm:$0xff] %v6469_v48  ;;  %v6552_v47 = vunpack.c.l.bf16 %v6717_v33  ;;  %v6553_v48 = vunpack.c.h.bf16 %v6717_v33 }
  0xa2   : > { %784 = vst [vmem:[#allocation2 + $0x398] sm:$0xff] %v6472_v51  ;;  %785 = vst [vmem:[#allocation2 + $0x3a0] sm:$0xff] %v6473_v52  ;;  %v6723_v51 = vld [vmem:[%s8033_s13 + $0x1f0] sm:$0xff]   ;;  %v6724_v52 = vld [vmem:[%s8033_s13 + $0x1f8] sm:$0xff]  }
  0xa3   : > { %786 = vst [vmem:[#allocation2 + $0x3a8] sm:$0xff] %v6476_v53  ;;  %787 = vst [vmem:[#allocation2 + $0x3b0] sm:$0xff] %v6477_v54  ;;  %v6560_v53 = vunpack.c.l.bf16 %v6719_v39  ;;  %v6561_v54 = vunpack.c.h.bf16 %v6719_v39  ;;  %v6576_v61 = vunpack.c.l.bf16 %v6723_v51  ;;  %v6577_v62 = vunpack.c.h.bf16 %v6723_v51 }
  0xa4   : > { %788 = vst [vmem:[#allocation2 + $0x3c8] sm:$0xff] %v6480_v57  ;;  %789 = vst [vmem:[#allocation2 + $0x3d0] sm:$0xff] %v6481_v58  ;;  %v6568_v57 = vunpack.c.l.bf16 %v6721_v45  ;;  %v6569_v58 = vunpack.c.h.bf16 %v6721_v45 }
  0xa5   : > { %790 = vst [vmem:[#allocation2 + $0x3d8] sm:$0xff] %v6484_v59  ;;  %791 = vst [vmem:[#allocation2 + $0x3e0] sm:$0xff] %v6485_v60  ;;  %v6572_v59 = vunpack.c.l.bf16 %v6722_v46  ;;  %v6573_v60 = vunpack.c.h.bf16 %v6722_v46 }
  0xa6   : > { %792 = vst [vmem:[#allocation2 + $0x3f8] sm:$0xff] %v6488_v63  ;;  %793 = vst [vmem:[#allocation2 + $0x400] sm:$0xff] %v6489_v0  ;;  %v6580_v63 = vunpack.c.l.bf16 %v6724_v52  ;;  %v6581_v0 = vunpack.c.h.bf16 %v6724_v52 }
  0xa7   : > { %794 = vst [vmem:[#allocation2 + $0x408] sm:$0xff] %v6492_v1  ;;  %795 = vst [vmem:[#allocation2 + $0x410] sm:$0xff] %v6493_v2 }
  0xa8   : > { %796 = vst [vmem:[#allocation2 + $0x428] sm:$0xff] %v6496_v5  ;;  %797 = vst [vmem:[#allocation2 + $0x430] sm:$0xff] %v6497_v6 }
  0xa9   : > { %798 = vst [vmem:[#allocation2 + $0x438] sm:$0xff] %v6500_v7  ;;  %799 = vst [vmem:[#allocation2 + $0x440] sm:$0xff] %v6501_v8 }
  0xaa   : > { %800 = vst [vmem:[#allocation2 + $0x458] sm:$0xff] %v6504_v11  ;;  %801 = vst [vmem:[#allocation2 + $0x460] sm:$0xff] %v6505_v12 }
  0xab   : > { %802 = vst [vmem:[#allocation2 + $0x468] sm:$0xff] %v6508_v13  ;;  %803 = vst [vmem:[#allocation2 + $0x470] sm:$0xff] %v6509_v14 }
  0xac   : > { %804 = vst [vmem:[#allocation2 + $0x488] sm:$0xff] %v6512_v17  ;;  %805 = vst [vmem:[#allocation2 + $0x490] sm:$0xff] %v6513_v18 }
  0xad   : > { %806 = vst [vmem:[#allocation2 + $0x498] sm:$0xff] %v6516_v19  ;;  %807 = vst [vmem:[#allocation2 + $0x4a0] sm:$0xff] %v6517_v20 }
  0xae   : > { %808 = vst [vmem:[#allocation2 + $0x4b8] sm:$0xff] %v6520_v23  ;;  %809 = vst [vmem:[#allocation2 + $0x4c0] sm:$0xff] %v6521_v24 }
  0xaf   : > { %810 = vst [vmem:[#allocation2 + $0x4c8] sm:$0xff] %v6524_v25  ;;  %811 = vst [vmem:[#allocation2 + $0x4d0] sm:$0xff] %v6525_v26 }
  0xb0   : > { %812 = vst [vmem:[#allocation2 + $0x4e8] sm:$0xff] %v6528_v29  ;;  %813 = vst [vmem:[#allocation2 + $0x4f0] sm:$0xff] %v6529_v30 }
  0xb1   : > { %814 = vst [vmem:[#allocation2 + $0x4f8] sm:$0xff] %v6532_v31  ;;  %815 = vst [vmem:[#allocation2 + $0x500] sm:$0xff] %v6533_v32 }
  0xb2   : > { %816 = vst [vmem:[#allocation2 + $0x518] sm:$0xff] %v6536_v35  ;;  %817 = vst [vmem:[#allocation2 + $0x520] sm:$0xff] %v6537_v36 }
  0xb3   : > { %818 = vst [vmem:[#allocation2 + $0x528] sm:$0xff] %v6540_v37  ;;  %819 = vst [vmem:[#allocation2 + $0x530] sm:$0xff] %v6541_v38 }
  0xb4   : > { %820 = vst [vmem:[#allocation2 + $0x548] sm:$0xff] %v6544_v41  ;;  %821 = vst [vmem:[#allocation2 + $0x550] sm:$0xff] %v6545_v42 }
  0xb5   : > { %822 = vst [vmem:[#allocation2 + $0x558] sm:$0xff] %v6548_v43  ;;  %823 = vst [vmem:[#allocation2 + $0x560] sm:$0xff] %v6549_v44 }
  0xb6   : > { %824 = vst [vmem:[#allocation2 + $0x578] sm:$0xff] %v6552_v47  ;;  %825 = vst [vmem:[#allocation2 + $0x580] sm:$0xff] %v6553_v48 }
  0xb7   : > { %826 = vst [vmem:[#allocation2 + $0x588] sm:$0xff] %v6556_v49  ;;  %827 = vst [vmem:[#allocation2 + $0x590] sm:$0xff] %v6557_v50 }
  0xb8   : > { %828 = vst [vmem:[#allocation2 + $0x5a8] sm:$0xff] %v6560_v53  ;;  %829 = vst [vmem:[#allocation2 + $0x5b0] sm:$0xff] %v6561_v54 }
  0xb9   : > { %830 = vst [vmem:[#allocation2 + $0x5b8] sm:$0xff] %v6564_v55  ;;  %831 = vst [vmem:[#allocation2 + $0x5c0] sm:$0xff] %v6565_v56 }
  0xba   : > { %832 = vst [vmem:[#allocation2 + $0x5d8] sm:$0xff] %v6568_v57  ;;  %833 = vst [vmem:[#allocation2 + $0x5e0] sm:$0xff] %v6569_v58 }
  0xbb   : > { %834 = vst [vmem:[#allocation2 + $0x5e8] sm:$0xff] %v6572_v59  ;;  %835 = vst [vmem:[#allocation2 + $0x5f0] sm:$0xff] %v6573_v60 }
  0xbc   : > { %836 = vst [vmem:[#allocation2 + $0x608] sm:$0xff] %v6576_v61  ;;  %837 = vst [vmem:[#allocation2 + $0x610] sm:$0xff] %v6577_v62 }
  0xbd   : > { %838 = vst [vmem:[#allocation2 + $0x618] sm:$0xff] %v6580_v63  ;;  %839 = vst [vmem:[#allocation2 + $0x620] sm:$0xff] %v6581_v0 }
  0xbe PF: > { %v7394_v1 = vld [vmem:[#allocation7 + $0x78] sm:$0xff]   ;;  %v7396_v3 = vld [vmem:[#allocation7 + $0x70] sm:$0xff]   ;;  %v7398_v5 = vld [vmem:[#allocation7 + $0x68] sm:$0xff]   ;;  %s5262_s28 = smul.u32 384, %s7836_s21  ;;  %s6325_s1 = sshll.u32 %s7836_s21, 5 }
  0xbf   : > { %v7395_v2 = vld [vmem:[#allocation7 + $0x38] sm:$0xff]   ;;  %6740 = vmatprep.subr.bf16.mxu0 %v7394_v1  ;;  %7260 = vmatprep.subr.bf16.mxu1 %v7394_v1  ;;  %v7397_v4 = vld [vmem:[#allocation7 + $0x30] sm:$0xff]   ;;  %v7399_v6 = vld [vmem:[#allocation7 + $0x28] sm:$0xff]   ;;  %s6000_s23 = sshll.u32 %s7840_s22, 7  ;;  %s9044_s4 = sld [smem:[#allocation15_spill]] }
  0xc0   : > { %6741 = vmatpush3.bf16.msra.mxu0 %v7395_v2  ;;  %7268 = vmatpush3.bf16.msra.mxu1 %v7395_v2  ;;  %v7400_v7 = vld [vmem:[#allocation7 + $0x60] sm:$0xff]   ;;  %v7402_v9 = vld [vmem:[#allocation7 + $0x58] sm:$0xff]   ;;  %v7404_v11 = vld [vmem:[#allocation7 + $0x50] sm:$0xff]   ;;  %s8202_s30 = scalar_lea.vmem [#allocation2], %s5262_s28  ;;  %s5138_s6 = sadd.s32 %s6325_s1, %s6000_s23 }
  0xc1   : > { %6742 = vmatprep.subr.bf16.mxu0 %v7396_v3  ;;  %7261 = vmatprep.subr.bf16.mxu1 %v7396_v3  ;;  %v7401_v8 = vld [vmem:[#allocation7 + $0x20] sm:$0xff]   ;;  %v7403_v10 = vld [vmem:[#allocation7 + $0x18] sm:$0xff]   ;;  %v7405_v26 = vld [vmem:[#allocation7 + $0x10] sm:$0xff]   ;;  %s6001_s12 = sshll.u32 %s5138_s6, 6  ;;  %s5141_s8 = sshll.u32 %s8046_s7, 4  ;;  %s8926_s8 = int_to_ptr.vmem [resolvable:$true] %s5141_s8 }
  0xc2   : > { %v7406_v29 = vld [vmem:[#allocation7 + $0x48] sm:$0xff]   ;;  %v7408_v31 = vld [vmem:[#allocation7 + $0x40] sm:$0xff]   ;;  %v7416_v38 = vld [vmem:[#allocation7 + $0xf8] sm:$0xff]   ;;  %s9045_s9 = sld [smem:[#allocation29_spill]]  ;;  %s8931_s13 = scalar_lea.sflag [#allocation6], %s242_s15 }
  0xc3   : > { %v7407_v30 = vld [vmem:[#allocation7 + $0x8] sm:$0xff]   ;;  %v7409_v33 = vld [vmem:[#allocation7] sm:$0xff]   ;;  %v7419_v45 = vld [vmem:[#allocation7 + $0x178] sm:$0xff]   ;;  %s7728_s5 = scalar_lea.vmem %s8926_s8, 2048  ;;  %s7859_s28 = smov [#allocation9]  }
  0xc4   : > { %6743 = vmatpush3.bf16.msra.mxu0 %v7397_v4  ;;  %7269 = vmatpush3.bf16.msra.mxu1 %v7397_v4  ;;  %v843_v12 = vld [vmem:[%s8202_s30 + $0x7] sm:$0xff]  ;;  %v844_v13 = vld [vmem:[%s8202_s30 + $0xf] sm:$0xff]  ;;  %v845_v32 = vld [vmem:[%s8202_s30 + $0x17] sm:$0xff]  ;;  %p7729_p1 = scmp.ne.s32.totalorder %s8926_s8, %s7728_s5 }
  0xc5   : > { %6744 = vmatprep.subr.bf16.mxu0 %v7398_v5  ;;  %7262 = vmatprep.subr.bf16.mxu1 %v7398_v5  ;;  %v1035_v14 = vld [vmem:[%s8202_s30 + $0x8] sm:$0xff]  ;;  %v6005_v15 = vpack.c.bf16 %v843_v12, %v843_v12  ;;  %v6006_v16 = vpack.c.bf16 %v844_v13, %v844_v13  ;;  %v1036_v17 = vld [vmem:[%s8202_s30 + $0x10] sm:$0xff]  ;;  %v846_v34 = vld [vmem:[%s8202_s30 + $0x1f] sm:$0xff]  ;;  %v6007_v35 = vpack.c.bf16 %v845_v32, %v845_v32  ;;  %p9046_p3 = scmp.ne.s32.totalorder %s9044_s4, 0 }
  0xc6   : > { %v6037_v18 = vpack.c.bf16 %v1035_v14, %v1035_v14  ;;  %v867_v19 = vld [vmem:[%s8202_s30 + $0x127] sm:$0xff]  ;;  %v868_v20 = vld [vmem:[%s8202_s30 + $0x12f] sm:$0xff]  ;;  %v6038_v21 = vpack.c.bf16 %v1036_v17, %v1036_v17  ;;  %v1037_v36 = vld [vmem:[%s8202_s30 + $0x18] sm:$0xff]  ;;  %v6008_v39 = vpack.c.bf16 %v846_v34, %v846_v34 }
  0xc7   : > { %v6029_v22 = vpack.c.bf16 %v867_v19, %v867_v19  ;;  %v6030_v23 = vpack.c.bf16 %v868_v20, %v868_v20  ;;  %v1059_v24 = vld [vmem:[%s8202_s30 + $0x128] sm:$0xff]  ;;  %v1060_v25 = vld [vmem:[%s8202_s30 + $0x130] sm:$0xff]  ;;  %1003 = vst [vmem:[#allocation3] sm:$0xf] %v6005_v15  ;;  %1004 = vst [vmem:[#allocation3 + $0x24] sm:$0xf] %v6006_v16  ;;  %v6039_v40 = vpack.c.bf16 %v1037_v36, %v1037_v36  ;;  %p7730_p0 = pnand %p7729_p1, %p9046_p3 }
  0xc8   : > { %6745 = vmatpush3.bf16.msra.mxu0 %v7399_v6  ;;  %7270 = vmatpush3.bf16.msra.mxu1 %v7399_v6  ;;  %1195 = vst [vmem:[#allocation3 + $0x4] sm:$0xf] %v6037_v18  ;;  %v6061_v27 = vpack.c.bf16 %v1059_v24, %v1059_v24  ;;  %v6062_v28 = vpack.c.bf16 %v1060_v25, %v1060_v25  ;;  %1196 = vst [vmem:[#allocation3 + $0x28] sm:$0xf] %v6038_v21  ;;  %v1038_v37 = vld [vmem:[%s8202_s30 + $0x20] sm:$0xff]  ;;  %v869_v42 = vld [vmem:[%s8202_s30 + $0x137] sm:$0xff]  ;;  %s8924_s10 = scalar_lea.hbm %s9045_s9, %s6001_s12 }
  0xc9   : > { %6746 = vmatprep.subr.bf16.mxu0 %v7400_v7  ;;  %7263 = vmatprep.subr.bf16.mxu1 %v7400_v7  ;;  %1027 = vst [vmem:[#allocation3 + $0x360] sm:$0xf] %v6029_v22  ;;  %1028 = vst [vmem:[#allocation3 + $0x384] sm:$0xf] %v6030_v23  ;;  %v6040_v41 = vpack.c.bf16 %v1038_v37, %v1038_v37  ;;  %v870_v43 = vld [vmem:[%s8202_s30 + $0x13f] sm:$0xff]  ;;  %v6031_v46 = vpack.c.bf16 %v869_v42, %v869_v42  ;;  %v7418_v57 = vld [vmem:[#allocation7 + $0xf0] sm:$0xff]   ;;  %p7731_p13 = pneg %p7730_p0 }
  0xca   : > { %1219 = vst [vmem:[#allocation3 + $0x364] sm:$0xf] %v6061_v27  ;;  %1220 = vst [vmem:[#allocation3 + $0x388] sm:$0xf] %v6062_v28  ;;  %v6032_v47 = vpack.c.bf16 %v870_v43, %v870_v43  ;;  %v7417_v50 = vld [vmem:[#allocation7 + $0xb8] sm:$0xff]   ;;  %v1062_v52 = vld [vmem:[%s8202_s30 + $0x140] sm:$0xff] }
  0xcb   : > { %1005 = vst [vmem:[#allocation3 + $0x48] sm:$0xf] %v6007_v35  ;;  %1006 = vst [vmem:[#allocation3 + $0x6c] sm:$0xf] %v6008_v39  ;;  %v1061_v51 = vld [vmem:[%s8202_s30 + $0x138] sm:$0xff]  ;;  %v6064_v55 = vpack.c.bf16 %v1062_v52, %v1062_v52  ;;  %v7420_v58 = vld [vmem:[#allocation7 + $0xb0] sm:$0xff]  }
  0xcc   : > { %6747 = vmatpush3.bf16.msra.mxu0 %v7401_v8  ;;  %7271 = vmatpush3.bf16.msra.mxu1 %v7401_v8  ;;  %1197 = vst [vmem:[#allocation3 + $0x4c] sm:$0xf] %v6039_v40  ;;  %1198 = vst [vmem:[#allocation3 + $0x70] sm:$0xf] %v6040_v41  ;;  %v6063_v54 = vpack.c.bf16 %v1061_v51, %v1061_v51  ;;  %v7421_v56 = vld [vmem:[#allocation7 + $0x138] sm:$0xff]   ;;  %v7428_v2 = vld [vmem:[#allocation7 + $0xe8] sm:$0xff]  }
  0xcd   : > { %6748 = vmatprep.subr.bf16.mxu0 %v7402_v9  ;;  %7264 = vmatprep.subr.bf16.mxu1 %v7402_v9  ;;  %1029 = vst [vmem:[#allocation3 + $0x3a8] sm:$0xf] %v6031_v46  ;;  %1030 = vst [vmem:[#allocation3 + $0x3cc] sm:$0xf] %v6032_v47  ;;  %v847_v59 = vld [vmem:[%s8202_s30 + $0x37] sm:$0xff]  ;;  %v848_v60 = vld [vmem:[%s8202_s30 + $0x3f] sm:$0xff] }
  0xce   : > { %v7410_v48 = vld [vmem:[#allocation3] ss:$36 sps:$4 sm:$0xff]   ;;  %1221 = vst [vmem:[#allocation3 + $0x3ac] sm:$0xf] %v6063_v54  ;;  %1222 = vst [vmem:[#allocation3 + $0x3d0] sm:$0xf] %v6064_v55  ;;  %v6009_v63 = vpack.c.bf16 %v847_v59, %v847_v59  ;;  %v6010_v0 = vpack.c.bf16 %v848_v60, %v848_v60 }
  0xcf   : > { %v7412_v44 = vld [vmem:[#allocation3 + $0x4] ss:$36 sps:$4 sm:$0xff]   ;;  %v1039_v61 = vld [vmem:[%s8202_s30 + $0x38] sm:$0xff]  ;;  %v7439_v18 = vld [vmem:[#allocation7 + $0x170] sm:$0xff]  }
  0xd0   : > { %6749 = vmatpush3.bf16.msra.mxu0 %v7403_v10  ;;  %7272 = vmatpush3.bf16.msra.mxu1 %v7403_v10  ;;  %v7413_v53 = vld [vmem:[#allocation3 + $0x360] ss:$36 sps:$4 sm:$0xff]   ;;  %v6041_v1 = vpack.c.bf16 %v1039_v61, %v1039_v61  ;;  %v871_v4 = vld [vmem:[%s8202_s30 + $0x157] sm:$0xff]  ;;  %v7429_v5 = vld [vmem:[#allocation7 + $0xa8] sm:$0xff]   ;;  %1007 = vst [vmem:[#allocation3 + $0x90] sm:$0xf] %v6009_v63 }
  0xd1   : > { %6750 = vmatprep.subr.bf16.mxu0 %v7404_v11  ;;  %7265 = vmatprep.subr.bf16.mxu1 %v7404_v11  ;;  %v7415_v49 = vld [vmem:[#allocation3 + $0x364] ss:$36 sps:$4 sm:$0xff]   ;;  %1008 = vst [vmem:[#allocation3 + $0xb4] sm:$0xf] %v6010_v0  ;;  %v6033_v8 = vpack.c.bf16 %v871_v4, %v871_v4  ;;  %v1063_v9 = vld [vmem:[%s8202_s30 + $0x158] sm:$0xff]  ;;  %v7441_v20 = vld [vmem:[#allocation7 + $0x130] sm:$0xff]  }
  0xd2   : > { %4081 = vmatprep.mubr.bf16.mxu0 %v7412_v44  ;;  %4177 = vmatprep.mubr.bf16.mxu1 %v7415_v49  ;;  %v1040_v3 = vld [vmem:[%s8202_s30 + $0x40] sm:$0xff]  ;;  %1199 = vst [vmem:[#allocation3 + $0x94] sm:$0xf] %v6041_v1  ;;  %1582 = vst [vmem:[#allocation3 + $0xc] sm:$0xf] %v6009_v63  ;;  %v6065_v14 = vpack.c.bf16 %v1063_v9, %v1063_v9  ;;  %v7438_v21 = vld [vmem:[#allocation7 + $0xd8] sm:$0xff]  }
  0xd3   : > { %v7422_v62 = vld [vmem:[#allocation3 + $0x4c] ss:$36 sps:$4 sm:$0xff]   ;;  %v6042_v6 = vpack.c.bf16 %v1040_v3, %v1040_v3  ;;  %v872_v7 = vld [vmem:[%s8202_s30 + $0x15f] sm:$0xff]  ;;  %1583 = vst [vmem:[#allocation3 + $0x30] sm:$0xf] %v6010_v0  ;;  %v853_v4 = vld [vmem:[%s8202_s30 + $0x77] sm:$0xff] }
  0xd4   : > { %6751 = vmatpush3.bf16.msra.mxu0 %v7405_v26  ;;  %7273 = vmatpush3.bf16.msra.mxu1 %v7405_v26  ;;  %v1064_v10 = vld [vmem:[%s8202_s30 + $0x160] sm:$0xff]  ;;  %1774 = vst [vmem:[#allocation3 + $0x10] sm:$0xf] %v6041_v1  ;;  %v7426_v11 = vld [vmem:[#allocation3 + $0x48] ss:$36 sps:$4 sm:$0xff]   ;;  %v6034_v13 = vpack.c.bf16 %v872_v7, %v872_v7  ;;  %v7440_v22 = vld [vmem:[#allocation7 + $0x98] sm:$0xff]  }
  0xd5   : > { %6752 = vmatprep.subr.bf16.mxu0 %v7406_v29  ;;  %7266 = vmatprep.subr.bf16.mxu1 %v7406_v29  ;;  %v7430_v12 = vld [vmem:[#allocation7 + $0xe0] sm:$0xff]   ;;  %v6066_v15 = vpack.c.bf16 %v1064_v10, %v1064_v10  ;;  %v7424_v16 = vld [vmem:[#allocation3 + $0x3ac] ss:$36 sps:$4 sm:$0xff]   ;;  %1200 = vst [vmem:[#allocation3 + $0xb8] sm:$0xf] %v6042_v6  ;;  %v7462_v3 = vld [vmem:[#allocation7 + $0x1f8] sm:$0xff]  }
  0xd6   : > { %1031 = vst [vmem:[#allocation3 + $0x3f0] sm:$0xf] %v6033_v8  ;;  %1775 = vst [vmem:[#allocation3 + $0x34] sm:$0xf] %v6042_v6  ;;  %v7427_v17 = vld [vmem:[#allocation3 + $0x3a8] ss:$36 sps:$4 sm:$0xff]   ;;  %v6015_v6 = vpack.c.bf16 %v853_v4, %v853_v4 }
  0xd7   : > { %1032 = vst [vmem:[#allocation3 + $0x414] sm:$0xf] %v6034_v13  ;;  %1223 = vst [vmem:[#allocation3 + $0x3f4] sm:$0xf] %v6065_v14  ;;  %v7431_v19 = vld [vmem:[#allocation7 + $0xa0] sm:$0xff]   ;;  %v7442_v26 = vld [vmem:[#allocation7 + $0xd0] sm:$0xff]  }
  0xd8   : > { %6753 = vmatpush3.bf16.msra.mxu0 %v7407_v30  ;;  %7274 = vmatpush3.bf16.msra.mxu1 %v7407_v30  ;;  %1224 = vst [vmem:[#allocation3 + $0x418] sm:$0xf] %v6066_v15  ;;  %v849_v23 = vld [vmem:[%s8202_s30 + $0x47] sm:$0xff]  ;;  %v7436_v25 = vld [vmem:[#allocation3 + $0x90] ss:$36 sps:$4 sm:$0xff]   ;;  %v1045_v8 = vld [vmem:[%s8202_s30 + $0x78] sm:$0xff] }
  0xd9   : > { %6754 = vmatprep.subr.bf16.mxu0 %v7408_v31  ;;  %7267 = vmatprep.subr.bf16.mxu1 %v7408_v31  ;;  %v6011_v27 = vpack.c.bf16 %v849_v23, %v849_v23  ;;  %v850_v30 = vld [vmem:[%s8202_s30 + $0x4f] sm:$0xff]  ;;  %v873_v35 = vld [vmem:[%s8202_s30 + $0x167] sm:$0xff]  ;;  %v1229_v10 = vld [vmem:[%s8202_s30 + $0x19] sm:$0xff]  ;;  %1013 = vst [vmem:[#allocation3 + $0x168] sm:$0xf] %v6015_v6 }
  0xda   : > { %v1041_v31 = vld [vmem:[%s8202_s30 + $0x48] sm:$0xff]  ;;  %v6012_v32 = vpack.c.bf16 %v850_v30, %v850_v30  ;;  %v1066_v41 = vld [vmem:[%s8202_s30 + $0x170] sm:$0xff]  ;;  %v7454_v55 = vld [vmem:[#allocation7 + $0x80] sm:$0xff]   ;;  %v6071_v14 = vpack.c.bf16 %v1229_v10, %v1229_v10  ;;  %1588 = vst [vmem:[#allocation3 + $0xe4] sm:$0xf] %v6015_v6 }
  0xdb   : > { %1009 = vst [vmem:[#allocation3 + $0xd8] sm:$0xf] %v6011_v27  ;;  %1584 = vst [vmem:[#allocation3 + $0x54] sm:$0xf] %v6011_v27  ;;  %v6043_v34 = vpack.c.bf16 %v1041_v31, %v1041_v31  ;;  %v874_v36 = vld [vmem:[%s8202_s30 + $0x16f] sm:$0xff]  ;;  %v6068_v44 = vpack.c.bf16 %v1066_v41, %v1066_v41  ;;  %v1046_v9 = vld [vmem:[%s8202_s30 + $0x80] sm:$0xff] }
  0xdc   : > { %6755 = vmatpush3.bf16.msra.mxu0 %v7409_v33  ;;  %7275 = vmatpush3.bf16.msra.mxu1 %v7409_v33  ;;  %v7432_v24 = vld [vmem:[#allocation3 + $0x94] ss:$36 sps:$4 sm:$0xff]   ;;  %v6036_v39 = vpack.c.bf16 %v874_v36, %v874_v36  ;;  %v1065_v40 = vld [vmem:[%s8202_s30 + $0x168] sm:$0xff]  ;;  %1010 = vst [vmem:[#allocation3 + $0xfc] sm:$0xf] %v6012_v32 }
  0xdd   : > { %6852 = vmatprep.subr.bf16.mxu1 %v7416_v38  ;;  %6964 = vmatprep.subr.bf16.mxu0 %v7419_v45  ;;  %v1042_v33 = vld [vmem:[%s8202_s30 + $0x50] sm:$0xff]  ;;  %v6035_v38 = vpack.c.bf16 %v873_v35, %v873_v35  ;;  %1201 = vst [vmem:[#allocation3 + $0xdc] sm:$0xf] %v6043_v34  ;;  %v6067_v43 = vpack.c.bf16 %v1065_v40, %v1065_v40  ;;  %1585 = vst [vmem:[#allocation3 + $0x78] sm:$0xf] %v6012_v32  ;;  %v7450_v45 = vld [vmem:[#allocation7 + $0xc8] sm:$0xff]  }
  0xde   : > { %v7437_v29 = vld [vmem:[#allocation3 + $0x3f0] ss:$36 sps:$4 sm:$0xff]   ;;  %v6044_v37 = vpack.c.bf16 %v1042_v33, %v1042_v33  ;;  %1776 = vst [vmem:[#allocation3 + $0x58] sm:$0xf] %v6043_v34  ;;  %1034 = vst [vmem:[#allocation3 + $0x45c] sm:$0xf] %v6036_v39 }
  0xdf   : > { %4082 = vmatmul.mubr.bf16.vlgmr.msra.gmra.mxu0 %v7410_v48  ;;  %4178 = vmatmul.mubr.bf16.vlgmr.msra.gmra.mxu1 %v7413_v53  ;;  %v7434_v28 = vld [vmem:[#allocation3 + $0x3f4] ss:$36 sps:$4 sm:$0xff]   ;;  %1033 = vst [vmem:[#allocation3 + $0x438] sm:$0xf] %v6035_v38  ;;  %1225 = vst [vmem:[#allocation3 + $0x43c] sm:$0xf] %v6067_v43 }
  0xe0   : > { %6853 = vmatpush3.bf16.msra.mxu1 %v7417_v50  ;;  %6965 = vmatpush3.bf16.msra.mxu0 %v7421_v56  ;;  %v7443_v42 = vld [vmem:[#allocation7 + $0x90] sm:$0xff]   ;;  %1202 = vst [vmem:[#allocation3 + $0x100] sm:$0xf] %v6044_v37  ;;  %1777 = vst [vmem:[#allocation3 + $0x7c] sm:$0xf] %v6044_v37  ;;  %v7451_v46 = vld [vmem:[#allocation7 + $0x88] sm:$0xff]  }
  0xe1   : > { %6854 = vmatprep.subr.bf16.mxu1 %v7418_v57  ;;  %4089 = vmatprep.mubr.bf16.mxu0 %v7422_v62  ;;  %1226 = vst [vmem:[#allocation3 + $0x460] sm:$0xf] %v6068_v44  ;;  %v7453_v47 = vld [vmem:[#allocation7 + $0x168] sm:$0xff]   ;;  %v7452_v48 = vld [vmem:[#allocation7 + $0xc0] sm:$0xff]   ;;  %v1044_v54 = vld [vmem:[%s8202_s30 + $0x70] sm:$0xff] }
  0xe2   : > { %4185 = vmatprep.mubr.bf16.mxu1 %v7424_v16  ;;  %6966 = vmatprep.subr.bf16.mxu0 %v7439_v18  ;;  %v7455_v49 = vld [vmem:[#allocation7 + $0x128] sm:$0xff]   ;;  %v1228_v60 = vld [vmem:[%s8202_s30 + $0x11] sm:$0xff]  ;;  %v7470_v16 = vld [vmem:[#allocation7 + $0x160] sm:$0xff]   ;;  %1389 = vst [vmem:[#allocation3 + $0x50] sm:$0xf] %v6071_v14 }
  0xe3   : > { %v851_v50 = vld [vmem:[%s8202_s30 + $0x67] sm:$0xff]  ;;  %v852_v51 = vld [vmem:[%s8202_s30 + $0x6f] sm:$0xff]  ;;  %v7448_v62 = vld [vmem:[#allocation3 + $0xd8] ss:$36 sps:$4 sm:$0xff]   ;;  %v6070_v0 = vpack.c.bf16 %v1228_v60, %v1228_v60 }
  0xe4   : > { %6855 = vmatpush3.bf16.msra.mxu1 %v7420_v58  ;;  %6967 = vmatpush3.bf16.msra.mxu0 %v7441_v20  ;;  %v6013_v52 = vpack.c.bf16 %v851_v50, %v851_v50  ;;  %v1043_v53 = vld [vmem:[%s8202_s30 + $0x68] sm:$0xff]  ;;  %v6014_v56 = vpack.c.bf16 %v852_v51, %v852_v51  ;;  %v6046_v58 = vpack.c.bf16 %v1044_v54, %v1044_v54  ;;  %v7463_v18 = vld [vmem:[#allocation7 + $0x1b8] sm:$0xff]   ;;  %v7478_v35 = vld [vmem:[#allocation7 + $0x1f0] sm:$0xff]  }
  0xe5   : > { %6856 = vmatprep.subr.bf16.mxu1 %v7428_v2  ;;  %6968 = vmatprep.subr.bf16.mxu0 %v7453_v47  ;;  %v6045_v57 = vpack.c.bf16 %v1043_v53, %v1043_v53  ;;  %v1227_v59 = vld [vmem:[%s8202_s30 + $0x9] sm:$0xff]  ;;  %1388 = vst [vmem:[#allocation3 + $0x2c] sm:$0xf] %v6070_v0  ;;  %v1230_v13 = vld [vmem:[%s8202_s30 + $0x21] sm:$0xff]  ;;  %v855_v23 = vld [vmem:[%s8202_s30 + $0x97] sm:$0xff] }
  0xe6   : > { %1011 = vst [vmem:[#allocation3 + $0x120] sm:$0xf] %v6013_v52  ;;  %v6069_v63 = vpack.c.bf16 %v1227_v59, %v1227_v59  ;;  %1586 = vst [vmem:[#allocation3 + $0x9c] sm:$0xf] %v6013_v52  ;;  %v7449_v2 = vld [vmem:[#allocation3 + $0x438] ss:$36 sps:$4 sm:$0xff]   ;;  %v6072_v15 = vpack.c.bf16 %v1230_v13, %v1230_v13 }
  0xe7   : > { %4090 = vmatmul.mubr.bf16.gmra.mxu0 %v7426_v11  ;;  %4186 = vmatmul.mubr.bf16.gmra.mxu1 %v7427_v17  ;;  %v7444_v61 = vld [vmem:[#allocation3 + $0xdc] ss:$36 sps:$4 sm:$0xff]   ;;  %1012 = vst [vmem:[#allocation3 + $0x144] sm:$0xf] %v6014_v56  ;;  %1203 = vst [vmem:[#allocation3 + $0x124] sm:$0xf] %v6045_v57  ;;  %v6047_v11 = vpack.c.bf16 %v1045_v8, %v1045_v8 }
  0xe8   : > { %6857 = vmatpush3.bf16.msra.mxu1 %v7429_v5  ;;  %4097 = vmatprep.mubr.bf16.mxu0 %v7432_v24  ;;  %v7446_v1 = vld [vmem:[#allocation3 + $0x43c] ss:$36 sps:$4 sm:$0xff]   ;;  %1204 = vst [vmem:[#allocation3 + $0x148] sm:$0xf] %v6046_v58  ;;  %1587 = vst [vmem:[#allocation3 + $0xc0] sm:$0xf] %v6014_v56 }
  0xe9   : > { %6858 = vmatprep.subr.bf16.mxu1 %v7430_v12  ;;  %4193 = vmatprep.mubr.bf16.mxu1 %v7434_v28  ;;  %1778 = vst [vmem:[#allocation3 + $0xa0] sm:$0xf] %v6045_v57  ;;  %1779 = vst [vmem:[#allocation3 + $0xc4] sm:$0xf] %v6046_v58  ;;  %v854_v5 = vld [vmem:[%s8202_s30 + $0x7f] sm:$0xff]  ;;  %v6048_v12 = vpack.c.bf16 %v1046_v9, %v1046_v9  ;;  %v7479_v36 = vld [vmem:[#allocation7 + $0x1b0] sm:$0xff]  }
  0xea   : > { %6969 = vmatpush3.bf16.msra.mxu0 %v7455_v49  ;;  %1387 = vst [vmem:[#allocation3 + $0x8] sm:$0xf] %v6069_v63  ;;  %v6016_v7 = vpack.c.bf16 %v854_v5, %v854_v5  ;;  %1205 = vst [vmem:[#allocation3 + $0x16c] sm:$0xf] %v6047_v11  ;;  %v7460_v20 = vld [vmem:[#allocation3 + $0xc] ss:$36 sps:$4 sm:$0xff]  }
  0xeb   : > { %1206 = vst [vmem:[#allocation3 + $0x190] sm:$0xf] %v6048_v12  ;;  %1780 = vst [vmem:[#allocation3 + $0xe8] sm:$0xf] %v6047_v11  ;;  %6970 = vmatprep.subr.bf16.mxu0 %v7470_v16  ;;  %v856_v24 = vld [vmem:[%s8202_s30 + $0x9f] sm:$0xff]  ;;  %v857_v43 = vld [vmem:[%s8202_s30 + $0xa7] sm:$0xff] }
  0xec   : > { %6859 = vmatpush3.bf16.msra.mxu1 %v7431_v19  ;;  %1014 = vst [vmem:[#allocation3 + $0x18c] sm:$0xf] %v6016_v7  ;;  %1589 = vst [vmem:[#allocation3 + $0x108] sm:$0xf] %v6016_v7  ;;  %v6018_v27 = vpack.c.bf16 %v856_v24, %v856_v24  ;;  %v1048_v28 = vld [vmem:[%s8202_s30 + $0xa0] sm:$0xff]  ;;  %v7480_v41 = vld [vmem:[#allocation7 + $0x158] sm:$0xff]  }
  0xed   : > { %6860 = vmatprep.subr.bf16.mxu1 %v7438_v21  ;;  %1781 = vst [vmem:[#allocation3 + $0x10c] sm:$0xf] %v6048_v12  ;;  %1390 = vst [vmem:[#allocation3 + $0x74] sm:$0xf] %v6072_v15  ;;  %v1231_v30 = vld [vmem:[%s8202_s30 + $0x39] sm:$0xff]  ;;  %v1232_v31 = vld [vmem:[%s8202_s30 + $0x41] sm:$0xff]  ;;  %v6050_v32 = vpack.c.bf16 %v1048_v28, %v1048_v28 }
  0xee   : > { %v7461_v21 = vld [vmem:[#allocation3 + $0x120] ss:$36 sps:$4 sm:$0xff]   ;;  %v6073_v33 = vpack.c.bf16 %v1231_v30, %v1231_v30  ;;  %v6074_v34 = vpack.c.bf16 %v1232_v31, %v1232_v31  ;;  %1016 = vst [vmem:[#allocation3 + $0x1d4] sm:$0xf] %v6018_v27  ;;  %1591 = vst [vmem:[#allocation3 + $0x150] sm:$0xf] %v6018_v27 }
  0xef   : > { %4098 = vmatmul.mubr.bf16.gmra.mxu0 %v7436_v25  ;;  %4194 = vmatmul.mubr.bf16.gmra.mxu1 %v7437_v29  ;;  %v7456_v17 = vld [vmem:[#allocation3 + $0x124] ss:$36 sps:$4 sm:$0xff]   ;;  %v1047_v25 = vld [vmem:[%s8202_s30 + $0x98] sm:$0xff]  ;;  %1208 = vst [vmem:[#allocation3 + $0x1d8] sm:$0xf] %v6050_v32  ;;  %v858_v44 = vld [vmem:[%s8202_s30 + $0xaf] sm:$0xff] }
  0xf0   : > { %6861 = vmatpush3.bf16.msra.mxu1 %v7440_v22  ;;  %4105 = vmatprep.mubr.bf16.mxu0 %v7444_v61  ;;  %v7471_v22 = vld [vmem:[#allocation7 + $0x120] sm:$0xff]   ;;  %v6049_v29 = vpack.c.bf16 %v1047_v25, %v1047_v25  ;;  %1391 = vst [vmem:[#allocation3 + $0x98] sm:$0xf] %v6073_v33  ;;  %1392 = vst [vmem:[#allocation3 + $0xbc] sm:$0xf] %v6074_v34  ;;  %v1050_v47 = vld [vmem:[%s8202_s30 + $0xb0] sm:$0xff] }
  0xf1   : > { %6862 = vmatprep.subr.bf16.mxu1 %v7442_v26  ;;  %4201 = vmatprep.mubr.bf16.mxu1 %v7446_v1  ;;  %v7458_v19 = vld [vmem:[#allocation3 + $0x8] ss:$36 sps:$4 sm:$0xff]   ;;  %v6017_v26 = vpack.c.bf16 %v855_v23, %v855_v23  ;;  %1966 = vst [vmem:[#allocation3 + $0x14] sm:$0xf] %v6073_v33  ;;  %1967 = vst [vmem:[#allocation3 + $0x38] sm:$0xf] %v6074_v34  ;;  %v6052_v50 = vpack.c.bf16 %v1050_v47, %v1050_v47 }
  0xf2   : > { %6971 = vmatpush3.bf16.msra.mxu0 %v7471_v22  ;;  %1207 = vst [vmem:[#allocation3 + $0x1b4] sm:$0xf] %v6049_v29  ;;  %1782 = vst [vmem:[#allocation3 + $0x130] sm:$0xf] %v6049_v29  ;;  %v7464_v37 = vld [vmem:[#allocation3 + $0x16c] ss:$36 sps:$4 sm:$0xff]  }
  0xf3   : > { %1015 = vst [vmem:[#allocation3 + $0x1b0] sm:$0xf] %v6017_v26  ;;  %1590 = vst [vmem:[#allocation3 + $0x12c] sm:$0xf] %v6017_v26  ;;  %v7466_v38 = vld [vmem:[#allocation3 + $0x54] ss:$36 sps:$4 sm:$0xff]   ;;  %6972 = vmatprep.subr.bf16.mxu0 %v7480_v41 }
  0xf4   : > { %6863 = vmatpush3.bf16.msra.mxu1 %v7443_v42  ;;  %1783 = vst [vmem:[#allocation3 + $0x154] sm:$0xf] %v6050_v32  ;;  %v7468_v39 = vld [vmem:[#allocation3 + $0x168] ss:$36 sps:$4 sm:$0xff]   ;;  %v7469_v40 = vld [vmem:[#allocation3 + $0x50] ss:$36 sps:$4 sm:$0xff]  }
  0xf5   : > { %6864 = vmatprep.subr.bf16.mxu1 %v7450_v45  ;;  %v7481_v42 = vld [vmem:[#allocation7 + $0x118] sm:$0xff]   ;;  %v6019_v45 = vpack.c.bf16 %v857_v43, %v857_v43  ;;  %v1233_v51 = vld [vmem:[%s8202_s30 + $0x49] sm:$0xff]  ;;  %1210 = vst [vmem:[#allocation3 + $0x220] sm:$0xf] %v6052_v50  ;;  %1785 = vst [vmem:[#allocation3 + $0x19c] sm:$0xf] %v6052_v50 }
  0xf6   : > { %6973 = vmatpush3.bf16.msra.mxu0 %v7481_v42  ;;  %v1234_v52 = vld [vmem:[%s8202_s30 + $0x51] sm:$0xff]  ;;  %v6075_v54 = vpack.c.bf16 %v1233_v51, %v1233_v51  ;;  %v7474_v56 = vld [vmem:[#allocation3 + $0x9c] ss:$36 sps:$4 sm:$0xff]   ;;  %v859_v59 = vld [vmem:[%s8202_s30 + $0xc7] sm:$0xff] }
  0xf7   : > { %4106 = vmatmul.mubr.bf16.gmra.mxu0 %v7448_v62  ;;  %4202 = vmatmul.mubr.bf16.gmra.mxu1 %v7449_v2  ;;  %1017 = vst [vmem:[#allocation3 + $0x1f8] sm:$0xf] %v6019_v45  ;;  %1592 = vst [vmem:[#allocation3 + $0x174] sm:$0xf] %v6019_v45  ;;  %v7477_v58 = vld [vmem:[#allocation3 + $0x98] ss:$36 sps:$4 sm:$0xff]   ;;  %v6021_v61 = vpack.c.bf16 %v859_v59, %v859_v59 }
  0xf8   : > { %6865 = vmatpush3.bf16.msra.mxu1 %v7451_v46  ;;  %4113 = vmatprep.mubr.bf16.mxu0 %v7456_v17  ;;  %v1049_v46 = vld [vmem:[%s8202_s30 + $0xa8] sm:$0xff]  ;;  %1393 = vst [vmem:[#allocation3 + $0xe0] sm:$0xf] %v6075_v54  ;;  %1968 = vst [vmem:[#allocation3 + $0x5c] sm:$0xf] %v6075_v54  ;;  %v1052_v0 = vld [vmem:[%s8202_s30 + $0xd0] sm:$0xff] }
  0xf9   : > { %6866 = vmatprep.subr.bf16.mxu1 %v7452_v48  ;;  %4242 = vmatprep.mubr.bf16.mxu1 %v7460_v20  ;;  %v6020_v48 = vpack.c.bf16 %v858_v44, %v858_v44  ;;  %v6051_v49 = vpack.c.bf16 %v1049_v46, %v1049_v46  ;;  %v7472_v53 = vld [vmem:[#allocation3 + $0x1b4] ss:$36 sps:$4 sm:$0xff]   ;;  %v1051_v63 = vld [vmem:[%s8202_s30 + $0xc8] sm:$0xff]  ;;  %1019 = vst [vmem:[#allocation3 + $0x240] sm:$0xf] %v6021_v61  ;;  %v862_v16 = vld [vmem:[%s8202_s30 + $0xdf] sm:$0xff] }
  0xfa   : > { %v7476_v57 = vld [vmem:[#allocation3 + $0x1b0] ss:$36 sps:$4 sm:$0xff]   ;;  %v6053_v2 = vpack.c.bf16 %v1051_v63, %v1051_v63  ;;  %1594 = vst [vmem:[#allocation3 + $0x1bc] sm:$0xf] %v6021_v61  ;;  %v7495_v8 = vld [vmem:[#allocation7 + $0x1e8] sm:$0xff]   ;;  %v1053_v17 = vld [vmem:[%s8202_s30 + $0xd8] sm:$0xff] }
  0xfb   : > { %1018 = vst [vmem:[#allocation3 + $0x21c] sm:$0xf] %v6020_v48  ;;  %1209 = vst [vmem:[#allocation3 + $0x1fc] sm:$0xf] %v6051_v49  ;;  %v860_v60 = vld [vmem:[%s8202_s30 + $0xcf] sm:$0xff]  ;;  %v861_v15 = vld [vmem:[%s8202_s30 + $0xd7] sm:$0xff] }
  0xfc   : > { %6867 = vmatpush3.bf16.msra.mxu1 %v7454_v55  ;;  %v6076_v55 = vpack.c.bf16 %v1234_v52, %v1234_v52  ;;  %1593 = vst [vmem:[#allocation3 + $0x198] sm:$0xf] %v6020_v48  ;;  %1784 = vst [vmem:[#allocation3 + $0x178] sm:$0xf] %v6051_v49  ;;  %v6022_v62 = vpack.c.bf16 %v860_v60, %v860_v60  ;;  %v1235_v1 = vld [vmem:[%s8202_s30 + $0x69] sm:$0xff]  ;;  %v1236_v4 = vld [vmem:[%s8202_s30 + $0x71] sm:$0xff] }
  0xfd   : > { %7076 = vmatprep.subr.bf16.mxu1 %v7462_v3  ;;  %v6054_v3 = vpack.c.bf16 %v1052_v0, %v1052_v0  ;;  %v6077_v5 = vpack.c.bf16 %v1235_v1, %v1235_v1  ;;  %v6078_v6 = vpack.c.bf16 %v1236_v4, %v1236_v4  ;;  %v7494_v7 = vld [vmem:[#allocation7 + $0x150] sm:$0xff]   ;;  %1211 = vst [vmem:[#allocation3 + $0x244] sm:$0xf] %v6053_v2  ;;  %1786 = vst [vmem:[#allocation3 + $0x1c0] sm:$0xf] %v6053_v2  ;;  %v7497_v14 = vld [vmem:[#allocation7 + $0x1a8] sm:$0xff]  }
  0xfe   : > { %1394 = vst [vmem:[#allocation3 + $0x104] sm:$0xf] %v6076_v55  ;;  %1969 = vst [vmem:[#allocation3 + $0x80] sm:$0xf] %v6076_v55  ;;  %6974 = vmatprep.subr.bf16.mxu0 %v7494_v7  ;;  %v7496_v9 = vld [vmem:[#allocation7 + $0x110] sm:$0xff]   ;;  %v1054_v20 = vld [vmem:[%s8202_s30 + $0xe0] sm:$0xff] }
  0xff   : > { %4114 = vmatmul.mubr.bf16.gmra.mxu0 %v7461_v21  ;;  %4243 = vmatmul.mubr.bf16.vlgmr.msra.gmra.mxu1 %v7458_v19  ;;  %1020 = vst [vmem:[#allocation3 + $0x264] sm:$0xf] %v6022_v62  ;;  %1595 = vst [vmem:[#allocation3 + $0x1e0] sm:$0xf] %v6022_v62  ;;  %v7484_v11 = vld [vmem:[#allocation3 + $0xe4] ss:$36 sps:$4 sm:$0xff]   ;;  %v6024_v19 = vpack.c.bf16 %v862_v16, %v862_v16  ;;  %v6055_v21 = vpack.c.bf16 %v1053_v17, %v1053_v17 }
 0x100   : > { %7077 = vmatpush3.bf16.msra.mxu1 %v7463_v18  ;;  %4121 = vmatprep.mubr.bf16.mxu0 %v7464_v37  ;;  %1212 = vst [vmem:[#allocation3 + $0x268] sm:$0xf] %v6054_v3  ;;  %1395 = vst [vmem:[#allocation3 + $0x128] sm:$0xf] %v6077_v5  ;;  %v6023_v18 = vpack.c.bf16 %v861_v15, %v861_v15  ;;  %v1237_v22 = vld [vmem:[%s8202_s30 + $0x79] sm:$0xff]  ;;  %v1238_v23 = vld [vmem:[%s8202_s30 + $0x81] sm:$0xff]  ;;  %v6056_v25 = vpack.c.bf16 %v1054_v20, %v1054_v20 }
 0x101   : > { %7078 = vmatprep.subr.bf16.mxu1 %v7478_v35  ;;  %4250 = vmatprep.mubr.bf16.mxu1 %v7466_v38  ;;  %1970 = vst [vmem:[#allocation3 + $0xa4] sm:$0xf] %v6077_v5  ;;  %1787 = vst [vmem:[#allocation3 + $0x1e4] sm:$0xf] %v6054_v3  ;;  %v6079_v26 = vpack.c.bf16 %v1237_v22, %v1237_v22  ;;  %v6080_v27 = vpack.c.bf16 %v1238_v23, %v1238_v23  ;;  %v7490_v28 = vld [vmem:[#allocation3 + $0x12c] ss:$36 sps:$4 sm:$0xff]  }
 0x102   : > { %1396 = vst [vmem:[#allocation3 + $0x14c] sm:$0xf] %v6078_v6  ;;  %1971 = vst [vmem:[#allocation3 + $0xc8] sm:$0xf] %v6078_v6  ;;  %v7482_v10 = vld [vmem:[#allocation3 + $0x1fc] ss:$36 sps:$4 sm:$0xff]   ;;  %6975 = vmatpush3.bf16.msra.mxu0 %v7496_v9 }
 0x103   : > { %v7486_v12 = vld [vmem:[#allocation3 + $0x1f8] ss:$36 sps:$4 sm:$0xff]   ;;  %1021 = vst [vmem:[#allocation3 + $0x288] sm:$0xf] %v6023_v18  ;;  %1022 = vst [vmem:[#allocation3 + $0x2ac] sm:$0xf] %v6024_v19 }
 0x104   : > { %7079 = vmatpush3.bf16.msra.mxu1 %v7479_v36  ;;  %1213 = vst [vmem:[#allocation3 + $0x28c] sm:$0xf] %v6055_v21  ;;  %1596 = vst [vmem:[#allocation3 + $0x204] sm:$0xf] %v6023_v18  ;;  %v7504_v30 = vld [vmem:[#allocation7 + $0x148] sm:$0xff]   ;;  %v863_v33 = vld [vmem:[%s8202_s30 + $0xf7] sm:$0xff] }
 0x105   : > { %7080 = vmatprep.subr.bf16.mxu1 %v7495_v8  ;;  %v7487_v13 = vld [vmem:[#allocation3 + $0xe0] ss:$36 sps:$4 sm:$0xff]   ;;  %1597 = vst [vmem:[#allocation3 + $0x228] sm:$0xf] %v6024_v19  ;;  %1788 = vst [vmem:[#allocation3 + $0x208] sm:$0xf] %v6055_v21  ;;  %6976 = vmatprep.subr.bf16.mxu0 %v7504_v30  ;;  %v6025_v35 = vpack.c.bf16 %v863_v33, %v863_v33 }
 0x106   : > { %1214 = vst [vmem:[#allocation3 + $0x2b0] sm:$0xf] %v6056_v25  ;;  %1397 = vst [vmem:[#allocation3 + $0x170] sm:$0xf] %v6079_v26  ;;  %v7492_v29 = vld [vmem:[#allocation3 + $0x240] ss:$36 sps:$4 sm:$0xff]  }
 0x107   : > { %4122 = vmatmul.mubr.bf16.gmra.mxu0 %v7468_v39  ;;  %4251 = vmatmul.mubr.bf16.gmra.mxu1 %v7469_v40  ;;  %v7488_v24 = vld [vmem:[#allocation3 + $0x244] ss:$36 sps:$4 sm:$0xff]   ;;  %1398 = vst [vmem:[#allocation3 + $0x194] sm:$0xf] %v6080_v27  ;;  %1972 = vst [vmem:[#allocation3 + $0xec] sm:$0xf] %v6079_v26 }
 0x108   : > { %4129 = vmatprep.mubr.bf16.mxu0 %v7472_v53  ;;  %4258 = vmatprep.mubr.bf16.mxu1 %v7474_v56  ;;  %1973 = vst [vmem:[#allocation3 + $0x110] sm:$0xf] %v6080_v27  ;;  %1789 = vst [vmem:[#allocation3 + $0x22c] sm:$0xf] %v6056_v25  ;;  %v7505_v32 = vld [vmem:[#allocation7 + $0x108] sm:$0xff]   ;;  %v864_v34 = vld [vmem:[%s8202_s30 + $0xff] sm:$0xff] }
 0x109   : > { %7081 = vmatpush3.bf16.msra.mxu1 %v7497_v14  ;;  %v7493_v31 = vld [vmem:[#allocation3 + $0x128] ss:$36 sps:$4 sm:$0xff]   ;;  %v1055_v36 = vld [vmem:[%s8202_s30 + $0xf8] sm:$0xff]  ;;  %v1056_v37 = vld [vmem:[%s8202_s30 + $0x100] sm:$0xff]  ;;  %6977 = vmatpush3.bf16.msra.mxu0 %v7505_v32  ;;  %v6026_v38 = vpack.c.bf16 %v864_v34, %v864_v34  ;;  %1023 = vst [vmem:[#allocation3 + $0x2d0] sm:$0xf] %v6025_v35 }
 0x10a   : > { %v6057_v39 = vpack.c.bf16 %v1055_v36, %v1055_v36  ;;  %v6058_v40 = vpack.c.bf16 %v1056_v37, %v1056_v37  ;;  %v1239_v41 = vld [vmem:[%s8202_s30 + $0x99] sm:$0xff]  ;;  %v1240_v42 = vld [vmem:[%s8202_s30 + $0xa1] sm:$0xff]  ;;  %1598 = vst [vmem:[#allocation3 + $0x24c] sm:$0xf] %v6025_v35  ;;  %v866_v51 = vld [vmem:[%s8202_s30 + $0x10f] sm:$0xff] }
 0x10b   : > { %v6081_v43 = vpack.c.bf16 %v1239_v41, %v1239_v41  ;;  %v6082_v44 = vpack.c.bf16 %v1240_v42, %v1240_v42  ;;  %v7512_v45 = vld [vmem:[#allocation7 + $0x1e0] sm:$0xff]   ;;  %1024 = vst [vmem:[#allocation3 + $0x2f4] sm:$0xf] %v6026_v38  ;;  %1599 = vst [vmem:[#allocation3 + $0x270] sm:$0xf] %v6026_v38  ;;  %v6028_v54 = vpack.c.bf16 %v866_v51, %v866_v51  ;;  %v1057_v55 = vld [vmem:[%s8202_s30 + $0x108] sm:$0xff] }
 0x10c   : > { %1215 = vst [vmem:[#allocation3 + $0x2d4] sm:$0xf] %v6057_v39  ;;  %1216 = vst [vmem:[#allocation3 + $0x2f8] sm:$0xf] %v6058_v40  ;;  %v7513_v46 = vld [vmem:[#allocation7 + $0x1a0] sm:$0xff]   ;;  %7082 = vmatprep.subr.bf16.mxu1 %v7512_v45  ;;  %v1058_v56 = vld [vmem:[%s8202_s30 + $0x110] sm:$0xff] }
 0x10d   : > { %1790 = vst [vmem:[#allocation3 + $0x250] sm:$0xf] %v6057_v39  ;;  %1791 = vst [vmem:[#allocation3 + $0x274] sm:$0xf] %v6058_v40  ;;  %v7498_v47 = vld [vmem:[#allocation3 + $0x28c] ss:$36 sps:$4 sm:$0xff]   ;;  %7083 = vmatpush3.bf16.msra.mxu1 %v7513_v46  ;;  %v6060_v59 = vpack.c.bf16 %v1058_v56, %v1058_v56 }
 0x10e   : > { %1399 = vst [vmem:[#allocation3 + $0x1b8] sm:$0xf] %v6081_v43  ;;  %1400 = vst [vmem:[#allocation3 + $0x1dc] sm:$0xf] %v6082_v44  ;;  %v7500_v48 = vld [vmem:[#allocation3 + $0x174] ss:$36 sps:$4 sm:$0xff]  }
 0x10f   : > { %4130 = vmatmul.mubr.bf16.gmra.mxu0 %v7476_v57  ;;  %4259 = vmatmul.mubr.bf16.gmra.mxu1 %v7477_v58  ;;  %1974 = vst [vmem:[#allocation3 + $0x134] sm:$0xf] %v6081_v43  ;;  %1975 = vst [vmem:[#allocation3 + $0x158] sm:$0xf] %v6082_v44  ;;  %v7502_v49 = vld [vmem:[#allocation3 + $0x288] ss:$36 sps:$4 sm:$0xff]   ;;  %v6059_v58 = vpack.c.bf16 %v1057_v55, %v1057_v55 }
 0x110   : > { %4137 = vmatprep.mubr.bf16.mxu0 %v7482_v10  ;;  %4266 = vmatprep.mubr.bf16.mxu1 %v7484_v11  ;;  %v865_v50 = vld [vmem:[%s8202_s30 + $0x107] sm:$0xff]  ;;  %v7503_v52 = vld [vmem:[#allocation3 + $0x170] ss:$36 sps:$4 sm:$0xff]   ;;  %1026 = vst [vmem:[#allocation3 + $0x33c] sm:$0xf] %v6028_v54  ;;  %v7528_v9 = vld [vmem:[#allocation7 + $0x1d8] sm:$0xff]  }
 0x111   : > { %v6027_v53 = vpack.c.bf16 %v865_v50, %v865_v50  ;;  %v1241_v57 = vld [vmem:[%s8202_s30 + $0xa9] sm:$0xff]  ;;  %v1242_v60 = vld [vmem:[%s8202_s30 + $0xb1] sm:$0xff]  ;;  %v7520_v63 = vld [vmem:[#allocation7 + $0x140] sm:$0xff]   ;;  %1601 = vst [vmem:[#allocation3 + $0x2b8] sm:$0xf] %v6028_v54  ;;  %7084 = vmatprep.subr.bf16.mxu1 %v7528_v9 }
 0x112   : > { %v6083_v61 = vpack.c.bf16 %v1241_v57, %v1241_v57  ;;  %v6084_v62 = vpack.c.bf16 %v1242_v60, %v1242_v60  ;;  %1217 = vst [vmem:[#allocation3 + $0x31c] sm:$0xf] %v6059_v58  ;;  %1218 = vst [vmem:[#allocation3 + $0x340] sm:$0xf] %v6060_v59  ;;  %v7508_v1 = vld [vmem:[#allocation3 + $0x1bc] ss:$36 sps:$4 sm:$0xff]   ;;  %6978 = vmatprep.subr.bf16.mxu0 %v7520_v63 }
 0x113   : > { %1025 = vst [vmem:[#allocation3 + $0x318] sm:$0xf] %v6027_v53  ;;  %1600 = vst [vmem:[#allocation3 + $0x294] sm:$0xf] %v6027_v53  ;;  %v7506_v0 = vld [vmem:[#allocation3 + $0x2d4] ss:$36 sps:$4 sm:$0xff]  }
 0x114   : > { %1401 = vst [vmem:[#allocation3 + $0x200] sm:$0xf] %v6083_v61  ;;  %1976 = vst [vmem:[#allocation3 + $0x17c] sm:$0xf] %v6083_v61  ;;  %v7521_v2 = vld [vmem:[#allocation7 + $0x100] sm:$0xff]   ;;  %v1243_v3 = vld [vmem:[%s8202_s30 + $0xc9] sm:$0xff] }
 0x115   : > { %1792 = vst [vmem:[#allocation3 + $0x298] sm:$0xf] %v6059_v58  ;;  %1793 = vst [vmem:[#allocation3 + $0x2bc] sm:$0xf] %v6060_v59  ;;  %v1244_v4 = vld [vmem:[%s8202_s30 + $0xd1] sm:$0xff]  ;;  %6979 = vmatpush3.bf16.msra.mxu0 %v7521_v2  ;;  %v6085_v6 = vpack.c.bf16 %v1243_v3, %v1243_v3  ;;  %v1245_v14 = vld [vmem:[%s8202_s30 + $0xd9] sm:$0xff] }
 0x116   : > { %1402 = vst [vmem:[#allocation3 + $0x224] sm:$0xf] %v6084_v62  ;;  %1977 = vst [vmem:[#allocation3 + $0x1a0] sm:$0xf] %v6084_v62  ;;  %v7510_v5 = vld [vmem:[#allocation3 + $0x2d0] ss:$36 sps:$4 sm:$0xff]   ;;  %v6086_v7 = vpack.c.bf16 %v1244_v4, %v1244_v4  ;;  %v6087_v16 = vpack.c.bf16 %v1245_v14, %v1245_v14 }
 0x117   : > { %4138 = vmatmul.mubr.bf16.gmra.mxu0 %v7486_v12  ;;  %4267 = vmatmul.mubr.bf16.gmra.mxu1 %v7487_v13  ;;  %v7511_v8 = vld [vmem:[#allocation3 + $0x1b8] ss:$36 sps:$4 sm:$0xff]   ;;  %1403 = vst [vmem:[#allocation3 + $0x248] sm:$0xf] %v6085_v6  ;;  %1978 = vst [vmem:[#allocation3 + $0x1c4] sm:$0xf] %v6085_v6 }
 0x118   : > { %4145 = vmatprep.mubr.bf16.mxu0 %v7488_v24  ;;  %4274 = vmatprep.mubr.bf16.mxu1 %v7490_v28  ;;  %1404 = vst [vmem:[#allocation3 + $0x26c] sm:$0xf] %v6086_v7  ;;  %v7529_v10 = vld [vmem:[#allocation7 + $0x198] sm:$0xff]   ;;  %1979 = vst [vmem:[#allocation3 + $0x1e8] sm:$0xf] %v6086_v7  ;;  %v1246_v15 = vld [vmem:[%s8202_s30 + $0xe1] sm:$0xff] }
 0x119   : > { %v7514_v11 = vld [vmem:[#allocation3 + $0x31c] ss:$36 sps:$4 sm:$0xff]   ;;  %v7516_v12 = vld [vmem:[#allocation3 + $0x204] ss:$36 sps:$4 sm:$0xff]   ;;  %7085 = vmatpush3.bf16.msra.mxu1 %v7529_v10  ;;  %v6088_v17 = vpack.c.bf16 %v1246_v15, %v1246_v15  ;;  %v7526_v20 = vld [vmem:[#allocation3 + $0x14] ss:$36 sps:$4 sm:$0xff]  }
 0x11a   : > { %v8286_v13 = vld [vmem:[#allocation7 + $0x238] sm:$0xff]   ;;  %1405 = vst [vmem:[#allocation3 + $0x290] sm:$0xf] %v6087_v16  ;;  %1980 = vst [vmem:[#allocation3 + $0x20c] sm:$0xf] %v6087_v16  ;;  %v1248_v23 = vld [vmem:[%s8202_s30 + $0x101] sm:$0xff] }
 0x11b   : > { %7212 = vmatprep.subr.bf16.mxu0 %v8286_v13  ;;  %v1247_v18 = vld [vmem:[%s8202_s30 + $0xf9] sm:$0xff]  ;;  %1406 = vst [vmem:[#allocation3 + $0x2b4] sm:$0xf] %v6088_v17  ;;  %v5381_v24 = vld [vmem:[%s8202_s30 + $0x127] sm:$0xff]  ;;  %1981 = vst [vmem:[#allocation3 + $0x230] sm:$0xf] %v6088_v17  ;;  %v6090_v25 = vpack.c.bf16 %v1248_v23, %v1248_v23 }
 0x11c   : > { %v7518_v19 = vld [vmem:[#allocation3 + $0x318] ss:$36 sps:$4 sm:$0xff]   ;;  %v6089_v21 = vpack.c.bf16 %v1247_v18, %v1247_v18  ;;  %v5382_v26 = vld [vmem:[%s8202_s30 + $0x12f] sm:$0xff]  ;;  %v6121_v27 = vpack.c.bf16 %v5381_v24, %v5381_v24  ;;  %v7539_v56 = vld [vmem:[#allocation3 + $0xa4] ss:$36 sps:$4 sm:$0xff]  }
 0x11d   : > { %v7519_v22 = vld [vmem:[#allocation3 + $0x200] ss:$36 sps:$4 sm:$0xff]   ;;  %v7522_v28 = vld [vmem:[#allocation3 + $0x24c] ss:$36 sps:$4 sm:$0xff]   ;;  %1408 = vst [vmem:[#allocation3 + $0x2fc] sm:$0xf] %v6090_v25 }
 0x11e   : > { %1407 = vst [vmem:[#allocation3 + $0x2d8] sm:$0xf] %v6089_v21  ;;  %1982 = vst [vmem:[#allocation3 + $0x254] sm:$0xf] %v6089_v21  ;;  %v7543_v30 = vld [vmem:[#allocation7 + $0x1d0] sm:$0xff]   ;;  %v5384_v40 = vld [vmem:[%s8202_s30 + $0x13f] sm:$0xff] }
 0x11f   : > { %4146 = vmatmul.mubr.bf16.gmra.mxu0 %v7492_v29  ;;  %4275 = vmatmul.mubr.bf16.gmra.mxu1 %v7493_v31  ;;  %v6122_v29 = vpack.c.bf16 %v5382_v26, %v5382_v26  ;;  %1602 = vst [vmem:[#allocation3 + $0x2dc] sm:$0xf] %v6121_v27  ;;  %1983 = vst [vmem:[#allocation3 + $0x278] sm:$0xf] %v6090_v25  ;;  %v7544_v31 = vld [vmem:[#allocation7 + $0x190] sm:$0xff]   ;;  %v6124_v43 = vpack.c.bf16 %v5384_v40, %v5384_v40  ;;  %v5386_v51 = vld [vmem:[%s8202_s30 + $0x15f] sm:$0xff] }
 0x120   : > { %4153 = vmatprep.mubr.bf16.mxu0 %v7498_v47  ;;  %4282 = vmatprep.mubr.bf16.mxu1 %v7500_v48  ;;  %v1249_v32 = vld [vmem:[%s8202_s30 + $0x109] sm:$0xff]  ;;  %v1250_v33 = vld [vmem:[%s8202_s30 + $0x111] sm:$0xff]  ;;  %v7533_v39 = vld [vmem:[#allocation3 + $0x5c] ss:$36 sps:$4 sm:$0xff]  }
 0x121   : > { %1603 = vst [vmem:[#allocation3 + $0x300] sm:$0xf] %v6122_v29  ;;  %7086 = vmatprep.subr.bf16.mxu1 %v7543_v30  ;;  %v6091_v34 = vpack.c.bf16 %v1249_v32, %v1249_v32  ;;  %v5383_v35 = vld [vmem:[%s8202_s30 + $0x137] sm:$0xff]  ;;  %v6092_v37 = vpack.c.bf16 %v1250_v33, %v1250_v33  ;;  %v7527_v41 = vld [vmem:[#allocation3 + $0x248] ss:$36 sps:$4 sm:$0xff]   ;;  %v7573_v16 = vld [vmem:[#allocation7 + $0x1c0] sm:$0xff]  }
 0x122   : > { %v7524_v36 = vld [vmem:[#allocation3 + $0x10] ss:$36 sps:$4 sm:$0xff]   ;;  %7087 = vmatpush3.bf16.msra.mxu1 %v7544_v31  ;;  %v6123_v38 = vpack.c.bf16 %v5383_v35, %v5383_v35  ;;  %1605 = vst [vmem:[#allocation3 + $0x348] sm:$0xf] %v6124_v43  ;;  %v7536_v53 = vld [vmem:[#allocation3 + $0x58] ss:$36 sps:$4 sm:$0xff]  }
 0x123   : > { %1409 = vst [vmem:[#allocation3 + $0x320] sm:$0xf] %v6091_v34  ;;  %1984 = vst [vmem:[#allocation3 + $0x29c] sm:$0xf] %v6091_v34  ;;  %v7531_v42 = vld [vmem:[#allocation3 + $0x294] ss:$36 sps:$4 sm:$0xff]  }
 0x124   : > { %1410 = vst [vmem:[#allocation3 + $0x344] sm:$0xf] %v6092_v37  ;;  %1604 = vst [vmem:[#allocation3 + $0x324] sm:$0xf] %v6123_v38  ;;  %v1251_v44 = vld [vmem:[%s8202_s30 + $0x129] sm:$0xff]  ;;  %v1252_v45 = vld [vmem:[%s8202_s30 + $0x131] sm:$0xff] }
 0x125   : > { %1985 = vst [vmem:[#allocation3 + $0x2c0] sm:$0xf] %v6092_v37  ;;  %v6093_v46 = vpack.c.bf16 %v1251_v44, %v1251_v44  ;;  %v5385_v47 = vld [vmem:[%s8202_s30 + $0x157] sm:$0xff]  ;;  %v7558_v54 = vld [vmem:[#allocation7 + $0x1c8] sm:$0xff]   ;;  %v7542_v7 = vld [vmem:[#allocation3 + $0xa0] ss:$36 sps:$4 sm:$0xff]  }
 0x126   : > { %v7545_v48 = vld [vmem:[#allocation7 + $0x230] sm:$0xff]   ;;  %v6125_v50 = vpack.c.bf16 %v5385_v47, %v5385_v47  ;;  %v7559_v57 = vld [vmem:[#allocation7 + $0x188] sm:$0xff]   ;;  %7088 = vmatprep.subr.bf16.mxu1 %v7558_v54  ;;  %v1253_v59 = vld [vmem:[%s8202_s30 + $0x139] sm:$0xff] }
 0x127   : > { %4154 = vmatmul.mubr.bf16.gmra.mxu0 %v7502_v49  ;;  %4283 = vmatmul.mubr.bf16.gmra.mxu1 %v7503_v52  ;;  %v6094_v49 = vpack.c.bf16 %v1252_v45, %v1252_v45  ;;  %1411 = vst [vmem:[#allocation3 + $0x368] sm:$0xf] %v6093_v46  ;;  %1986 = vst [vmem:[#allocation3 + $0x2e4] sm:$0xf] %v6093_v46  ;;  %v6126_v52 = vpack.c.bf16 %v5386_v51, %v5386_v51  ;;  %v7535_v55 = vld [vmem:[#allocation3 + $0x290] ss:$36 sps:$4 sm:$0xff]  }
 0x128   : > { %4161 = vmatprep.mubr.bf16.mxu0 %v7506_v0  ;;  %4290 = vmatprep.mubr.bf16.mxu1 %v7508_v1  ;;  %1606 = vst [vmem:[#allocation3 + $0x36c] sm:$0xf] %v6125_v50  ;;  %v7560_v58 = vld [vmem:[#allocation7 + $0x228] sm:$0xff]   ;;  %v7537_v62 = vld [vmem:[#allocation3 + $0x2dc] ss:$36 sps:$4 sm:$0xff]   ;;  %v6095_v63 = vpack.c.bf16 %v1253_v59, %v1253_v59  ;;  %v5446_v54 = vld [vmem:[%s8202_s30 + $0x130] sm:$0xff] }
 0x129   : > { %1412 = vst [vmem:[#allocation3 + $0x38c] sm:$0xf] %v6094_v49  ;;  %1987 = vst [vmem:[#allocation3 + $0x308] sm:$0xf] %v6094_v49  ;;  %7089 = vmatpush3.bf16.msra.mxu1 %v7559_v57  ;;  %v1254_v60 = vld [vmem:[%s8202_s30 + $0x141] sm:$0xff]  ;;  %v5388_v2 = vld [vmem:[%s8202_s30 + $0x16f] sm:$0xff]  ;;  %v6154_v57 = vpack.c.bf16 %v5446_v54, %v5446_v54 }
 0x12a   : > { %1607 = vst [vmem:[#allocation3 + $0x390] sm:$0xf] %v6126_v52  ;;  %v5387_v61 = vld [vmem:[%s8202_s30 + $0x167] sm:$0xff]  ;;  %v6096_v0 = vpack.c.bf16 %v1254_v60, %v1254_v60  ;;  %1413 = vst [vmem:[#allocation3 + $0x3b0] sm:$0xf] %v6095_v63  ;;  %v6128_v3 = vpack.c.bf16 %v5388_v2, %v5388_v2  ;;  %v1255_v4 = vld [vmem:[%s8202_s30 + $0x159] sm:$0xff]  ;;  %7090 = vmatprep.subr.bf16.mxu1 %v7573_v16 }
 0x12b   : > { %v6127_v1 = vpack.c.bf16 %v5387_v61, %v5387_v61  ;;  %1988 = vst [vmem:[#allocation3 + $0x32c] sm:$0xf] %v6095_v63  ;;  %v5389_v6 = vld [vmem:[%s8202_s30 + $0x187] sm:$0xff]  ;;  %v5391_v21 = vld [vmem:[%s8202_s30 + $0x197] sm:$0xff]  ;;  %v5392_v25 = vld [vmem:[%s8202_s30 + $0x19f] sm:$0xff] }
 0x12c   : > { %1414 = vst [vmem:[#allocation3 + $0x3d4] sm:$0xf] %v6096_v0  ;;  %1989 = vst [vmem:[#allocation3 + $0x350] sm:$0xf] %v6096_v0  ;;  %v6129_v10 = vpack.c.bf16 %v5389_v6, %v5389_v6  ;;  %v7546_v14 = vld [vmem:[#allocation3 + $0x324] ss:$36 sps:$4 sm:$0xff]   ;;  %v6131_v24 = vpack.c.bf16 %v5391_v21, %v5391_v21  ;;  %v6132_v27 = vpack.c.bf16 %v5392_v25, %v5392_v25 }
 0x12d   : > { %1608 = vst [vmem:[#allocation3 + $0x3b4] sm:$0xf] %v6127_v1  ;;  %1609 = vst [vmem:[#allocation3 + $0x3d8] sm:$0xf] %v6128_v3  ;;  %v7574_v17 = vld [vmem:[#allocation7 + $0x180] sm:$0xff]   ;;  %v5556_v32 = vld [vmem:[%s8202_s30 + $0x6f] sm:$0xff] }
 0x12e   : > { %1610 = vst [vmem:[#allocation3 + $0x3fc] sm:$0xf] %v6129_v10  ;;  %v7575_v18 = vld [vmem:[#allocation7 + $0x220] sm:$0xff]   ;;  %7091 = vmatpush3.bf16.msra.mxu1 %v7574_v17  ;;  %v7551_v26 = vld [vmem:[#allocation3 + $0xe8] ss:$36 sps:$4 sm:$0xff]   ;;  %v6198_v35 = vpack.c.bf16 %v5556_v32, %v5556_v32  ;;  %v5557_v40 = vld [vmem:[%s8202_s30 + $0x77] sm:$0xff] }
 0x12f   : > { %4162 = vmatmul.mubr.bf16.gmra.mxu0 %v7510_v5  ;;  %4291 = vmatmul.mubr.bf16.gmra.mxu1 %v7511_v8  ;;  %v1256_v5 = vld [vmem:[%s8202_s30 + $0x161] sm:$0xff]  ;;  %v6097_v8 = vpack.c.bf16 %v1255_v4, %v1255_v4  ;;  %1612 = vst [vmem:[#allocation3 + $0x444] sm:$0xf] %v6131_v24  ;;  %1613 = vst [vmem:[#allocation3 + $0x468] sm:$0xf] %v6132_v27  ;;  %v6199_v43 = vpack.c.bf16 %v5557_v40, %v5557_v40  ;;  %v5621_v44 = vld [vmem:[%s8202_s30 + $0x78] sm:$0xff] }
 0x130   : > { %4169 = vmatprep.mubr.bf16.mxu0 %v7514_v11  ;;  %4298 = vmatprep.mubr.bf16.mxu1 %v7516_v12  ;;  %v6098_v9 = vpack.c.bf16 %v1256_v5, %v1256_v5  ;;  %v7548_v11 = vld [vmem:[#allocation3 + $0xec] ss:$36 sps:$4 sm:$0xff]   ;;  %v7550_v29 = vld [vmem:[#allocation3 + $0x320] ss:$36 sps:$4 sm:$0xff]   ;;  %2162 = vst [vmem:[#allocation3 + $0x3c] sm:$0xf] %v6198_v35 }
 0x131   : > { %v5390_v12 = vld [vmem:[%s8202_s30 + $0x18f] sm:$0xff]  ;;  %1415 = vst [vmem:[#allocation3 + $0x3f8] sm:$0xf] %v6097_v8  ;;  %1990 = vst [vmem:[#allocation3 + $0x374] sm:$0xf] %v6097_v8  ;;  %v5555_v31 = vld [vmem:[%s8202_s30 + $0x67] sm:$0xff] }
 0x132   : > { %1416 = vst [vmem:[#allocation3 + $0x41c] sm:$0xf] %v6098_v9  ;;  %v6130_v15 = vpack.c.bf16 %v5390_v12, %v5390_v12  ;;  %1991 = vst [vmem:[#allocation3 + $0x398] sm:$0xf] %v6098_v9  ;;  %v7552_v30 = vld [vmem:[#allocation3 + $0x36c] ss:$36 sps:$4 sm:$0xff]   ;;  %v6197_v34 = vpack.c.bf16 %v5555_v31, %v5555_v31 }
 0x133   : > { %v5619_v33 = vld [vmem:[%s8202_s30 + $0x68] sm:$0xff]  ;;  %v7563_v45 = vld [vmem:[#allocation3 + $0x17c] ss:$36 sps:$4 sm:$0xff]   ;;  %2163 = vst [vmem:[#allocation3 + $0x60] sm:$0xf] %v6199_v43  ;;  %v7601_v0 = vld [vmem:[#allocation7 + $0x210] sm:$0xff]  }
 0x134   : > { %1611 = vst [vmem:[#allocation3 + $0x420] sm:$0xf] %v6130_v15  ;;  %v6229_v37 = vpack.c.bf16 %v5619_v33, %v5619_v33  ;;  %2161 = vst [vmem:[#allocation3 + $0x18] sm:$0xf] %v6197_v34  ;;  %v5622_v47 = vld [vmem:[%s8202_s30 + $0x80] sm:$0xff]  ;;  %v5445_v49 = vld [vmem:[%s8202_s30 + $0x128] sm:$0xff] }
 0x135   : > { %v7556_v50 = vld [vmem:[#allocation3 + $0x368] ss:$36 sps:$4 sm:$0xff]   ;;  %v7561_v51 = vld [vmem:[#allocation3 + $0x3b4] ss:$36 sps:$4 sm:$0xff]   ;;  %v6232_v52 = vpack.c.bf16 %v5622_v47, %v5622_v47  ;;  %v5624_v61 = vld [vmem:[%s8202_s30 + $0xa0] sm:$0xff] }
 0x136   : > { %2353 = vst [vmem:[#allocation3 + $0x1c] sm:$0xf] %v6229_v37  ;;  %v5623_v60 = vld [vmem:[%s8202_s30 + $0x98] sm:$0xff]  ;;  %v6234_v63 = vpack.c.bf16 %v5624_v61, %v5624_v61  ;;  %1795 = vst [vmem:[#allocation3 + $0x304] sm:$0xf] %v6154_v57  ;;  %v5448_v2 = vld [vmem:[%s8202_s30 + $0x140] sm:$0xff] }
 0x137   : > { %4170 = vmatmul.mubr.bf16.gmra.mxu0 %v7518_v19  ;;  %4299 = vmatmul.mubr.bf16.gmra.mxu1 %v7519_v22  ;;  %v1257_v19 = vld [vmem:[%s8202_s30 + $0x169] sm:$0xff]  ;;  %2356 = vst [vmem:[#allocation3 + $0x88] sm:$0xf] %v6232_v52  ;;  %v5447_v1 = vld [vmem:[%s8202_s30 + $0x138] sm:$0xff]  ;;  %2370 = vst [vmem:[#allocation3 + $0x280] sm:$0xf] %v6154_v57  ;;  %v6156_v5 = vpack.c.bf16 %v5448_v2, %v5448_v2 }
 0x138   : > { %4403 = vmatprep.mubr.bf16.mxu0 %v7526_v20  ;;  %4306 = vmatprep.mubr.bf16.mxu1 %v7522_v28  ;;  %v1258_v20 = vld [vmem:[%s8202_s30 + $0x171] sm:$0xff]  ;;  %v6099_v22 = vpack.c.bf16 %v1257_v19, %v1257_v19  ;;  %v6155_v3 = vpack.c.bf16 %v5447_v1, %v5447_v1  ;;  %v5561_v4 = vld [vmem:[%s8202_s30 + $0xa7] sm:$0xff]  ;;  %2358 = vst [vmem:[#allocation3 + $0xd0] sm:$0xf] %v6234_v63  ;;  %v5568_v57 = vld [vmem:[%s8202_s30 + $0xff] sm:$0xff] }
 0x139   : > { %v6100_v23 = vpack.c.bf16 %v1258_v20, %v1258_v20  ;;  %v7554_v28 = vld [vmem:[#allocation3 + $0x134] ss:$36 sps:$4 sm:$0xff]   ;;  %v6203_v6 = vpack.c.bf16 %v5561_v4, %v5561_v4  ;;  %v5625_v9 = vld [vmem:[%s8202_s30 + $0xa8] sm:$0xff]  ;;  %1797 = vst [vmem:[#allocation3 + $0x34c] sm:$0xf] %v6156_v5  ;;  %v5450_v16 = vld [vmem:[%s8202_s30 + $0x160] sm:$0xff]  ;;  %v6210_v61 = vpack.c.bf16 %v5568_v57, %v5568_v57 }
 0x13a   : > { %1417 = vst [vmem:[#allocation3 + $0x440] sm:$0xf] %v6099_v22  ;;  %1992 = vst [vmem:[#allocation3 + $0x3bc] sm:$0xf] %v6099_v22  ;;  %v5562_v8 = vld [vmem:[%s8202_s30 + $0xaf] sm:$0xff]  ;;  %v5449_v15 = vld [vmem:[%s8202_s30 + $0x158] sm:$0xff]  ;;  %v6158_v19 = vpack.c.bf16 %v5450_v16, %v5450_v16 }
 0x13b   : > { %1418 = vst [vmem:[#allocation3 + $0x464] sm:$0xf] %v6100_v23  ;;  %1993 = vst [vmem:[#allocation3 + $0x3e0] sm:$0xf] %v6100_v23  ;;  %v5626_v10 = vld [vmem:[%s8202_s30 + $0xb0] sm:$0xff]  ;;  %v6204_v12 = vpack.c.bf16 %v5562_v8, %v5562_v8  ;;  %v5563_v17 = vld [vmem:[%s8202_s30 + $0xc7] sm:$0xff] }
 0x13c   : > { %1796 = vst [vmem:[#allocation3 + $0x328] sm:$0xf] %v6155_v3  ;;  %2371 = vst [vmem:[#allocation3 + $0x2a4] sm:$0xf] %v6155_v3  ;;  %v5564_v20 = vld [vmem:[%s8202_s30 + $0xcf] sm:$0xff]  ;;  %v6205_v21 = vpack.c.bf16 %v5563_v17, %v5563_v17  ;;  %v5629_v40 = vld [vmem:[%s8202_s30 + $0xd8] sm:$0xff] }
 0x13d   : > { %2167 = vst [vmem:[#allocation3 + $0xf0] sm:$0xf] %v6203_v6  ;;  %2372 = vst [vmem:[#allocation3 + $0x2c8] sm:$0xf] %v6156_v5  ;;  %v5627_v22 = vld [vmem:[%s8202_s30 + $0xc8] sm:$0xff]  ;;  %v6206_v25 = vpack.c.bf16 %v5564_v20, %v5564_v20  ;;  %v5628_v27 = vld [vmem:[%s8202_s30 + $0xd0] sm:$0xff]  ;;  %v6239_v43 = vpack.c.bf16 %v5629_v40, %v5629_v40 }
 0x13e   : > { %v7565_v23 = vld [vmem:[#allocation3 + $0x3b0] ss:$36 sps:$4 sm:$0xff]   ;;  %v7567_v24 = vld [vmem:[#allocation3 + $0x3fc] ss:$36 sps:$4 sm:$0xff]   ;;  %2168 = vst [vmem:[#allocation3 + $0x114] sm:$0xf] %v6204_v12 }
 0x13f   : > { %4404 = vmatmul.mubr.bf16.vlgmr.msra.gmra.mxu0 %v7524_v36  ;;  %4307 = vmatmul.mubr.bf16.gmra.mxu1 %v7527_v41  ;;  %v5620_v36 = vld [vmem:[%s8202_s30 + $0x70] sm:$0xff]  ;;  %1799 = vst [vmem:[#allocation3 + $0x394] sm:$0xf] %v6158_v19  ;;  %2169 = vst [vmem:[#allocation3 + $0x138] sm:$0xf] %v6205_v21  ;;  %v5451_v31 = vld [vmem:[%s8202_s30 + $0x168] sm:$0xff] }
 0x140   : > { %7213 = vmatpush3.bf16.msra.mxu0 %v8286_v13  ;;  %4314 = vmatprep.mubr.bf16.mxu1 %v7531_v42  ;;  %v7541_v13 = vld [vmem:[#allocation3 + $0x2d8] ss:$36 sps:$4 sm:$0xff]   ;;  %v6230_v38 = vpack.c.bf16 %v5620_v36, %v5620_v36  ;;  %v7557_v41 = vld [vmem:[#allocation3 + $0x130] ss:$36 sps:$4 sm:$0xff]   ;;  %2374 = vst [vmem:[#allocation3 + $0x310] sm:$0xf] %v6158_v19  ;;  %v6159_v34 = vpack.c.bf16 %v5451_v31, %v5451_v31 }
 0x141   : > { %4411 = vmatprep.mubr.bf16.mxu0 %v7533_v39  ;;  %7214 = vmatprep.subr.bf16.mxu0 %v7545_v48  ;;  %v7588_v39 = vld [vmem:[#allocation7 + $0x218] sm:$0xff]   ;;  %2170 = vst [vmem:[#allocation3 + $0x15c] sm:$0xf] %v6206_v25  ;;  %v5452_v32 = vld [vmem:[%s8202_s30 + $0x170] sm:$0xff]  ;;  %v7576_v37 = vld [vmem:[#allocation3 + $0x444] ss:$36 sps:$4 sm:$0xff]  }
 0x142   : > { %2354 = vst [vmem:[#allocation3 + $0x40] sm:$0xf] %v6230_v38  ;;  %v5558_v42 = vld [vmem:[%s8202_s30 + $0x7f] sm:$0xff]  ;;  %v7578_v33 = vld [vmem:[#allocation3 + $0x20c] ss:$36 sps:$4 sm:$0xff]   ;;  %v6160_v35 = vpack.c.bf16 %v5452_v32, %v5452_v32  ;;  %v5565_v38 = vld [vmem:[%s8202_s30 + $0xd7] sm:$0xff] }
 0x143   : > { %v6200_v46 = vpack.c.bf16 %v5558_v42, %v5558_v42  ;;  %v7571_v36 = vld [vmem:[#allocation3 + $0x3f8] ss:$36 sps:$4 sm:$0xff]   ;;  %1800 = vst [vmem:[#allocation3 + $0x3b8] sm:$0xf] %v6159_v34  ;;  %2375 = vst [vmem:[#allocation3 + $0x334] sm:$0xf] %v6159_v34 }
 0x144   : > { %7215 = vmatpush3.bf16.msra.mxu0 %v7545_v48  ;;  %v6231_v48 = vpack.c.bf16 %v5621_v44, %v5621_v44  ;;  %1801 = vst [vmem:[#allocation3 + $0x3dc] sm:$0xf] %v6160_v35  ;;  %2376 = vst [vmem:[#allocation3 + $0x358] sm:$0xf] %v6160_v35  ;;  %v5630_v44 = vld [vmem:[%s8202_s30 + $0xe0] sm:$0xff]  ;;  %v5518_v52 = vld [vmem:[%s8202_s30 + $0x191] sm:$0xff] }
 0x145   : > { %7216 = vmatprep.subr.bf16.mxu0 %v7560_v58  ;;  %2164 = vst [vmem:[#allocation3 + $0x84] sm:$0xf] %v6200_v46  ;;  %v5454_v46 = vld [vmem:[%s8202_s30 + $0x190] sm:$0xff]  ;;  %v7581_v47 = vld [vmem:[#allocation3 + $0x208] ss:$36 sps:$4 sm:$0xff]   ;;  %v5455_v3 = vld [vmem:[%s8202_s30 + $0x198] sm:$0xff] }
 0x146   : > { %2355 = vst [vmem:[#allocation3 + $0x64] sm:$0xf] %v6231_v48  ;;  %v6240_v48 = vpack.c.bf16 %v5630_v44, %v5630_v44  ;;  %2363 = vst [vmem:[#allocation3 + $0x184] sm:$0xf] %v6239_v43  ;;  %v7582_v54 = vld [vmem:[#allocation3 + $0x254] ss:$36 sps:$4 sm:$0xff]   ;;  %v6163_v5 = vpack.c.bf16 %v5455_v3, %v5455_v3 }
 0x147   : > { %4412 = vmatmul.mubr.bf16.gmra.mxu0 %v7536_v53  ;;  %4315 = vmatmul.mubr.bf16.gmra.mxu1 %v7535_v55  ;;  %v6153_v53 = vpack.c.bf16 %v5445_v49, %v5445_v49  ;;  %v5559_v55 = vld [vmem:[%s8202_s30 + $0x97] sm:$0xff]  ;;  %v7580_v1 = vld [vmem:[#allocation3 + $0x440] ss:$36 sps:$4 sm:$0xff]   ;;  %2174 = vst [vmem:[#allocation3 + $0x1ec] sm:$0xf] %v6210_v61  ;;  %v5570_v12 = vld [vmem:[%s8202_s30 + $0x10f] sm:$0xff] }
 0x148   : > { %4419 = vmatprep.mubr.bf16.mxu0 %v7539_v56  ;;  %4322 = vmatprep.mubr.bf16.mxu1 %v7537_v62  ;;  %v5560_v56 = vld [vmem:[%s8202_s30 + $0x9f] sm:$0xff]  ;;  %v6233_v62 = vpack.c.bf16 %v5623_v60, %v5623_v60  ;;  %2364 = vst [vmem:[#allocation3 + $0x1a8] sm:$0xf] %v6240_v48  ;;  %1804 = vst [vmem:[#allocation3 + $0x448] sm:$0xf] %v6163_v5  ;;  %v6212_v16 = vpack.c.bf16 %v5570_v12, %v5570_v12  ;;  %v5571_v19 = vld [vmem:[%s8202_s30 + $0x127] sm:$0xff] }
 0x149   : > { %7217 = vmatpush3.bf16.msra.mxu0 %v7560_v58  ;;  %1794 = vst [vmem:[#allocation3 + $0x2e0] sm:$0xf] %v6153_v53  ;;  %v6201_v58 = vpack.c.bf16 %v5559_v55, %v5559_v55  ;;  %v6202_v59 = vpack.c.bf16 %v5560_v56, %v5560_v56  ;;  %2369 = vst [vmem:[#allocation3 + $0x25c] sm:$0xf] %v6153_v53  ;;  %v5567_v53 = vld [vmem:[%s8202_s30 + $0xf7] sm:$0xff]  ;;  %v6194_v56 = vpack.c.bf16 %v5518_v52, %v5518_v52  ;;  %v5632_v60 = vld [vmem:[%s8202_s30 + $0x100] sm:$0xff] }
 0x14a   : > { %7218 = vmatprep.subr.bf16.mxu0 %v7575_v18  ;;  %2357 = vst [vmem:[#allocation3 + $0xac] sm:$0xf] %v6233_v62  ;;  %v6242_v63 = vpack.c.bf16 %v5632_v60, %v5632_v60  ;;  %v7586_v2 = vld [vmem:[#allocation3 + $0x1c] ss:$36 sps:$4 sm:$0xff]   ;;  %v5572_v20 = vld [vmem:[%s8202_s30 + $0x12f] sm:$0xff]  ;;  %v6213_v21 = vpack.c.bf16 %v5571_v19, %v5571_v19  ;;  %v5577_v3 = vld [vmem:[%s8202_s30 + $0x167] sm:$0xff] }
 0x14b   : > { %2165 = vst [vmem:[#allocation3 + $0xa8] sm:$0xf] %v6201_v58  ;;  %2166 = vst [vmem:[#allocation3 + $0xcc] sm:$0xf] %v6202_v59  ;;  %v6209_v58 = vpack.c.bf16 %v5567_v53, %v5567_v53  ;;  %v5631_v59 = vld [vmem:[%s8202_s30 + $0xf8] sm:$0xff]  ;;  %v5456_v4 = vld [vmem:[%s8202_s30 + $0x1a0] sm:$0xff] }
 0x14c   : > { %v6241_v62 = vpack.c.bf16 %v5631_v59, %v5631_v59  ;;  %1995 = vst [vmem:[#allocation3 + $0x428] sm:$0xf] %v6194_v56  ;;  %2570 = vst [vmem:[#allocation3 + $0x3a4] sm:$0xf] %v6194_v56  ;;  %v6164_v6 = vpack.c.bf16 %v5456_v4, %v5456_v4  ;;  %v5520_v8 = vld [vmem:[%s8202_s30 + $0x1a1] sm:$0xff]  ;;  %v5685_v25 = vld [vmem:[%s8202_s30 + $0x79] sm:$0xff] }
 0x14d   : > { %7219 = vmatpush3.bf16.msra.mxu0 %v7575_v18  ;;  %v6157_v18 = vpack.c.bf16 %v5449_v15, %v5449_v15  ;;  %2173 = vst [vmem:[#allocation3 + $0x1c8] sm:$0xf] %v6209_v58  ;;  %2366 = vst [vmem:[#allocation3 + $0x1f0] sm:$0xf] %v6242_v63  ;;  %v5634_v15 = vld [vmem:[%s8202_s30 + $0x110] sm:$0xff]  ;;  %v5688_v40 = vld [vmem:[%s8202_s30 + $0xa1] sm:$0xff] }
 0x14e   : > { %7220 = vmatprep.subr.bf16.mxu0 %v7588_v39  ;;  %2365 = vst [vmem:[#allocation3 + $0x1cc] sm:$0xf] %v6241_v62  ;;  %1805 = vst [vmem:[#allocation3 + $0x46c] sm:$0xf] %v6164_v6  ;;  %v7584_v31 = vld [vmem:[#allocation3 + $0x18] ss:$36 sps:$4 sm:$0xff]   ;;  %v6266_v44 = vpack.c.bf16 %v5688_v40, %v5688_v40 }
 0x14f   : > { %4420 = vmatmul.mubr.bf16.gmra.mxu0 %v7542_v7  ;;  %4323 = vmatmul.mubr.bf16.gmra.mxu1 %v7541_v13  ;;  %v7566_v7 = vld [vmem:[#allocation3 + $0x178] ss:$36 sps:$4 sm:$0xff]   ;;  %v6235_v13 = vpack.c.bf16 %v5625_v9, %v5625_v9  ;;  %1798 = vst [vmem:[#allocation3 + $0x370] sm:$0xf] %v6157_v18  ;;  %2373 = vst [vmem:[#allocation3 + $0x2ec] sm:$0xf] %v6157_v18  ;;  %v6244_v18 = vpack.c.bf16 %v5634_v15, %v5634_v15 }
 0x150   : > { %4427 = vmatprep.mubr.bf16.mxu0 %v7548_v11  ;;  %4330 = vmatprep.mubr.bf16.mxu1 %v7546_v14  ;;  %v7569_v11 = vld [vmem:[#allocation3 + $0x1c4] ss:$36 sps:$4 sm:$0xff]   ;;  %v6236_v14 = vpack.c.bf16 %v5626_v10, %v5626_v10  ;;  %2379 = vst [vmem:[#allocation3 + $0x3c4] sm:$0xf] %v6163_v5  ;;  %2380 = vst [vmem:[#allocation3 + $0x3e8] sm:$0xf] %v6164_v6  ;;  %v6219_v5 = vpack.c.bf16 %v5577_v3, %v5577_v3 }
 0x151   : > { %7221 = vmatpush3.bf16.msra.mxu0 %v7588_v39  ;;  %2359 = vst [vmem:[#allocation3 + $0xf4] sm:$0xf] %v6235_v13  ;;  %v5566_v39 = vld [vmem:[%s8202_s30 + $0xdf] sm:$0xff]  ;;  %v5569_v9 = vld [vmem:[%s8202_s30 + $0x107] sm:$0xff]  ;;  %2176 = vst [vmem:[#allocation3 + $0x234] sm:$0xf] %v6212_v16 }
 0x152   : > { %7222 = vmatprep.subr.bf16.mxu0 %v7601_v0  ;;  %2360 = vst [vmem:[#allocation3 + $0x118] sm:$0xf] %v6236_v14  ;;  %v6208_v42 = vpack.c.bf16 %v5566_v39, %v5566_v39  ;;  %v6211_v13 = vpack.c.bf16 %v5569_v9, %v5569_v9  ;;  %v5633_v14 = vld [vmem:[%s8202_s30 + $0x108] sm:$0xff]  ;;  %2368 = vst [vmem:[#allocation3 + $0x238] sm:$0xf] %v6244_v18  ;;  %v5573_v35 = vld [vmem:[%s8202_s30 + $0x137] sm:$0xff] }
 0x153   : > { %v6243_v17 = vpack.c.bf16 %v5633_v14, %v5633_v14  ;;  %2177 = vst [vmem:[#allocation3 + $0x258] sm:$0xf] %v6213_v21  ;;  %v7591_v32 = vld [vmem:[#allocation3 + $0x64] ss:$36 sps:$4 sm:$0xff]   ;;  %v5690_v43 = vld [vmem:[%s8202_s30 + $0xb1] sm:$0xff]  ;;  %v5693_v57 = vld [vmem:[%s8202_s30 + $0xd9] sm:$0xff] }
 0x154   : > { %2172 = vst [vmem:[#allocation3 + $0x1a4] sm:$0xf] %v6208_v42  ;;  %2175 = vst [vmem:[#allocation3 + $0x210] sm:$0xf] %v6211_v13  ;;  %v5689_v42 = vld [vmem:[%s8202_s30 + $0xa9] sm:$0xff]  ;;  %v5576_v52 = vld [vmem:[%s8202_s30 + $0x15f] sm:$0xff]  ;;  %v6271_v61 = vpack.c.bf16 %v5693_v57, %v5693_v57 }
 0x155   : > { %7223 = vmatpush3.bf16.msra.mxu0 %v7601_v0  ;;  %v7627_v0 = vld [vmem:[#allocation7 + $0x200] sm:$0xff]   ;;  %2367 = vst [vmem:[#allocation3 + $0x214] sm:$0xf] %v6243_v17  ;;  %2550 = vst [vmem:[#allocation3 + $0xd4] sm:$0xf] %v6266_v44  ;;  %v5692_v56 = vld [vmem:[%s8202_s30 + $0xd1] sm:$0xff] }
 0x156   : > { %v7594_v48 = vld [vmem:[#allocation3 + $0x60] ss:$36 sps:$4 sm:$0xff]   ;;  %v6270_v59 = vpack.c.bf16 %v5692_v56, %v5692_v56  ;;  %2555 = vst [vmem:[#allocation3 + $0x188] sm:$0xf] %v6271_v61  ;;  %v5578_v4 = vld [vmem:[%s8202_s30 + $0x16f] sm:$0xff]  ;;  %v5583_v40 = vld [vmem:[%s8202_s30 + $0x1b7] sm:$0xff] }
 0x157   : > { %4428 = vmatmul.mubr.bf16.gmra.mxu0 %v7551_v26  ;;  %4331 = vmatmul.mubr.bf16.gmra.mxu1 %v7550_v29  ;;  %v6237_v26 = vpack.c.bf16 %v5627_v22, %v5627_v22  ;;  %v7572_v29 = vld [vmem:[#allocation3 + $0x1c0] ss:$36 sps:$4 sm:$0xff]   ;;  %v6214_v22 = vpack.c.bf16 %v5572_v20, %v5572_v20  ;;  %v6220_v6 = vpack.c.bf16 %v5578_v4, %v5578_v4  ;;  %v5697_v9 = vld [vmem:[%s8202_s30 + $0x109] sm:$0xff]  ;;  %v5698_v12 = vld [vmem:[%s8202_s30 + $0x111] sm:$0xff] }
 0x158   : > { %4435 = vmatprep.mubr.bf16.mxu0 %v7554_v28  ;;  %4338 = vmatprep.mubr.bf16.mxu1 %v7552_v30  ;;  %v6238_v28 = vpack.c.bf16 %v5628_v27, %v5628_v27  ;;  %v7614_v30 = vld [vmem:[#allocation7 + $0x208] sm:$0xff]   ;;  %v7599_v63 = vld [vmem:[#allocation3 + $0x2e0] ss:$36 sps:$4 sm:$0xff]   ;;  %2554 = vst [vmem:[#allocation3 + $0x164] sm:$0xf] %v6270_v59  ;;  %v6275_v13 = vpack.c.bf16 %v5697_v9, %v5697_v9  ;;  %v5700_v20 = vld [vmem:[%s8202_s30 + $0x131] sm:$0xff] }
 0x159   : > { %2361 = vst [vmem:[#allocation3 + $0x13c] sm:$0xf] %v6237_v26  ;;  %7224 = vmatprep.subr.bf16.mxu0 %v7614_v30  ;;  %v7587_v26 = vld [vmem:[#allocation3 + $0x250] ss:$36 sps:$4 sm:$0xff]   ;;  %2178 = vst [vmem:[#allocation3 + $0x27c] sm:$0xf] %v6214_v22  ;;  %v6276_v16 = vpack.c.bf16 %v5698_v12, %v5698_v12  ;;  %v6225_v44 = vpack.c.bf16 %v5583_v40, %v5583_v40 }
 0x15a   : > { %2362 = vst [vmem:[#allocation3 + $0x160] sm:$0xf] %v6238_v28  ;;  %7225 = vmatpush3.bf16.msra.mxu0 %v7614_v30  ;;  %v7589_v30 = vld [vmem:[#allocation3 + $0x29c] ss:$36 sps:$4 sm:$0xff]   ;;  %v5579_v14 = vld [vmem:[%s8202_s30 + $0x187] sm:$0xff]  ;;  %v5580_v15 = vld [vmem:[%s8202_s30 + $0x18f] sm:$0xff] }
 0x15b   : > { %7226 = vmatprep.subr.bf16.mxu0 %v7627_v0  ;;  %v5694_v60 = vld [vmem:[%s8202_s30 + $0xe1] sm:$0xff]  ;;  %2183 = vst [vmem:[#allocation3 + $0x330] sm:$0xf] %v6219_v5  ;;  %2184 = vst [vmem:[#allocation3 + $0x354] sm:$0xf] %v6220_v6  ;;  %v6221_v17 = vpack.c.bf16 %v5579_v14, %v5579_v14  ;;  %v6222_v18 = vpack.c.bf16 %v5580_v15, %v5580_v15  ;;  %v5699_v19 = vld [vmem:[%s8202_s30 + $0x129] sm:$0xff] }
 0x15c   : > { %v6272_v62 = vpack.c.bf16 %v5694_v60, %v5694_v60  ;;  %v5701_v21 = vld [vmem:[%s8202_s30 + $0x139] sm:$0xff]  ;;  %2559 = vst [vmem:[#allocation3 + $0x218] sm:$0xf] %v6275_v13  ;;  %v6277_v22 = vpack.c.bf16 %v5699_v19, %v5699_v19  ;;  %2560 = vst [vmem:[#allocation3 + $0x23c] sm:$0xf] %v6276_v16  ;;  %v5649_v9 = vld [vmem:[%s8202_s30 + $0x1c8] sm:$0xff] }
 0x15d   : > { %2185 = vst [vmem:[#allocation3 + $0x378] sm:$0xf] %v6221_v17  ;;  %2186 = vst [vmem:[#allocation3 + $0x39c] sm:$0xf] %v6222_v18  ;;  %v7617_v60 = vld [vmem:[#allocation3 + $0x184] ss:$36 sps:$4 sm:$0xff]   ;;  %v6259_v13 = vpack.c.bf16 %v5649_v9, %v5649_v9 }
 0x15e   : > { %7227 = vmatpush3.bf16.msra.mxu0 %v7627_v0  ;;  %v7600_v0 = vld [vmem:[#allocation3 + $0xa8] ss:$36 sps:$4 sm:$0xff]   ;;  %2556 = vst [vmem:[#allocation3 + $0x1ac] sm:$0xf] %v6272_v62  ;;  %2561 = vst [vmem:[#allocation3 + $0x260] sm:$0xf] %v6277_v22 }
 0x15f   : > { %4436 = vmatmul.mubr.bf16.gmra.mxu0 %v7557_v41  ;;  %4339 = vmatmul.mubr.bf16.gmra.mxu1 %v7556_v50  ;;  %v6207_v41 = vpack.c.bf16 %v5565_v38, %v5565_v38  ;;  %v6162_v50 = vpack.c.bf16 %v5454_v46, %v5454_v46  ;;  %v6215_v38 = vpack.c.bf16 %v5573_v35, %v5573_v35  ;;  %v7619_v3 = vld [vmem:[#allocation3 + $0x3b8] ss:$36 sps:$4 sm:$0xff]   ;;  %v5650_v12 = vld [vmem:[%s8202_s30 + $0x1d0] sm:$0xff]  ;;  %v5712_v15 = vld [vmem:[%s8202_s30 + $0x1c1] sm:$0xff] }
 0x160   : > { %4443 = vmatprep.mubr.bf16.mxu0 %v7563_v45  ;;  %4346 = vmatprep.mubr.bf16.mxu1 %v7561_v51  ;;  %v5453_v45 = vld [vmem:[%s8202_s30 + $0x188] sm:$0xff]  ;;  %v6268_v46 = vpack.c.bf16 %v5690_v43, %v5690_v43  ;;  %2189 = vst [vmem:[#allocation3 + $0x408] sm:$0xf] %v6225_v44  ;;  %v5711_v14 = vld [vmem:[%s8202_s30 + $0x1b9] sm:$0xff]  ;;  %v6260_v19 = vpack.c.bf16 %v5650_v12, %v5650_v12  ;;  %2383 = vst [vmem:[#allocation3 + $0x454] sm:$0xf] %v6259_v13 }
 0x161   : > { %2171 = vst [vmem:[#allocation3 + $0x180] sm:$0xf] %v6207_v41  ;;  %v6161_v49 = vpack.c.bf16 %v5453_v45, %v5453_v45  ;;  %v5517_v51 = vld [vmem:[%s8202_s30 + $0x189] sm:$0xff]  ;;  %1803 = vst [vmem:[#allocation3 + $0x424] sm:$0xf] %v6162_v50  ;;  %v6267_v45 = vpack.c.bf16 %v5689_v42, %v5689_v42 }
 0x162   : > { %v6193_v55 = vpack.c.bf16 %v5517_v51, %v5517_v51  ;;  %2378 = vst [vmem:[#allocation3 + $0x3a0] sm:$0xf] %v6162_v50  ;;  %2179 = vst [vmem:[#allocation3 + $0x2a0] sm:$0xf] %v6215_v38  ;;  %v7597_v50 = vld [vmem:[#allocation3 + $0xac] ss:$36 sps:$4 sm:$0xff]  }
 0x163   : > { %1802 = vst [vmem:[#allocation3 + $0x400] sm:$0xf] %v6161_v49  ;;  %2377 = vst [vmem:[#allocation3 + $0x37c] sm:$0xf] %v6161_v49  ;;  %v7595_v49 = vld [vmem:[#allocation3 + $0x2e4] ss:$36 sps:$4 sm:$0xff]  }
 0x164   : > { %1994 = vst [vmem:[#allocation3 + $0x404] sm:$0xf] %v6193_v55  ;;  %2569 = vst [vmem:[#allocation3 + $0x380] sm:$0xf] %v6193_v55  ;;  %v5575_v51 = vld [vmem:[%s8202_s30 + $0x157] sm:$0xff]  ;;  %v5691_v55 = vld [vmem:[%s8202_s30 + $0xc9] sm:$0xff] }
 0x165   : > { %2551 = vst [vmem:[#allocation3 + $0xf8] sm:$0xf] %v6267_v45  ;;  %2552 = vst [vmem:[#allocation3 + $0x11c] sm:$0xf] %v6268_v46  ;;  %v6217_v53 = vpack.c.bf16 %v5575_v51, %v5575_v51  ;;  %v6269_v58 = vpack.c.bf16 %v5691_v55, %v5691_v55  ;;  %v5705_v38 = vld [vmem:[%s8202_s30 + $0x169] sm:$0xff]  ;;  %v5648_v51 = vld [vmem:[%s8202_s30 + $0x1c0] sm:$0xff] }
 0x166   : > { %v6283_v42 = vpack.c.bf16 %v5705_v38, %v5705_v38  ;;  %v7612_v45 = vld [vmem:[#allocation3 + $0x370] ss:$36 sps:$4 sm:$0xff]   ;;  %v6258_v57 = vpack.c.bf16 %v5648_v51, %v5648_v51  ;;  %2384 = vst [vmem:[#allocation3 + $0x478] sm:$0xf] %v6260_v19  ;;  %v7626_v38 = vld [vmem:[#allocation3 + $0x1c8] ss:$36 sps:$4 sm:$0xff]  }
 0x167   : > { %4444 = vmatmul.mubr.bf16.gmra.mxu0 %v7566_v7  ;;  %4347 = vmatmul.mubr.bf16.gmra.mxu1 %v7565_v23  ;;  %v5519_v7 = vld [vmem:[%s8202_s30 + $0x199] sm:$0xff]  ;;  %v5683_v23 = vld [vmem:[%s8202_s30 + $0x69] sm:$0xff]  ;;  %2181 = vst [vmem:[#allocation3 + $0x2e8] sm:$0xf] %v6217_v53  ;;  %2553 = vst [vmem:[#allocation3 + $0x140] sm:$0xf] %v6269_v58 }
 0x168   : > { %4451 = vmatprep.mubr.bf16.mxu0 %v7569_v11  ;;  %4354 = vmatprep.mubr.bf16.mxu1 %v7567_v24  ;;  %v6195_v10 = vpack.c.bf16 %v5519_v7, %v5519_v7  ;;  %v6196_v11 = vpack.c.bf16 %v5520_v8, %v5520_v8  ;;  %v5684_v24 = vld [vmem:[%s8202_s30 + $0x71] sm:$0xff]  ;;  %v6261_v27 = vpack.c.bf16 %v5683_v23, %v5683_v23  ;;  %v5695_v7 = vld [vmem:[%s8202_s30 + $0xf9] sm:$0xff]  ;;  %v5696_v8 = vld [vmem:[%s8202_s30 + $0x101] sm:$0xff] }
 0x169   : > { %v6262_v28 = vpack.c.bf16 %v5684_v24, %v5684_v24  ;;  %v6278_v23 = vpack.c.bf16 %v5700_v20, %v5700_v20  ;;  %v6279_v24 = vpack.c.bf16 %v5701_v21, %v5701_v21  ;;  %2567 = vst [vmem:[#allocation3 + $0x338] sm:$0xf] %v6283_v42  ;;  %2382 = vst [vmem:[#allocation3 + $0x430] sm:$0xf] %v6258_v57  ;;  %v7620_v6 = vld [vmem:[#allocation3 + $0x180] ss:$36 sps:$4 sm:$0xff]  }
 0x16a   : > { %1996 = vst [vmem:[#allocation3 + $0x44c] sm:$0xf] %v6195_v10  ;;  %1997 = vst [vmem:[#allocation3 + $0x470] sm:$0xf] %v6196_v11  ;;  %v6289_v20 = vpack.c.bf16 %v5711_v14, %v5711_v14  ;;  %v6290_v21 = vpack.c.bf16 %v5712_v15, %v5712_v15  ;;  %v5713_v22 = vld [vmem:[%s8202_s30 + $0x1c9] sm:$0xff] }
 0x16b   : > { %2571 = vst [vmem:[#allocation3 + $0x3c8] sm:$0xf] %v6195_v10  ;;  %2572 = vst [vmem:[#allocation3 + $0x3ec] sm:$0xf] %v6196_v11  ;;  %v6273_v10 = vpack.c.bf16 %v5695_v7, %v5695_v7  ;;  %v6274_v11 = vpack.c.bf16 %v5696_v8, %v5696_v8  ;;  %v5585_v7 = vld [vmem:[%s8202_s30 + $0x1c7] sm:$0xff]  ;;  %v5586_v8 = vld [vmem:[%s8202_s30 + $0x1cf] sm:$0xff] }
 0x16c   : > { %2545 = vst [vmem:[#allocation3 + $0x20] sm:$0xf] %v6261_v27  ;;  %2546 = vst [vmem:[#allocation3 + $0x44] sm:$0xf] %v6262_v28  ;;  %v7608_v27 = vld [vmem:[#allocation3 + $0x374] ss:$36 sps:$4 sm:$0xff]  }
 0x16d   : > { %2557 = vst [vmem:[#allocation3 + $0x1d0] sm:$0xf] %v6273_v10  ;;  %2558 = vst [vmem:[#allocation3 + $0x1f4] sm:$0xf] %v6274_v11  ;;  %v5702_v28 = vld [vmem:[%s8202_s30 + $0x141] sm:$0xff]  ;;  %v6227_v10 = vpack.c.bf16 %v5585_v7, %v5585_v7  ;;  %v6228_v11 = vpack.c.bf16 %v5586_v8, %v5586_v8 }
 0x16e   : > { %2562 = vst [vmem:[#allocation3 + $0x284] sm:$0xf] %v6278_v23  ;;  %2563 = vst [vmem:[#allocation3 + $0x2a8] sm:$0xf] %v6279_v24  ;;  %v7621_v18 = vld [vmem:[#allocation3 + $0x404] ss:$36 sps:$4 sm:$0xff]  }
 0x16f   : > { %4452 = vmatmul.mubr.bf16.gmra.mxu0 %v7572_v29  ;;  %4355 = vmatmul.mubr.bf16.gmra.mxu1 %v7571_v36  ;;  %v6263_v29 = vpack.c.bf16 %v5685_v25, %v5685_v25  ;;  %v5574_v36 = vld [vmem:[%s8202_s30 + $0x13f] sm:$0xff]  ;;  %v7606_v25 = vld [vmem:[#allocation3 + $0x328] ss:$36 sps:$4 sm:$0xff]   ;;  %v5714_v23 = vld [vmem:[%s8202_s30 + $0x1d1] sm:$0xff]  ;;  %2191 = vst [vmem:[#allocation3 + $0x450] sm:$0xf] %v6227_v10 }
 0x170   : > { %4459 = vmatprep.mubr.bf16.mxu0 %v7578_v33  ;;  %4362 = vmatprep.mubr.bf16.mxu1 %v7576_v37  ;;  %v5686_v33 = vld [vmem:[%s8202_s30 + $0x81] sm:$0xff]  ;;  %v5687_v37 = vld [vmem:[%s8202_s30 + $0x99] sm:$0xff]  ;;  %v6216_v39 = vpack.c.bf16 %v5574_v36, %v5574_v36  ;;  %2192 = vst [vmem:[#allocation3 + $0x474] sm:$0xf] %v6228_v11  ;;  %2573 = vst [vmem:[#allocation3 + $0x410] sm:$0xf] %v6289_v20 }
 0x171   : > { %2547 = vst [vmem:[#allocation3 + $0x68] sm:$0xf] %v6263_v29  ;;  %v6264_v34 = vpack.c.bf16 %v5686_v33, %v5686_v33  ;;  %v6265_v41 = vpack.c.bf16 %v5687_v37, %v5687_v37  ;;  %v5581_v29 = vld [vmem:[%s8202_s30 + $0x197] sm:$0xff]  ;;  %2574 = vst [vmem:[#allocation3 + $0x434] sm:$0xf] %v6290_v21 }
 0x172   : > { %2180 = vst [vmem:[#allocation3 + $0x2c4] sm:$0xf] %v6216_v39  ;;  %v5703_v33 = vld [vmem:[%s8202_s30 + $0x159] sm:$0xff]  ;;  %v5706_v39 = vld [vmem:[%s8202_s30 + $0x171] sm:$0xff]  ;;  %v7632_v51 = vld [vmem:[#allocation3 + $0x448] ss:$36 sps:$4 sm:$0xff]  }
 0x173   : > { %2548 = vst [vmem:[#allocation3 + $0x8c] sm:$0xf] %v6264_v34  ;;  %2549 = vst [vmem:[#allocation3 + $0xb0] sm:$0xf] %v6265_v41  ;;  %v5704_v34 = vld [vmem:[%s8202_s30 + $0x161] sm:$0xff]  ;;  %v6281_v36 = vpack.c.bf16 %v5703_v33, %v5703_v33  ;;  %v6284_v43 = vpack.c.bf16 %v5706_v39, %v5706_v39 }
 0x174   : > { %v6282_v37 = vpack.c.bf16 %v5704_v34, %v5704_v34  ;;  %v7610_v41 = vld [vmem:[#allocation3 + $0x13c] ss:$36 sps:$4 sm:$0xff]   ;;  %v7630_v44 = vld [vmem:[#allocation3 + $0x214] ss:$36 sps:$4 sm:$0xff]   ;;  %v7641_v9 = vld [vmem:[#allocation3 + $0x2a4] ss:$36 sps:$4 sm:$0xff]  }
 0x175   : > { %2565 = vst [vmem:[#allocation3 + $0x2f0] sm:$0xf] %v6281_v36  ;;  %2568 = vst [vmem:[#allocation3 + $0x35c] sm:$0xf] %v6284_v43  ;;  %v7647_v21 = vld [vmem:[#allocation3 + $0x140] ss:$36 sps:$4 sm:$0xff]  }
 0x176   : > { %2566 = vst [vmem:[#allocation3 + $0x314] sm:$0xf] %v6282_v37  ;;  %v7625_v37 = vld [vmem:[#allocation3 + $0x400] ss:$36 sps:$4 sm:$0xff]  }
 0x177   : > { %4460 = vmatmul.mubr.bf16.gmra.mxu0 %v7581_v47  ;;  %4363 = vmatmul.mubr.bf16.gmra.mxu1 %v7580_v1  ;;  %v7593_v47 = vld [vmem:[#allocation3 + $0x298] ss:$36 sps:$4 sm:$0xff]   ;;  %v7602_v1 = vld [vmem:[#allocation3 + $0x32c] ss:$36 sps:$4 sm:$0xff]  }
 0x178   : > { %4467 = vmatprep.mubr.bf16.mxu0 %v7582_v54  ;;  %4564 = vmatprep.mubr.bf16.mxu1 %v7586_v2  ;;  %v6218_v54 = vpack.c.bf16 %v5576_v52, %v5576_v52  ;;  %v7604_v2 = vld [vmem:[#allocation3 + $0xf4] ss:$36 sps:$4 sm:$0xff]  }
 0x179   : > { %v7639_v20 = vld [vmem:[#allocation3 + $0x2a0] ss:$36 sps:$4 sm:$0xff]  }
 0x17a   : > { %2182 = vst [vmem:[#allocation3 + $0x30c] sm:$0xf] %v6218_v54  ;;  %v7615_v54 = vld [vmem:[#allocation3 + $0x3bc] ss:$36 sps:$4 sm:$0xff]  }
 0x17f   : > { %4468 = vmatmul.mubr.bf16.gmra.mxu0 %v7587_v26  ;;  %4565 = vmatmul.mubr.bf16.vlgmr.msra.gmra.mxu1 %v7584_v31  ;;  %v7607_v26 = vld [vmem:[#allocation3 + $0xf0] ss:$36 sps:$4 sm:$0xff]   ;;  %v5582_v31 = vld [vmem:[%s8202_s30 + $0x19f] sm:$0xff] }
 0x180   : > { %4475 = vmatprep.mubr.bf16.mxu0 %v7589_v30  ;;  %4572 = vmatprep.mubr.bf16.mxu1 %v7591_v32  ;;  %v6280_v30 = vpack.c.bf16 %v5702_v28, %v5702_v28  ;;  %v6223_v32 = vpack.c.bf16 %v5581_v29, %v5581_v29  ;;  %v6224_v35 = vpack.c.bf16 %v5582_v31, %v5582_v31 }
 0x181   : > { %v6292_v28 = vpack.c.bf16 %v5714_v23, %v5714_v23 }
 0x182   : > { %2564 = vst [vmem:[#allocation3 + $0x2cc] sm:$0xf] %v6280_v30  ;;  %2187 = vst [vmem:[#allocation3 + $0x3c0] sm:$0xf] %v6223_v32 }
 0x183   : > { %2188 = vst [vmem:[#allocation3 + $0x3e4] sm:$0xf] %v6224_v35  ;;  %2576 = vst [vmem:[#allocation3 + $0x47c] sm:$0xf] %v6292_v28 }
 0x187   : > { %4476 = vmatmul.mubr.bf16.gmra.mxu0 %v7593_v47  ;;  %4573 = vmatmul.mubr.bf16.gmra.mxu1 %v7594_v48  ;;  %v7613_v48 = vld [vmem:[#allocation3 + $0x138] ss:$36 sps:$4 sm:$0xff]  }
 0x188   : > { %4483 = vmatprep.mubr.bf16.mxu0 %v7595_v49  ;;  %4580 = vmatprep.mubr.bf16.mxu1 %v7597_v50  ;;  %v5584_v49 = vld [vmem:[%s8202_s30 + $0x1bf] sm:$0xff] }
 0x189   : > { %v5647_v50 = vld [vmem:[%s8202_s30 + $0x1b8] sm:$0xff]  ;;  %v6226_v55 = vpack.c.bf16 %v5584_v49, %v5584_v49  ;;  %s7732_s30 = sshll.u32 %s7859_s28, 4  ;;  %s7733_s30 = int_to_ptr.vmem [resolvable:$false] %s7732_s30 }
 0x18a   : > { %v6257_v56 = vpack.c.bf16 %v5647_v50, %v5647_v50  ;;  %s7734_s26 = scalar_lea.vmem %s7733_s30, 4096  ;;  %p7735_p5 = scmp.lt.s32.totalorder %s8926_s8, %s7733_s30 }
 0x18b   : > { %2190 = vst [vmem:[#allocation3 + $0x42c] sm:$0xf] %v6226_v55  ;;  %p7736_p6 = scmp.lt.s32.totalorder %s7734_s26, %s7728_s5 }
 0x18c   : > { %2381 = vst [vmem:[#allocation3 + $0x40c] sm:$0xf] %v6257_v56 }
 0x18d   : > { %p7737_p8 = por %p7736_p6, %p7735_p5 }
 0x18f   : > { %4484 = vmatmul.mubr.bf16.gmra.mxu0 %v7599_v63  ;;  %4581 = vmatmul.mubr.bf16.gmra.mxu1 %v7600_v0  ;;  %p7738_p7 = pnand %p7737_p8, %p7731_p13 }
 0x190   : > { %4491 = vmatprep.mubr.bf16.mxu0 %v7602_v1  ;;  %4588 = vmatprep.mubr.bf16.mxu1 %v7604_v2 }
 0x197   : > { %4492 = vmatmul.mubr.bf16.gmra.mxu0 %v7606_v25  ;;  %4589 = vmatmul.mubr.bf16.gmra.mxu1 %v7607_v26  ;;  %v7623_v26 = vld [vmem:[#allocation3 + $0x1cc] ss:$36 sps:$4 sm:$0xff]  }
 0x198   : > { %4499 = vmatprep.mubr.bf16.mxu0 %v7608_v27  ;;  %4596 = vmatprep.mubr.bf16.mxu1 %v7610_v41  ;;  %v6291_v27 = vpack.c.bf16 %v5713_v22, %v5713_v22  ;;  %v7628_v41 = vld [vmem:[#allocation3 + $0x44c] ss:$36 sps:$4 sm:$0xff]  }
 0x19a   : > { %2575 = vst [vmem:[#allocation3 + $0x458] sm:$0xf] %v6291_v27 }
 0x19f   : > { %v6756_v46 = vpop.f32.mrf.mxu0  ;;  %v6828_v47 = vpop.f32.mrf.mxu1  ;;  %4500 = vmatmul.mubr.bf16.gmra.mxu0 %v7612_v45  ;;  %4597 = vmatmul.mubr.bf16.gmra.mxu1 %v7613_v48 }
 0x1a0   : > { %4507 = vmatprep.mubr.bf16.mxu0 %v7615_v54  ;;  %4604 = vmatprep.mubr.bf16.mxu1 %v7617_v60  ;;  %v7636_v54 = vld [vmem:[#allocation3 + $0x25c] ss:$36 sps:$4 sm:$0xff]  }
 0x1a1   : > { %v6757_v52 = vpop.f32.mrf.mxu0  ;;  %v6829_v53 = vpop.f32.mrf.mxu1 }
 0x1a2   : > { %v8404_v58 = vadd.f32 %v6757_v52, %v6756_v46  ;;  %v8406_v59 = vadd.f32 %v6829_v53, %v6828_v47  ;;  %v7633_v52 = vld [vmem:[#allocation3 + $0x210] ss:$36 sps:$4 sm:$0xff]   ;;  %v7637_v53 = vld [vmem:[#allocation3 + $0x20] ss:$36 sps:$4 sm:$0xff]  }
 0x1a3   : > { %v6759_v61 = vpop.f32.mrf.mxu0  ;;  %v6831_v62 = vpop.f32.mrf.mxu1 }
 0x1a5   : > { %v6760_v63 = vpop.f32.mrf.mxu0  ;;  %v6832_v0 = vpop.f32.mrf.mxu1 }
 0x1a6   : > { %v8408_v1 = vadd.f32 %v6760_v63, %v6759_v61  ;;  %v8410_v2 = vadd.f32 %v6832_v0, %v6831_v62 }
 0x1a7   : > { %v6762_v4 = vpop.f32.mrf.mxu0  ;;  %v6834_v5 = vpop.f32.mrf.mxu1  ;;  %4508 = vmatmul.mubr.bf16.gmra.mxu0 %v7619_v3  ;;  %4605 = vmatmul.mubr.bf16.gmra.mxu1 %v7620_v6  ;;  %v7638_v3 = vld [vmem:[#allocation3 + $0x68] ss:$36 sps:$4 sm:$0xff]   ;;  %v7642_v6 = vld [vmem:[#allocation3 + $0xb0] ss:$36 sps:$4 sm:$0xff]  }
 0x1a8   : > { %4515 = vmatprep.mubr.bf16.mxu0 %v7621_v18  ;;  %4612 = vmatprep.mubr.bf16.mxu1 %v7623_v26  ;;  %v7643_v18 = vld [vmem:[#allocation3 + $0xf8] ss:$36 sps:$4 sm:$0xff]   ;;  %v7646_v26 = vld [vmem:[#allocation3 + $0x2ec] ss:$36 sps:$4 sm:$0xff]  }
 0x1a9   : > { %v6763_v16 = vpop.f32.mrf.mxu0  ;;  %v6835_v17 = vpop.f32.mrf.mxu1 }
 0x1aa   : > { %v8420_v24 = vadd.f32 %v6763_v16, %v6762_v4  ;;  %v8422_v25 = vadd.f32 %v6835_v17, %v6834_v5  ;;  %v7634_v5 = vld [vmem:[#allocation3 + $0x258] ss:$36 sps:$4 sm:$0xff]  }
 0x1ab   : > { %v6765_v29 = vpop.f32.mrf.mxu0  ;;  %v6837_v30 = vpop.f32.mrf.mxu1 }
 0x1ad   : > { %v6766_v31 = vpop.f32.mrf.mxu0  ;;  %v6838_v32 = vpop.f32.mrf.mxu1 }
 0x1ae   : > { %v8424_v33 = vadd.f32 %v6766_v31, %v6765_v29  ;;  %v8426_v34 = vadd.f32 %v6838_v32, %v6837_v30 }
 0x1af   : > { %v6768_v35 = vpop.f32.mrf.mxu0  ;;  %v6840_v36 = vpop.f32.mrf.mxu1  ;;  %4516 = vmatmul.mubr.bf16.gmra.mxu0 %v7625_v37  ;;  %4613 = vmatmul.mubr.bf16.gmra.mxu1 %v7626_v38 }
 0x1b0   : > { %4523 = vmatprep.mubr.bf16.mxu0 %v7628_v41  ;;  %4620 = vmatprep.mubr.bf16.mxu1 %v7630_v44  ;;  %v7644_v41 = vld [vmem:[#allocation3 + $0x2e8] ss:$36 sps:$4 sm:$0xff]   ;;  %v7652_v44 = vld [vmem:[#allocation3 + $0x1d0] ss:$36 sps:$4 sm:$0xff]  }
 0x1b1   : > { %v6769_v39 = vpop.f32.mrf.mxu0  ;;  %v6841_v40 = vpop.f32.mrf.mxu1 }
 0x1b2   : > { %v8428_v42 = vadd.f32 %v6769_v39, %v6768_v35  ;;  %v8430_v43 = vadd.f32 %v6841_v40, %v6840_v36  ;;  %v7648_v39 = vld [vmem:[#allocation3 + $0x188] ss:$36 sps:$4 sm:$0xff]  }
 0x1b3   : > { %v6771_v45 = vpop.f32.mrf.mxu0  ;;  %v6843_v46 = vpop.f32.mrf.mxu1 }
 0x1b5   : > { %v6772_v47 = vpop.f32.mrf.mxu0  ;;  %v6844_v48 = vpop.f32.mrf.mxu1 }
 0x1b6   : > { %v8432_v49 = vadd.f32 %v6772_v47, %v6771_v45  ;;  %v8434_v50 = vadd.f32 %v6844_v48, %v6843_v46  ;;  %v7651_v47 = vld [vmem:[#allocation3 + $0x334] ss:$36 sps:$4 sm:$0xff]  }
 0x1b7   : > { %v6774_v55 = vpop.f32.mrf.mxu0  ;;  %v6846_v56 = vpop.f32.mrf.mxu1  ;;  %4524 = vmatmul.mubr.bf16.gmra.mxu0 %v7632_v51  ;;  %4621 = vmatmul.mubr.bf16.gmra.mxu1 %v7633_v52 }
 0x1b8   : > { %7228 = vmatprep.mubr.bf16.mxu0 %v7637_v53  ;;  %4628 = vmatprep.mubr.bf16.mxu1 %v7636_v54 }
 0x1b9   : > { %v6775_v57 = vpop.f32.mrf.mxu0  ;;  %v6847_v61 = vpop.f32.mrf.mxu1 }
 0x1ba   : > { %v8436_v60 = vadd.f32 %v6775_v57, %v6774_v55  ;;  %v8438_v62 = vadd.f32 %v6847_v61, %v6846_v56 }
 0x1bb   : > { %v6777_v63 = vpop.f32.mrf.mxu0  ;;  %v6849_v0 = vpop.f32.mrf.mxu1 }
 0x1bd   : > { %v6778_v4 = vpop.f32.mrf.mxu0  ;;  %v6850_v8 = vpop.f32.mrf.mxu1 }
 0x1be   : > { %v8440_v7 = vadd.f32 %v6778_v4, %v6777_v63  ;;  %v8442_v10 = vadd.f32 %v6850_v8, %v6849_v0  ;;  %v7653_v63 = vld [vmem:[#allocation3 + $0x218] ss:$36 sps:$4 sm:$0xff]   ;;  %v7657_v4 = vld [vmem:[#allocation3 + $0x260] ss:$36 sps:$4 sm:$0xff]  }
 0x1bf   : > { %v6780_v11 = vpop.f32.mrf.mxu0  ;;  %7229 = vmatmul.mubr.bf16.vlgmr.msra.gmra.mxu0 %v7638_v3  ;;  %v6868_v12 = vpop.f32.mrf.mxu1  ;;  %4629 = vmatmul.mubr.bf16.gmra.mxu1 %v7634_v5  ;;  %v7649_v3 = vld [vmem:[#allocation3 + $0x330] ss:$36 sps:$4 sm:$0xff]   ;;  %v7656_v8 = vld [vmem:[#allocation3 + $0x37c] ss:$36 sps:$4 sm:$0xff]  }
 0x1c0   : > { %7232 = vmatprep.mubr.bf16.mxu0 %v7642_v6  ;;  %4636 = vmatprep.mubr.bf16.mxu1 %v7641_v9 }
 0x1c1   : > { %v6781_v13 = vpop.f32.mrf.mxu0  ;;  %v6869_v15 = vpop.f32.mrf.mxu1 }
 0x1c2   : > { %v8444_v14 = vadd.f32 %v6781_v13, %v6780_v11  ;;  %v6870_v16 = vadd.f32 %v6869_v15, %v6868_v12 }
 0x1c3   : > { %v6783_v17 = vpop.f32.mrf.mxu0  ;;  %v6871_v19 = vpop.f32.mrf.mxu1 }
 0x1c4   : > { %v8447_v22 = vadd.f32 %v6870_v16, %v8404_v58 }
 0x1c5   : > { %v6784_v23 = vpop.f32.mrf.mxu0  ;;  %v6872_v28 = vpop.f32.mrf.mxu1 }
 0x1c6   : > { %v8449_v27 = vadd.f32 %v6784_v23, %v6783_v17  ;;  %v6873_v29 = vadd.f32 %v6872_v28, %v6871_v19  ;;  %v7654_v23 = vld [vmem:[#allocation3 + $0x378] ss:$36 sps:$4 sm:$0xff]  }
 0x1c7   : > { %v6786_v30 = vpop.f32.mrf.mxu0  ;;  %7233 = vmatmul.mubr.bf16.gmra.mxu0 %v7643_v18  ;;  %v6874_v31 = vpop.f32.mrf.mxu1  ;;  %4637 = vmatmul.mubr.bf16.gmra.mxu1 %v7639_v20  ;;  %v7658_v20 = vld [vmem:[#allocation3 + $0x2a8] ss:$36 sps:$4 sm:$0xff]  }
 0x1c8   : > { %7236 = vmatprep.mubr.bf16.mxu0 %v7647_v21  ;;  %v8452_v32 = vadd.f32 %v6873_v29, %v8408_v1  ;;  %4644 = vmatprep.mubr.bf16.mxu1 %v7646_v26  ;;  %v7662_v26 = vld [vmem:[#allocation3 + $0x2f0] ss:$36 sps:$4 sm:$0xff]  }
 0x1c9   : > { %v6787_v35 = vpop.f32.mrf.mxu0  ;;  %v6875_v58 = vpop.f32.mrf.mxu1 }
 0x1ca   : > { %v8454_v36 = vadd.f32 %v6787_v35, %v6786_v30  ;;  %v6876_v37 = vadd.f32 %v6875_v58, %v6874_v31  ;;  %v7661_v30 = vld [vmem:[#allocation3 + $0x3c4] ss:$36 sps:$4 sm:$0xff]  }
 0x1cb   : > { %v6789_v38 = vpop.f32.mrf.mxu0  ;;  %v6877_v40 = vpop.f32.mrf.mxu1 }
 0x1cc   : > { %v8457_v45 = vadd.f32 %v6876_v37, %v8420_v24 }
 0x1cd   : > { %v6790_v46 = vpop.f32.mrf.mxu0  ;;  %v6878_v1 = vpop.f32.mrf.mxu1 }
 0x1ce   : > { %v8459_v48 = vadd.f32 %v6790_v46, %v6789_v38  ;;  %v6879_v51 = vadd.f32 %v6878_v1, %v6877_v40  ;;  %v7663_v46 = vld [vmem:[#allocation3 + $0x338] ss:$36 sps:$4 sm:$0xff]   ;;  %v7659_v1 = vld [vmem:[#allocation3 + $0x3c0] ss:$36 sps:$4 sm:$0xff]  }
 0x1cf   : > { %v6792_v52 = vpop.f32.mrf.mxu0  ;;  %7237 = vmatmul.mubr.bf16.gmra.mxu0 %v7648_v39  ;;  %v6880_v53 = vpop.f32.mrf.mxu1  ;;  %4645 = vmatmul.mubr.bf16.gmra.mxu1 %v7644_v41 }
 0x1d0   : > { %7240 = vmatprep.mubr.bf16.mxu0 %v7652_v44  ;;  %v8462_v54 = vadd.f32 %v6879_v51, %v8424_v33  ;;  %4652 = vmatprep.mubr.bf16.mxu1 %v7651_v47  ;;  %v7667_v51 = vld [vmem:[#allocation3 + $0x380] ss:$36 sps:$4 sm:$0xff]  }
 0x1d1   : > { %v6793_v55 = vpop.f32.mrf.mxu0  ;;  %v6881_v24 = vpop.f32.mrf.mxu1 }
 0x1d2   : > { %v8464_v56 = vadd.f32 %v6793_v55, %v6792_v52  ;;  %v6882_v57 = vadd.f32 %v6881_v24, %v6880_v53  ;;  %v7666_v55 = vld [vmem:[#allocation3 + $0x40c] ss:$36 sps:$4 sm:$0xff]  }
 0x1d3   : > { %v6795_v61 = vpop.f32.mrf.mxu0  ;;  %v6883_v0 = vpop.f32.mrf.mxu1 }
 0x1d4   : > { %v8467_v5 = vadd.f32 %v6882_v57, %v8428_v42 }
 0x1d5   : > { %v6796_v6 = vpop.f32.mrf.mxu0  ;;  %v6884_v33 = vpop.f32.mrf.mxu1 }
 0x1d6   : > { %v8469_v9 = vadd.f32 %v6796_v6, %v6795_v61  ;;  %v6885_v11 = vadd.f32 %v6884_v33, %v6883_v0  ;;  %v7668_v33 = vld [vmem:[#allocation3 + $0x3c8] ss:$36 sps:$4 sm:$0xff]  }
 0x1d7   : > { %v6798_v12 = vpop.f32.mrf.mxu0  ;;  %7241 = vmatmul.mubr.bf16.gmra.mxu0 %v7653_v63  ;;  %v6886_v13 = vpop.f32.mrf.mxu1  ;;  %4653 = vmatmul.mubr.bf16.gmra.mxu1 %v7649_v3 }
 0x1d8   : > { %7244 = vmatprep.mubr.bf16.mxu0 %v7657_v4  ;;  %v8472_v15 = vadd.f32 %v6885_v11, %v8432_v49  ;;  %4660 = vmatprep.mubr.bf16.mxu1 %v7656_v8 }
 0x1d9   : > { %v6799_v16 = vpop.f32.mrf.mxu0  ;;  %v6887_v42 = vpop.f32.mrf.mxu1 }
 0x1da   : > { %v8474_v17 = vadd.f32 %v6799_v16, %v6798_v12  ;;  %v6888_v18 = vadd.f32 %v6887_v42, %v6886_v13  ;;  %v7664_v12 = vld [vmem:[#allocation3 + $0x408] ss:$36 sps:$4 sm:$0xff]   ;;  %v7672_v13 = vld [vmem:[#allocation3 + $0x410] ss:$36 sps:$4 sm:$0xff]  }
 0x1db   : > { %v6801_v19 = vpop.f32.mrf.mxu0  ;;  %v6889_v21 = vpop.f32.mrf.mxu1 }
 0x1dc   : > { %v8477_v28 = vadd.f32 %v6888_v18, %v8436_v60  ;;  %v7671_v18 = vld [vmem:[#allocation3 + $0x454] ss:$36 sps:$4 sm:$0xff]  }
 0x1dd   : > { %v6802_v29 = vpop.f32.mrf.mxu0  ;;  %v6890_v49 = vpop.f32.mrf.mxu1 }
 0x1de   : > { %v8479_v31 = vadd.f32 %v6802_v29, %v6801_v19  ;;  %v6891_v35 = vadd.f32 %v6890_v49, %v6889_v21 }
 0x1df   : > { %v6804_v58 = vpop.f32.mrf.mxu0  ;;  %7245 = vmatmul.mubr.bf16.gmra.mxu0 %v7658_v20  ;;  %v6892_v37 = vpop.f32.mrf.mxu1  ;;  %4661 = vmatmul.mubr.bf16.gmra.mxu1 %v7654_v23 }
 0x1e0   : > { %7248 = vmatprep.mubr.bf16.mxu0 %v7662_v26  ;;  %v8482_v38 = vadd.f32 %v6891_v35, %v8440_v7  ;;  %4668 = vmatprep.mubr.bf16.mxu1 %v7661_v30 }
 0x1e1   : > { %v6805_v39 = vpop.f32.mrf.mxu0  ;;  %v6893_v60 = vpop.f32.mrf.mxu1 }
 0x1e2   : > { %v8484_v40 = vadd.f32 %v6805_v39, %v6804_v58  ;;  %v6894_v41 = vadd.f32 %v6893_v60, %v6892_v37  ;;  %v7673_v58 = vld [vmem:[#allocation3 + $0x458] ss:$36 sps:$4 sm:$0xff]   ;;  %v7669_v39 = vld [vmem:[#allocation3 + $0x450] ss:$36 sps:$4 sm:$0xff]  }
 0x1e3   : > { %v6807_v44 = vpop.f32.mrf.mxu0  ;;  %v6895_v47 = vpop.f32.mrf.mxu1 }
 0x1e4   : > { %v8487_v52 = vadd.f32 %v6894_v41, %v8444_v14 }
 0x1e5   : > { %v6808_v53 = vpop.f32.mrf.mxu0  ;;  %v6896_v7 = vpop.f32.mrf.mxu1 }
 0x1e6   : > { %v8489_v24 = vadd.f32 %v6808_v53, %v6807_v44  ;;  %v6897_v57 = vadd.f32 %v6896_v7, %v6895_v47 }
 0x1e7   : > { %v6810_v61 = vpop.f32.mrf.mxu0  ;;  %7249 = vmatmul.mubr.bf16.gmra.mxu0 %v7663_v46  ;;  %v6898_v63 = vpop.f32.mrf.mxu1  ;;  %4669 = vmatmul.mubr.bf16.gmra.mxu1 %v7659_v1 }
 0x1e8   : > { %7252 = vmatprep.mubr.bf16.mxu0 %v7667_v51  ;;  %v8492_v0 = vadd.f32 %v6897_v57, %v8449_v27  ;;  %4676 = vmatprep.mubr.bf16.mxu1 %v7666_v55 }
 0x1e9   : > { %v6811_v3 = vpop.f32.mrf.mxu0  ;;  %v6899_v14 = vpop.f32.mrf.mxu1 }
 0x1ea   : > { %v8494_v4 = vadd.f32 %v6811_v3, %v6810_v61  ;;  %v6900_v6 = vadd.f32 %v6899_v14, %v6898_v63 }
 0x1eb   : > { %v6813_v8 = vpop.f32.mrf.mxu0  ;;  %v6901_v11 = vpop.f32.mrf.mxu1 }
 0x1ec   : > { %v8497_v16 = vadd.f32 %v6900_v6, %v8454_v36 }
 0x1ed   : > { %v6814_v42 = vpop.f32.mrf.mxu0  ;;  %v6902_v27 = vpop.f32.mrf.mxu1 }
 0x1ee   : > { %v8499_v19 = vadd.f32 %v6814_v42, %v6813_v8  ;;  %v6903_v20 = vadd.f32 %v6902_v27, %v6901_v11 }
 0x1ef   : > { %v6816_v21 = vpop.f32.mrf.mxu0  ;;  %7253 = vmatmul.mubr.bf16.gmra.mxu0 %v7668_v33  ;;  %v6904_v23 = vpop.f32.mrf.mxu1  ;;  %4677 = vmatmul.mubr.bf16.gmra.mxu1 %v7664_v12 }
 0x1f0   : > { %7256 = vmatprep.mubr.bf16.mxu0 %v7672_v13  ;;  %v8502_v26 = vadd.f32 %v6903_v20, %v8459_v48  ;;  %4684 = vmatprep.mubr.bf16.mxu1 %v7671_v18 }
 0x1f1   : > { %v6817_v29 = vpop.f32.mrf.mxu0  ;;  %v6905_v36 = vpop.f32.mrf.mxu1 }
 0x1f2   : > { %v8504_v30 = vadd.f32 %v6817_v29, %v6816_v21  ;;  %v6906_v49 = vadd.f32 %v6905_v36, %v6904_v23 }
 0x1f3   : > { %v6819_v35 = vpop.f32.mrf.mxu0  ;;  %v6907_v37 = vpop.f32.mrf.mxu1 }
 0x1f4   : > { %v8507_v60 = vadd.f32 %v6906_v49, %v8464_v56 }
 0x1f5   : > { %v6820_v41 = vpop.f32.mrf.mxu0  ;;  %v6908_v46 = vpop.f32.mrf.mxu1 }
 0x1f6   : > { %v8509_v44 = vadd.f32 %v6820_v41, %v6819_v35  ;;  %v6909_v47 = vadd.f32 %v6908_v46, %v6907_v37 }
 0x1f7   : > { %v6822_v48 = vpop.f32.mrf.mxu0  ;;  %7257 = vmatmul.mubr.bf16.gmra.mxu0 %v7673_v58  ;;  %v6910_v1 = vpop.f32.mrf.mxu1  ;;  %4685 = vmatmul.mubr.bf16.gmra.mxu1 %v7669_v39 }
 0x1f8   : > { %v8512_v51 = vadd.f32 %v6909_v47, %v8469_v9 }
 0x1f9   : > { %v6823_v53 = vpop.f32.mrf.mxu0  ;;  %v6911_v7 = vpop.f32.mrf.mxu1 }
 0x1fa   : > { %v8514_v55 = vadd.f32 %v6823_v53, %v6822_v48  ;;  %v6912_v57 = vadd.f32 %v6911_v7, %v6910_v1 }
 0x1fb   : > { %v6825_v61 = vpop.f32.mrf.mxu0  ;;  %v6913_v56 = vpop.f32.mrf.mxu1 }
 0x1fc   : > { %v8517_v63 = vadd.f32 %v6912_v57, %v8474_v17 }
 0x1fd   : > { %v6826_v3 = vpop.f32.mrf.mxu0  ;;  %v6914_v6 = vpop.f32.mrf.mxu1 }
 0x1fe   : > { %v8519_v14 = vadd.f32 %v6826_v3, %v6825_v61  ;;  %v6915_v8 = vadd.f32 %v6914_v6, %v6913_v56 }
 0x1ff   : > { %v6980_v33 = vpop.f32.mrf.mxu0  ;;  %v6916_v11 = vpop.f32.mrf.mxu1 }
 0x200   : > { %v8522_v9 = vadd.f32 %v6915_v8, %v8479_v31 }
 0x201   : > { %v6981_v12 = vpop.f32.mrf.mxu0  ;;  %v6917_v13 = vpop.f32.mrf.mxu1 }
 0x202   : > { %v6982_v42 = vadd.f32 %v6981_v12, %v6980_v33  ;;  %v6918_v18 = vadd.f32 %v6917_v13, %v6916_v11 }
 0x203   : > { %v6983_v27 = vpop.f32.mrf.mxu0  ;;  %v6919_v17 = vpop.f32.mrf.mxu1 }
 0x204   : > { %v8525_v20 = vadd.f32 %v6982_v42, %v8447_v22  ;;  %v8528_v21 = vadd.f32 %v6918_v18, %v8484_v40 }
 0x205   : > { %v6984_v23 = vpop.f32.mrf.mxu0  ;;  %v6920_v29 = vpop.f32.mrf.mxu1 }
 0x206   : > { %v6985_v36 = vadd.f32 %v6984_v23, %v6983_v27  ;;  %v6921_v49 = vadd.f32 %v6920_v29, %v6919_v17 }
 0x207   : > { %v6986_v35 = vpop.f32.mrf.mxu0  ;;  %v6922_v58 = vpop.f32.mrf.mxu1 }
 0x208   : > { %v8531_v31 = vadd.f32 %v6985_v36, %v8452_v32  ;;  %v8534_v37 = vadd.f32 %v6921_v49, %v8489_v24 }
 0x209   : > { %v6987_v39 = vpop.f32.mrf.mxu0  ;;  %v6923_v41 = vpop.f32.mrf.mxu1 }
 0x20a   : > { %v6988_v22 = vadd.f32 %v6987_v39, %v6986_v35  ;;  %v6924_v46 = vadd.f32 %v6923_v41, %v6922_v58 }
 0x20b   : > { %v6989_v47 = vpop.f32.mrf.mxu0  ;;  %v6925_v48 = vpop.f32.mrf.mxu1 }
 0x20c   : > { %v8537_v40 = vadd.f32 %v6988_v22, %v8457_v45  ;;  %v8540_v1 = vadd.f32 %v6924_v46, %v8494_v4 }
 0x20d   : > { %v6990_v53 = vpop.f32.mrf.mxu0  ;;  %v6926_v7 = vpop.f32.mrf.mxu1 }
 0x20e   : > { %v6991_v32 = vadd.f32 %v6990_v53, %v6989_v47  ;;  %v6927_v57 = vadd.f32 %v6926_v7, %v6925_v48 }
 0x20f   : > { %v6992_v61 = vpop.f32.mrf.mxu0  ;;  %v6928_v56 = vpop.f32.mrf.mxu1 }
 0x210   : > { %v8543_v24 = vadd.f32 %v6991_v32, %v8462_v54  ;;  %v8546_v3 = vadd.f32 %v6927_v57, %v8499_v19 }
 0x211   : > { %v6993_v6 = vpop.f32.mrf.mxu0  ;;  %v6929_v8 = vpop.f32.mrf.mxu1 }
 0x212   : > { %v6994_v45 = vadd.f32 %v6993_v6, %v6992_v61  ;;  %v6930_v33 = vadd.f32 %v6929_v8, %v6928_v56 }
 0x213   : > { %v6995_v11 = vpop.f32.mrf.mxu0  ;;  %v6931_v12 = vpop.f32.mrf.mxu1 }
 0x214   : > { %v8549_v4 = vadd.f32 %v6994_v45, %v8467_v5  ;;  %v8552_v13 = vadd.f32 %v6930_v33, %v8504_v30 }
 0x215   : > { %v6996_v42 = vpop.f32.mrf.mxu0  ;;  %v6932_v18 = vpop.f32.mrf.mxu1 }
 0x216   : > { %v6997_v54 = vadd.f32 %v6996_v42, %v6995_v11  ;;  %v6933_v27 = vadd.f32 %v6932_v18, %v6931_v12 }
 0x217   : > { %v6998_v17 = vpop.f32.mrf.mxu0  ;;  %v6934_v23 = vpop.f32.mrf.mxu1 }
 0x218   : > { %v8555_v19 = vadd.f32 %v6997_v54, %v8472_v15  ;;  %v8558_v29 = vadd.f32 %v6933_v27, %v8509_v44 }
 0x219   : > { %v6999_v36 = vpop.f32.mrf.mxu0  ;;  %v6935_v49 = vpop.f32.mrf.mxu1 }
 0x21a   : > { %v7000_v5 = vadd.f32 %v6999_v36, %v6998_v17  ;;  %v6936_v35 = vadd.f32 %v6935_v49, %v6934_v23 }
 0x21b   : > { %v7001_v58 = vpop.f32.mrf.mxu0  ;;  %v6937_v39 = vpop.f32.mrf.mxu1 }
 0x21c   : > { %v8561_v30 = vadd.f32 %v7000_v5, %v8477_v28  ;;  %v8564_v41 = vadd.f32 %v6936_v35, %v8514_v55 }
 0x21d   : > { %v7002_v22 = vpop.f32.mrf.mxu0  ;;  %v6938_v46 = vpop.f32.mrf.mxu1 }
 0x21e   : > { %v7003_v15 = vadd.f32 %v7002_v22, %v7001_v58  ;;  %v6939_v47 = vadd.f32 %v6938_v46, %v6937_v39 }
 0x21f   : > { %v7004_v48 = vpop.f32.mrf.mxu0  ;;  %v6940_v53 = vpop.f32.mrf.mxu1 }
 0x220   : > { %v8567_v44 = vadd.f32 %v7003_v15, %v8482_v38  ;;  %v8570_v7 = vadd.f32 %v6939_v47, %v8519_v14 }
 0x221   : > { %v7005_v32 = vpop.f32.mrf.mxu0  ;;  %v6941_v57 = vpop.f32.mrf.mxu1 }
 0x222   : > { %v7006_v28 = vadd.f32 %v7005_v32, %v7004_v48  ;;  %v6942_v61 = vadd.f32 %v6941_v57, %v6940_v53 }
 0x223   : > { %v7007_v56 = vpop.f32.mrf.mxu0  ;;  %v6943_v6 = vpop.f32.mrf.mxu1 }
 0x224   : > { %v8573_v55 = vadd.f32 %v7006_v28, %v8487_v52  ;;  %v8576_v8 = vadd.f32 %v6942_v61, %v8406_v59 }
 0x225   : > { %v7008_v45 = vpop.f32.mrf.mxu0  ;;  %v6944_v33 = vpop.f32.mrf.mxu1 }
 0x226   : > { %v7009_v38 = vadd.f32 %v7008_v45, %v7007_v56  ;;  %v6945_v11 = vadd.f32 %v6944_v33, %v6943_v6 }
 0x227   : > { %v7010_v12 = vpop.f32.mrf.mxu0  ;;  %v6946_v42 = vpop.f32.mrf.mxu1 }
 0x228   : > { %v8579_v14 = vadd.f32 %v7009_v38, %v8492_v0  ;;  %v8582_v18 = vadd.f32 %v6945_v11, %v8410_v2 }
 0x229   : > { %v7011_v54 = vpop.f32.mrf.mxu0  ;;  %v6947_v27 = vpop.f32.mrf.mxu1 }
 0x22a   : > { %v7012_v52 = vadd.f32 %v7011_v54, %v7010_v12  ;;  %v6948_v17 = vadd.f32 %v6947_v27, %v6946_v42 }
 0x22b   : > { %v7013_v23 = vpop.f32.mrf.mxu0  ;;  %v6949_v36 = vpop.f32.mrf.mxu1 }
 0x22c   : > { %v8585_v59 = vadd.f32 %v7012_v52, %v8497_v16  ;;  %v8588_v49 = vadd.f32 %v6948_v17, %v8422_v25 }
 0x22d   : > { %v7014_v5 = vpop.f32.mrf.mxu0  ;;  %v6950_v35 = vpop.f32.mrf.mxu1 }
 0x22e   : > { %v7015_v0 = vadd.f32 %v7014_v5, %v7013_v23  ;;  %v6951_v58 = vadd.f32 %v6950_v35, %v6949_v36 }
 0x22f   : > { %v7016_v39 = vpop.f32.mrf.mxu0  ;;  %v6952_v22 = vpop.f32.mrf.mxu1 }
 0x230   : > { %v8591_v2 = vadd.f32 %v7015_v0, %v8502_v26  ;;  %v8594_v46 = vadd.f32 %v6951_v58, %v8426_v34 }
 0x231   : > { %v7017_v15 = vpop.f32.mrf.mxu0  ;;  %v6953_v47 = vpop.f32.mrf.mxu1 }
 0x232   : > { %v7018_v16 = vadd.f32 %v7017_v15, %v7016_v39  ;;  %v6954_v48 = vadd.f32 %v6953_v47, %v6952_v22 }
 0x233   : > { %v7019_v53 = vpop.f32.mrf.mxu0  ;;  %v6955_v32 = vpop.f32.mrf.mxu1 }
 0x234   : > { %v8597_v25 = vadd.f32 %v7018_v16, %v8507_v60  ;;  %v8600_v57 = vadd.f32 %v6954_v48, %v8430_v43 }
 0x235   : > { %v7020_v28 = vpop.f32.mrf.mxu0  ;;  %v6956_v61 = vpop.f32.mrf.mxu1 }
 0x236   : > { %v7021_v26 = vadd.f32 %v7020_v28, %v7019_v53  ;;  %v6957_v56 = vadd.f32 %v6956_v61, %v6955_v32 }
 0x237   : > { %v7022_v6 = vpop.f32.mrf.mxu0  ;;  %v6958_v45 = vpop.f32.mrf.mxu1 }
 0x238   : > { %v8603_v34 = vadd.f32 %v7021_v26, %v8512_v51  ;;  %v8606_v33 = vadd.f32 %v6957_v56, %v8434_v50 }
 0x239   : > { %v7023_v38 = vpop.f32.mrf.mxu0  ;;  %v6959_v11 = vpop.f32.mrf.mxu1 }
 0x23a   : > { %v7024_v60 = vadd.f32 %v7023_v38, %v7022_v6  ;;  %v6960_v12 = vadd.f32 %v6959_v11, %v6958_v45 }
 0x23b   : > { %v7025_v42 = vpop.f32.mrf.mxu0  ;;  %v6961_v54 = vpop.f32.mrf.mxu1 }
 0x23c   : > { %v8609_v43 = vadd.f32 %v7024_v60, %v8517_v63  ;;  %v8612_v27 = vadd.f32 %v6960_v12, %v8438_v62 }
 0x23d   : > { %v7026_v52 = vpop.f32.mrf.mxu0  ;;  %v6962_v17 = vpop.f32.mrf.mxu1 }
 0x23e   : > { %v7027_v51 = vadd.f32 %v7026_v52, %v7025_v42  ;;  %v6963_v23 = vadd.f32 %v6962_v17, %v6961_v54 }
 0x23f   : > { %v7028_v36 = vpop.f32.mrf.mxu0  ;;  %v7092_v5 = vpop.f32.mrf.mxu1 }
 0x240   : > { %v8615_v50 = vadd.f32 %v7027_v51, %v8522_v9  ;;  %v8618_v35 = vadd.f32 %v6963_v23, %v8442_v10 }
 0x241   : > { %v7029_v0 = vpop.f32.mrf.mxu0  ;;  %v7093_v63 = vpop.f32.mrf.mxu1 }
 0x242   : > { %v7030_v58 = vadd.f32 %v7029_v0, %v7028_v36  ;;  %v7094_v39 = vadd.f32 %v7093_v63, %v7092_v5 }
 0x243   : > { %v7031_v22 = vpop.f32.mrf.mxu0  ;;  %v8623_v15 = vpop.f32.mrf.mxu1 }
 0x244   : > { %v8621_v62 = vadd.f32 %v7030_v58, %v8528_v21  ;;  %v8626_v16 = vadd.f32 %v7094_v39, %v8525_v20 }
 0x245   : > { %v7032_v47 = vpop.f32.mrf.mxu0  ;;  %v8628_v48 = vpop.f32.mrf.mxu1 }
 0x246   : > { %v7033_v9 = vadd.f32 %v7032_v47, %v7031_v22 }
 0x247   : > { %v7034_v53 = vpop.f32.mrf.mxu0  ;;  %v8633_v32 = vpop.f32.mrf.mxu1 }
 0x248   : > { %v8631_v10 = vadd.f32 %v7033_v9, %v8534_v37 }
 0x249   : > { %v7035_v28 = vpop.f32.mrf.mxu0  ;;  %v8635_v26 = vpop.f32.mrf.mxu1 }
 0x24a   : > { %v7036_v61 = vadd.f32 %v7035_v28, %v7034_v53 }
 0x24b   : > { %v7037_v21 = vpop.f32.mrf.mxu0  ;;  %v8640_v6 = vpop.f32.mrf.mxu1 }
 0x24c   : > { %v8638_v56 = vadd.f32 %v7036_v61, %v8540_v1 }
 0x24d   : > { %v7038_v20 = vpop.f32.mrf.mxu0  ;;  %v8642_v38 = vpop.f32.mrf.mxu1 }
 0x24e   : > { %v7039_v45 = vadd.f32 %v7038_v20, %v7037_v21 }
 0x24f   : > { %v7040_v11 = vpop.f32.mrf.mxu0  ;;  %v8647_v60 = vpop.f32.mrf.mxu1 }
 0x250   : > { %v8645_v37 = vadd.f32 %v7039_v45, %v8546_v3 }
 0x251   : > { %v7041_v12 = vpop.f32.mrf.mxu0  ;;  %v8649_v54 = vpop.f32.mrf.mxu1 }
 0x252   : > { %v7042_v42 = vadd.f32 %v7041_v12, %v7040_v11 }
 0x253   : > { %v7043_v52 = vpop.f32.mrf.mxu0  ;;  %v8654_v17 = vpop.f32.mrf.mxu1 }
 0x254   : > { %v8652_v1 = vadd.f32 %v7042_v42, %v8552_v13 }
 0x255   : > { %v7044_v51 = vpop.f32.mrf.mxu0  ;;  %v8656_v36 = vpop.f32.mrf.mxu1 }
 0x256   : > { %9026 = vst [vmem:[#allocation19_spill] sm:$0xff] %v8652_v1  ;;  %v7045_v23 = vadd.f32 %v7044_v51, %v7043_v52 }
 0x257   : > { %v7046_v5 = vpop.f32.mrf.mxu0  ;;  %v8661_v0 = vpop.f32.mrf.mxu1 }
 0x258   : > { %v8659_v3 = vadd.f32 %v7045_v23, %v8558_v29 }
 0x259   : > { %v7047_v58 = vpop.f32.mrf.mxu0  ;;  %v8663_v39 = vpop.f32.mrf.mxu1 }
 0x25a   : > { %9027 = vst [vmem:[#allocation20_spill] sm:$0xff] %v8659_v3  ;;  %v7048_v63 = vadd.f32 %v7047_v58, %v7046_v5 }
 0x25b   : > { %v7049_v22 = vpop.f32.mrf.mxu0  ;;  %v8668_v47 = vpop.f32.mrf.mxu1 }
 0x25c   : > { %v8666_v13 = vadd.f32 %v7048_v63, %v8564_v41 }
 0x25d   : > { %v7050_v9 = vpop.f32.mrf.mxu0  ;;  %v8670_v28 = vpop.f32.mrf.mxu1 }
 0x25e   : > { %v7051_v53 = vadd.f32 %v7050_v9, %v7049_v22 }
 0x25f   : > { %v7052_v61 = vpop.f32.mrf.mxu0  ;;  %v8675_v21 = vpop.f32.mrf.mxu1 }
 0x260   : > { %v8673_v29 = vadd.f32 %v7051_v53, %v8570_v7 }
 0x261   : > { %v7053_v20 = vpop.f32.mrf.mxu0  ;;  %v8677_v11 = vpop.f32.mrf.mxu1 }
 0x262   : > { %9028 = vst [vmem:[#allocation21_spill] sm:$0xff] %v8673_v29  ;;  %v7054_v45 = vadd.f32 %v7053_v20, %v7052_v61 }
 0x263   : > { %v7055_v12 = vpop.f32.mrf.mxu0  ;;  %v8682_v42 = vpop.f32.mrf.mxu1 }
 0x264   : > { %v8680_v41 = vadd.f32 %v7054_v45, %v8576_v8 }
 0x265   : > { %v7056_v52 = vpop.f32.mrf.mxu0  ;;  %v8684_v23 = vpop.f32.mrf.mxu1 }
 0x266   : > { %9029 = vst [vmem:[#allocation22_spill] sm:$0xff] %v8680_v41  ;;  %v7057_v51 = vadd.f32 %v7056_v52, %v7055_v12 }
 0x267   : > { %v7058_v5 = vpop.f32.mrf.mxu0  ;;  %v8689_v58 = vpop.f32.mrf.mxu1 }
 0x268   : > { %v8687_v7 = vadd.f32 %v7057_v51, %v8582_v18 }
 0x269   : > { %v7059_v63 = vpop.f32.mrf.mxu0  ;;  %v8691_v9 = vpop.f32.mrf.mxu1 }
 0x26a   : > { %9030 = vst [vmem:[#allocation23_spill] sm:$0xff] %v8687_v7  ;;  %v7060_v22 = vadd.f32 %v7059_v63, %v7058_v5 }
 0x26b   : > { %v7061_v53 = vpop.f32.mrf.mxu0  ;;  %v8696_v61 = vpop.f32.mrf.mxu1 }
 0x26c   : > { %v8694_v8 = vadd.f32 %v7060_v22, %v8588_v49 }
 0x26d   : > { %v7062_v20 = vpop.f32.mrf.mxu0  ;;  %v8698_v12 = vpop.f32.mrf.mxu1 }
 0x26e   : > { %9031 = vst [vmem:[#allocation24_spill] sm:$0xff] %v8694_v8  ;;  %v7063_v45 = vadd.f32 %v7062_v20, %v7061_v53 }
 0x26f   : > { %v7064_v52 = vpop.f32.mrf.mxu0  ;;  %v8703_v51 = vpop.f32.mrf.mxu1 }
 0x270   : > { %v8701_v18 = vadd.f32 %v7063_v45, %v8594_v46 }
 0x271   : > { %v7065_v7 = vpop.f32.mrf.mxu0  ;;  %v8705_v63 = vpop.f32.mrf.mxu1 }
 0x272   : > { %9032 = vst [vmem:[#allocation25_spill] sm:$0xff] %v8701_v18  ;;  %v7066_v5 = vadd.f32 %v7065_v7, %v7064_v52  ;;  %v7100_v7 = vadd.f32 %v8635_v26, %v8633_v32  ;;  %v8736_v32 = vld [vmem:[%s8993_s2] ss:$0 sm:$0xff] }
 0x273   : > { %v7067_v41 = vpop.f32.mrf.mxu0  ;;  %v8710_v22 = vpop.f32.mrf.mxu1 }
 0x274   : > { %v8708_v49 = vadd.f32 %v7066_v5, %v8600_v57 }
 0x275   : > { %v7068_v8 = vpop.f32.mrf.mxu0  ;;  %v8712_v20 = vpop.f32.mrf.mxu1 }
 0x276   : > { %9033 = vst [vmem:[#allocation26_spill] sm:$0xff] %v8708_v49  ;;  %v7069_v53 = vadd.f32 %v7068_v8, %v7067_v41  ;;  %v4575_v49 = vadd.f32 %v7100_v7, %v8537_v40 }
 0x277   : > { %v7070_v3 = vpop.f32.mrf.mxu0  ;;  %v8717_v45 = vpop.f32.mrf.mxu1 }
 0x278   : > { %v8715_v46 = vadd.f32 %v7069_v53, %v8606_v33  ;;  %v7103_v33 = vadd.f32 %v8642_v38, %v8640_v6 }
 0x279   : > { %v7071_v18 = vpop.f32.mrf.mxu0  ;;  %v8721_v29 = vpop.f32.mrf.mxu1 }
 0x27a   : > { %9034 = vst [vmem:[#allocation27_spill] sm:$0xff] %v8715_v46  ;;  %v7072_v52 = vadd.f32 %v7071_v18, %v7070_v3  ;;  %v7112_v18 = vadd.f32 %v8663_v39, %v8661_v0 }
 0x27b   : > { %v7073_v57 = vpop.f32.mrf.mxu0  ;;  %v8726_v41 = vpop.f32.mrf.mxu1 }
 0x27c   : > { %v8724_v5 = vadd.f32 %v7072_v52, %v8612_v27  ;;  %v7097_v27 = vadd.f32 %v8628_v48, %v8623_v15  ;;  %v7106_v15 = vadd.f32 %v8649_v54, %v8647_v60  ;;  %v4591_v54 = vadd.f32 %v7112_v18, %v8561_v30 }
 0x27d   : > { %v7074_v8 = vpop.f32.mrf.mxu0  ;;  %v8730_v46 = vpop.f32.mrf.mxu1  ;;  %v7124_v30 = vadd.f32 %v8691_v9, %v8689_v58 }
 0x27e   : > { %v7075_v53 = vadd.f32 %v7074_v8, %v7073_v57  ;;  %v4578_v57 = vadd.f32 %v7103_v33, %v8543_v24 }
 0x27f   : > { %v7230_v1 = vpop.f32.mrf.mxu0  ;;  %v8743_v3 = vpop.f32.mrf.mxu1 }
 0x280   : > { %v8741_v26 = vadd.f32 %v7075_v53, %v8618_v35  ;;  %v4736_v6 = vadd.f32 %v7230_v1, %v4575_v49  ;;  %v8757_v35 = vld [vmem:[%s8994_s3] ss:$0 sm:$0xff]  ;;  %v4570_v49 = vadd.f32 %v7097_v27, %v8531_v31  ;;  %v7109_v53 = vadd.f32 %v8656_v36, %v8654_v17 }
 0x281   : > { %v4727_v38 = vpop.f32.mrf.mxu0  ;;  %v8748_v7 = vpop.f32.mrf.mxu1 }
 0x282   : > { %v4863_v40 = vmul.f32 %v8736_v32, %v4736_v6  ;;  %v4728_v52 = vadd.f32 %v4727_v38, %v8626_v16  ;;  %v7115_v6 = vadd.f32 %v8670_v28, %v8668_v47 }
 0x283   : > { %v7231_v48 = vpop.f32.mrf.mxu0  ;;  %v8760_v0 = vpop.f32.mrf.mxu1 }
 0x284   : > { %v4861_v1 = vmul.f32 %v8736_v32, %v4728_v52  ;;  %v4739_v39 = vadd.f32 %v7231_v48, %v4578_v57  ;;  %v4902_v16 = vadd.f32 %v8757_v35, %v4863_v40  ;;  %v4583_v52 = vadd.f32 %v7106_v15, %v8549_v4 }
 0x285   : > { %v4730_v8 = vpop.f32.mrf.mxu0  ;;  %v8765_v33 = vpop.f32.mrf.mxu1  ;;  %v7118_v15 = vadd.f32 %v8677_v11, %v8675_v21 }
 0x286   : > { %v4864_v24 = vmul.f32 %v8736_v32, %v4739_v39  ;;  %v4731_v60 = vadd.f32 %v4730_v8, %v4570_v49  ;;  %v4900_v31 = vadd.f32 %v8757_v35, %v4861_v1  ;;  %v4934_v17 = vmax.f32 %v4902_v16, 0.0 }
 0x287   : > { %v7234_v38 = vpop.f32.mrf.mxu0  ;;  %v8776_v57 = vpop.f32.mrf.mxu1  ;;  %v4594_v39 = vadd.f32 %v7115_v6, %v8567_v44  ;;  %v4586_v8 = vadd.f32 %v7109_v53, %v8555_v19  ;;  %v4607_v19 = vadd.f32 %v7124_v30, %v8585_v59 }
 0x288   : > { %v4903_v27 = vadd.f32 %v8757_v35, %v4864_v24  ;;  %v4862_v40 = vmul.f32 %v8736_v32, %v4731_v60  ;;  %v4752_v48 = vadd.f32 %v7234_v38, %v4591_v54  ;;  %v4932_v58 = vmax.f32 %v4900_v31, 0.0 }
 0x289   : > { %v4743_v18 = vpop.f32.mrf.mxu0  ;;  %v8781_v28 = vpop.f32.mrf.mxu1  ;;  %v7127_v54 = vadd.f32 %v8698_v12, %v8696_v61 }
 0x28a   : > { %v4935_v36 = vmax.f32 %v4903_v27, 0.0  ;;  %v4901_v47 = vadd.f32 %v8757_v35, %v4862_v40  ;;  %v4744_v4 = vadd.f32 %v4743_v18, %v4583_v52  ;;  %v4867_v1 = vmul.f32 %v8736_v32, %v4752_v48 }
 0x28b   : > { %v7235_v49 = vpop.f32.mrf.mxu0  ;;  %v8789_v60 = vpop.f32.mrf.mxu1  ;;  %v4599_v48 = vadd.f32 %v7118_v15, %v8573_v55  ;;  %v7121_v18 = vadd.f32 %v8684_v23, %v8682_v42  ;;  %v7130_v42 = vadd.f32 %v8705_v63, %v8703_v51 }
 0x28c   : > { %v6590_v9 = vpack.c.bf16 %v4935_v36, %v4934_v17  ;;  %v4933_v16 = vmax.f32 %v4901_v47, 0.0  ;;  %v4865_v24 = vmul.f32 %v8736_v32, %v4744_v4  ;;  %v4755_v38 = vadd.f32 %v7235_v49, %v4594_v39 }
 0x28d   : > { %v4746_v21 = vpop.f32.mrf.mxu0  ;;  %v8794_v52 = vpop.f32.mrf.mxu1  ;;  %v4906_v53 = vadd.f32 %v8757_v35, %v4867_v1  ;;  %v4610_v17 = vadd.f32 %v7127_v54, %v8591_v2  ;;  %v7136_v36 = vadd.f32 %v8721_v29, %v8717_v45  ;;  %v7139_v45 = vadd.f32 %v8730_v46, %v8726_v41 }
 0x28e   : > { %6725 = vst [vmem:[%s8046_s7 + $0x8] sm:$0xff] %v6590_v9   ;;  %v6585_v11 = vpack.c.bf16 %v4933_v16, %v4932_v58  ;;  %v4747_v44 = vadd.f32 %v4746_v21, %v4586_v8  ;;  %v4868_v6 = vmul.f32 %v8736_v32, %v4755_v38  ;;  %v4904_v27 = vadd.f32 %v8757_v35, %v4865_v24 }
 0x28f   : > { %v7238_v31 = vpop.f32.mrf.mxu0  ;;  %v8802_v61 = vpop.f32.mrf.mxu1  ;;  %v4938_v49 = vmax.f32 %v4906_v53, 0.0  ;;  %v4602_v16 = vadd.f32 %v7121_v18, %v8579_v14  ;;  %v4623_v21 = vadd.f32 %v7136_v36, %v8609_v43  ;;  %v7133_v46 = vadd.f32 %v8712_v20, %v8710_v22 }
 0x290   : > { %6586 = vst [vmem:[%s8046_s7] sm:$0xff] %v6585_v11   ;;  %v4866_v40 = vmul.f32 %v8736_v32, %v4747_v44  ;;  %v4768_v12 = vadd.f32 %v7238_v31, %v4607_v19  ;;  %v4907_v59 = vadd.f32 %v8757_v35, %v4868_v6  ;;  %v4936_v23 = vmax.f32 %v4904_v27, 0.0 }
 0x291   : > { %v4759_v30 = vpop.f32.mrf.mxu0  ;;  %v8813_v1 = vpop.f32.mrf.mxu1  ;;  %v4615_v53 = vadd.f32 %v7130_v42, %v8597_v25  ;;  %v7148_v6 = vadd.f32 %v8781_v28, %v8776_v57  ;;  %v7142_v25 = vadd.f32 %v8748_v7, %v8743_v3  ;;  %v7145_v42 = vadd.f32 %v8765_v33, %v8760_v0 }
 0x292   : > { %v4905_v47 = vadd.f32 %v8757_v35, %v4866_v40  ;;  %v4871_v4 = vmul.f32 %v8736_v32, %v4768_v12  ;;  %v4760_v39 = vadd.f32 %v4759_v30, %v4599_v48  ;;  %v4939_v55 = vmax.f32 %v4907_v59, 0.0 }
 0x293   : > { %v7239_v15 = vpop.f32.mrf.mxu0  ;;  %v8817_v2 = vpop.f32.mrf.mxu1  ;;  %v4626_v40 = vadd.f32 %v7139_v45, %v8615_v50  ;;  %v4618_v50 = vadd.f32 %v7133_v46, %v8603_v34 }
 0x294   : > { %v4937_v8 = vmax.f32 %v4905_v47, 0.0  ;;  %v4771_v29 = vadd.f32 %v7239_v15, %v4610_v17  ;;  %v6600_v58 = vpack.c.bf16 %v4939_v55, %v4938_v49  ;;  %v4869_v9 = vmul.f32 %v8736_v32, %v4760_v39 }
 0x295   : > { %v4762_v24 = vpop.f32.mrf.mxu0  ;;  %v4910_v38 = vadd.f32 %v8757_v35, %v4871_v4  ;;  %v8825_v63 = vpop.f32.mrf.mxu1  ;;  %v4639_v15 = vadd.f32 %v7148_v6, %v8638_v56 }
 0x296   : > { %v6595_v54 = vpack.c.bf16 %v4937_v8, %v4936_v23  ;;  %v4872_v51 = vmul.f32 %v8736_v32, %v4771_v29  ;;  %6727 = vst [vmem:[%s8046_s7 + $0x18] sm:$0xff] %v6600_v58   ;;  %v4763_v11 = vadd.f32 %v4762_v24, %v4602_v16  ;;  %v4908_v31 = vadd.f32 %v8757_v35, %v4869_v9 }
 0x297   : > { %v7242_v44 = vpop.f32.mrf.mxu0  ;;  %v7158_v14 = vpop.f32.mrf.mxu1  ;;  %v4942_v12 = vmax.f32 %v4910_v38, 0.0  ;;  %v7151_v23 = vadd.f32 %v8794_v52, %v8789_v60  ;;  %v4631_v29 = vadd.f32 %v7142_v25, %v8621_v62  ;;  %v7154_v62 = vadd.f32 %v8813_v1, %v8802_v61  ;;  %v9035_v25 = vld [vmem:[#allocation19_spill] sm:$0xff] }
 0x298   : > { %6726 = vst [vmem:[%s8046_s7 + $0x10] sm:$0xff] %v6595_v54   ;;  %v4911_v41 = vadd.f32 %v8757_v35, %v4872_v51  ;;  %v4784_v19 = vadd.f32 %v7242_v44, %v4623_v21  ;;  %v4870_v43 = vmul.f32 %v8736_v32, %v4763_v11  ;;  %v4940_v47 = vmax.f32 %v4908_v31, 0.0 }
 0x299   : > { %v4775_v27 = vpop.f32.mrf.mxu0  ;;  %v7159_v48 = vpop.f32.mrf.mxu1  ;;  %v4642_v21 = vadd.f32 %v7151_v23, %v8645_v37  ;;  %v4634_v44 = vadd.f32 %v7145_v42, %v8631_v10 }
 0x29a   : > { %v4943_v22 = vmax.f32 %v4911_v41, 0.0  ;;  %v4875_v20 = vmul.f32 %v8736_v32, %v4784_v19  ;;  %v4776_v18 = vadd.f32 %v4775_v27, %v4615_v53  ;;  %v4909_v59 = vadd.f32 %v8757_v35, %v4870_v43 }
 0x29b   : > { %v7243_v57 = vpop.f32.mrf.mxu0  ;;  %v7161_v17 = vpop.f32.mrf.mxu1  ;;  %v7160_v56 = vadd.f32 %v7159_v48, %v7158_v14 }
 0x29c   : > { %v6610_v28 = vpack.c.bf16 %v4943_v22, %v4942_v12  ;;  %v4873_v30 = vmul.f32 %v8736_v32, %v4776_v18  ;;  %v4787_v36 = vadd.f32 %v7243_v57, %v4626_v40  ;;  %v4941_v4 = vmax.f32 %v4909_v59, 0.0 }
 0x29d   : > { %v4778_v39 = vpop.f32.mrf.mxu0  ;;  %v4914_v49 = vadd.f32 %v8757_v35, %v4875_v20  ;;  %v7162_v3 = vpop.f32.mrf.mxu1  ;;  %v4655_v40 = vadd.f32 %v7160_v56, %v8666_v13  ;;  %v4647_v59 = vadd.f32 %v7154_v62, %v9035_v25  ;;  %v7157_v57 = vadd.f32 %v8825_v63, %v8817_v2 }
 0x29e   : > { %6729 = vst [vmem:[%s8046_s7 + $0x28] sm:$0xff] %v6610_v28   ;;  %v4876_v55 = vmul.f32 %v8736_v32, %v4787_v36  ;;  %v4779_v7 = vadd.f32 %v4778_v39, %v4618_v50  ;;  %v6605_v34 = vpack.c.bf16 %v4941_v4, %v4940_v47  ;;  %v4912_v45 = vadd.f32 %v8757_v35, %v4873_v30  ;;  %v9036_v47 = vld [vmem:[#allocation21_spill] sm:$0xff] }
 0x29f   : > { %v7246_v8 = vpop.f32.mrf.mxu0  ;;  %v7164_v16 = vpop.f32.mrf.mxu1  ;;  %v4946_v38 = vmax.f32 %v4914_v49, 0.0  ;;  %v7163_v43 = vadd.f32 %v7162_v3, %v7161_v17 }
 0x2a0   : > { %v4915_v58 = vadd.f32 %v8757_v35, %v4876_v55  ;;  %v4874_v9 = vmul.f32 %v8736_v32, %v4779_v7  ;;  %v4800_v24 = vadd.f32 %v7246_v8, %v4639_v15  ;;  %6728 = vst [vmem:[%s8046_s7 + $0x20] sm:$0xff] %v6605_v34   ;;  %v4944_v46 = vmax.f32 %v4912_v45, 0.0 }
 0x2a1   : > { %v4791_v54 = vpop.f32.mrf.mxu0  ;;  %v7165_v60 = vpop.f32.mrf.mxu1  ;;  %v4658_v4 = vadd.f32 %v7163_v43, %v9036_v47  ;;  %v9040_v43 = vld [vmem:[#allocation25_spill] sm:$0xff] }
 0x2a2   : > { %v4947_v0 = vmax.f32 %v4915_v58, 0.0  ;;  %v4913_v33 = vadd.f32 %v8757_v35, %v4874_v9  ;;  %v4792_v52 = vadd.f32 %v4791_v54, %v4631_v29  ;;  %v4879_v51 = vmul.f32 %v8736_v32, %v4800_v24  ;;  %v9037_v29 = vld [vmem:[#allocation20_spill] sm:$0xff] }
 0x2a3   : > { %v7247_v11 = vpop.f32.mrf.mxu0  ;;  %v7167_v53 = vpop.f32.mrf.mxu1  ;;  %v7166_v7 = vadd.f32 %v7165_v60, %v7164_v16  ;;  %v4650_v45 = vadd.f32 %v7157_v57, %v9037_v29  ;;  %v9038_v54 = vld [vmem:[#allocation24_spill] sm:$0xff] }
 0x2a4   : > { %v6620_v41 = vpack.c.bf16 %v4947_v0, %v4946_v38  ;;  %v4945_v14 = vmax.f32 %v4913_v33, 0.0  ;;  %v4877_v19 = vmul.f32 %v8736_v32, %v4792_v52  ;;  %v4803_v6 = vadd.f32 %v7247_v11, %v4642_v21  ;;  %v9039_v21 = vld [vmem:[#allocation22_spill] sm:$0xff] }
 0x2a5   : > { %v4794_v31 = vpop.f32.mrf.mxu0  ;;  %v7168_v61 = vpop.f32.mrf.mxu1  ;;  %v4918_v37 = vadd.f32 %v8757_v35, %v4879_v51  ;;  %v4663_v11 = vadd.f32 %v7166_v7, %v9039_v21 }
 0x2a6   : > { %6731 = vst [vmem:[%s8046_s7 + $0x38] sm:$0xff] %v6620_v41   ;;  %v6615_v27 = vpack.c.bf16 %v4945_v14, %v4944_v46  ;;  %v4795_v1 = vadd.f32 %v4794_v31, %v4634_v44  ;;  %v4880_v10 = vmul.f32 %v8736_v32, %v4803_v6  ;;  %v4916_v22 = vadd.f32 %v8757_v35, %v4877_v19 }
 0x2a7   : > { %v7250_v12 = vpop.f32.mrf.mxu0  ;;  %v7170_v48 = vpop.f32.mrf.mxu1  ;;  %v4950_v39 = vmax.f32 %v4918_v37, 0.0  ;;  %v7169_v16 = vadd.f32 %v7168_v61, %v7167_v53 }
 0x2a8   : > { %6730 = vst [vmem:[%s8046_s7 + $0x30] sm:$0xff] %v6615_v27   ;;  %v4878_v20 = vmul.f32 %v8736_v32, %v4795_v1  ;;  %v4816_v18 = vadd.f32 %v7250_v12, %v4655_v40  ;;  %v4919_v28 = vadd.f32 %v8757_v35, %v4880_v10  ;;  %v4948_v15 = vmax.f32 %v4916_v22, 0.0  ;;  %v9041_v40 = vld [vmem:[#allocation23_spill] sm:$0xff] }
 0x2a9   : > { %v4807_v13 = vpop.f32.mrf.mxu0  ;;  %v7171_v36 = vpop.f32.mrf.mxu1  ;;  %v4666_v37 = vadd.f32 %v7169_v16, %v9041_v40 }
 0x2aa   : > { %v4917_v30 = vadd.f32 %v8757_v35, %v4878_v20  ;;  %v4883_v17 = vmul.f32 %v8736_v32, %v4816_v18  ;;  %v4808_v50 = vadd.f32 %v4807_v13, %v4647_v59  ;;  %v4951_v49 = vmax.f32 %v4919_v28, 0.0 }
 0x2ab   : > { %v7172_v55 = vadd.f32 %v7171_v36, %v7170_v48  ;;  %v7251_v3 = vpop.f32.mrf.mxu0  ;;  %v7173_v2 = vpop.f32.mrf.mxu1 }
 0x2ac   : > { %v4949_v42 = vmax.f32 %v4917_v30, 0.0  ;;  %v4819_v63 = vadd.f32 %v7251_v3, %v4658_v4  ;;  %v6630_v23 = vpack.c.bf16 %v4951_v49, %v4950_v39  ;;  %v4922_v34 = vadd.f32 %v8757_v35, %v4883_v17 }
 0x2ad   : > { %v4881_v8 = vmul.f32 %v8736_v32, %v4808_v50  ;;  %v4810_v58 = vpop.f32.mrf.mxu0  ;;  %v7174_v56 = vpop.f32.mrf.mxu1  ;;  %v4671_v38 = vadd.f32 %v7172_v55, %v9038_v54  ;;  %v9042_v55 = vld [vmem:[#allocation26_spill] sm:$0xff] }
 0x2ae   : > { %v6625_v9 = vpack.c.bf16 %v4949_v42, %v4948_v15  ;;  %v4884_v24 = vmul.f32 %v8736_v32, %v4819_v63  ;;  %6733 = vst [vmem:[%s8046_s7 + $0x48] sm:$0xff] %v6630_v23   ;;  %v7175_v0 = vadd.f32 %v7174_v56, %v7173_v2  ;;  %v4811_v33 = vadd.f32 %v4810_v58, %v4650_v45  ;;  %v9043_v56 = vld [vmem:[#allocation27_spill] sm:$0xff] }
 0x2af   : > { %v7254_v60 = vpop.f32.mrf.mxu0  ;;  %v7176_v62 = vpop.f32.mrf.mxu1  ;;  %v4954_v44 = vmax.f32 %v4922_v34, 0.0  ;;  %v4920_v46 = vadd.f32 %v8757_v35, %v4881_v8 }
 0x2b0   : > { %6732 = vst [vmem:[%s8046_s7 + $0x40] sm:$0xff] %v6625_v9   ;;  %v4923_v52 = vadd.f32 %v8757_v35, %v4884_v24  ;;  %v4832_v51 = vadd.f32 %v7254_v60, %v4671_v38  ;;  %v4882_v41 = vmul.f32 %v8736_v32, %v4811_v33  ;;  %v4674_v27 = vadd.f32 %v7175_v0, %v9040_v43 }
 0x2b1   : > { %v4823_v14 = vpop.f32.mrf.mxu0  ;;  %v7177_v6 = vpop.f32.mrf.mxu1  ;;  %v4952_v18 = vmax.f32 %v4920_v46, 0.0 }
 0x2b2   : > { %v4955_v19 = vmax.f32 %v4923_v52, 0.0  ;;  %v4887_v53 = vmul.f32 %v8736_v32, %v4832_v51  ;;  %v4824_v31 = vadd.f32 %v4823_v14, %v4663_v11  ;;  %v4921_v61 = vadd.f32 %v8757_v35, %v4882_v41 }
 0x2b3   : > { %v7255_v1 = vpop.f32.mrf.mxu0  ;;  %v7178_v12 = vadd.f32 %v7177_v6, %v7176_v62  ;;  %v7179_v20 = vpop.f32.mrf.mxu1 }
 0x2b4   : > { %v6640_v10 = vpack.c.bf16 %v4955_v19, %v4954_v44  ;;  %v4885_v22 = vmul.f32 %v8736_v32, %v4824_v31  ;;  %v4835_v48 = vadd.f32 %v7255_v1, %v4674_v27  ;;  %v4953_v25 = vmax.f32 %v4921_v61, 0.0 }
 0x2b5   : > { %v4826_v59 = vpop.f32.mrf.mxu0  ;;  %v4926_v57 = vadd.f32 %v8757_v35, %v4887_v53  ;;  %v7180_v13 = vpop.f32.mrf.mxu1  ;;  %v4679_v3 = vadd.f32 %v7178_v12, %v9042_v55 }
 0x2b6   : > { %6735 = vst [vmem:[%s8046_s7 + $0x58] sm:$0xff] %v6640_v10   ;;  %v4888_v28 = vmul.f32 %v8736_v32, %v4835_v48  ;;  %v4827_v30 = vadd.f32 %v4826_v59, %v4666_v37  ;;  %v6635_v17 = vpack.c.bf16 %v4953_v25, %v4952_v18  ;;  %v4924_v36 = vadd.f32 %v8757_v35, %v4885_v22 }
 0x2b7   : > { %v7258_v50 = vpop.f32.mrf.mxu0  ;;  %v7181_v4 = vadd.f32 %v7180_v13, %v7179_v20  ;;  %v7182_v49 = vpop.f32.mrf.mxu1  ;;  %v4958_v15 = vmax.f32 %v4926_v57, 0.0 }
 0x2b8   : > { %v4927_v47 = vadd.f32 %v8757_v35, %v4888_v28  ;;  %v4886_v39 = vmul.f32 %v8736_v32, %v4827_v30  ;;  %6734 = vst [vmem:[%s8046_s7 + $0x50] sm:$0xff] %v6635_v17   ;;  %v4956_v34 = vmax.f32 %v4924_v36, 0.0 }
 0x2b9   : > { %v4839_v7 = vpop.f32.mrf.mxu0  ;;  %v7183_v63 = vpop.f32.mrf.mxu1  ;;  %v4682_v54 = vadd.f32 %v7181_v4, %v9043_v56 }
 0x2ba   : > { %v4959_v42 = vmax.f32 %v4927_v47, 0.0  ;;  %v4925_v2 = vadd.f32 %v8757_v35, %v4886_v39  ;;  %v4840_v23 = vadd.f32 %v4839_v7, %v4679_v3  ;;  %v7184_v8 = vadd.f32 %v7183_v63, %v7182_v49 }
 0x2bb   : > { %v7259_v29 = vpop.f32.mrf.mxu0  ;;  %v7185_v24 = vpop.f32.mrf.mxu1 }
 0x2bc   : > { %v6650_v45 = vpack.c.bf16 %v4959_v42, %v4958_v15  ;;  %v4957_v58 = vmax.f32 %v4925_v2, 0.0  ;;  %v4889_v9 = vmul.f32 %v8736_v32, %v4840_v23  ;;  %v4687_v38 = vadd.f32 %v7184_v8, %v8724_v5 }
 0x2bd   : > { %v4842_v16 = vpop.f32.mrf.mxu0  ;;  %v7186_v33 = vpop.f32.mrf.mxu1 }
 0x2be   : > { %6737 = vst [vmem:[%s8046_s7 + $0x68] sm:$0xff] %v6650_v45   ;;  %v6645_v0 = vpack.c.bf16 %v4957_v58, %v4956_v34  ;;  %v4843_v60 = vadd.f32 %v4842_v16, %v4682_v54  ;;  %v4848_v52 = vadd.f32 %v7258_v50, %v4687_v38  ;;  %v7187_v62 = vadd.f32 %v7186_v33, %v7185_v24 }
 0x2bf   : > { %v4928_v51 = vadd.f32 %v8757_v35, %v4889_v9 }
 0x2c0   : > { %6736 = vst [vmem:[%s8046_s7 + $0x60] sm:$0xff] %v6645_v0   ;;  %v4890_v21 = vmul.f32 %v8736_v32, %v4843_v60  ;;  %v4891_v11 = vmul.f32 %v8736_v32, %v4848_v52  ;;  %v4690_v44 = vadd.f32 %v7187_v62, %v8741_v26 }
 0x2c1   : > { %v4960_v41 = vmax.f32 %v4928_v51, 0.0 }
 0x2c2   : > { %v4929_v5 = vadd.f32 %v8757_v35, %v4890_v21  ;;  %v4851_v46 = vadd.f32 %v7259_v29, %v4690_v44  ;;  %v4930_v19 = vadd.f32 %v8757_v35, %v4891_v11 }
 0x2c4   : > { %v4961_v14 = vmax.f32 %v4929_v5, 0.0  ;;  %v4892_v53 = vmul.f32 %v8736_v32, %v4851_v46  ;;  %v4962_v26 = vmax.f32 %v4930_v19, 0.0 }
 0x2c6   : > { %v6655_v6 = vpack.c.bf16 %v4961_v14, %v4960_v41  ;;  %v4931_v31 = vadd.f32 %v8757_v35, %v4892_v53 }
 0x2c8   : > { %6738 = vst [vmem:[%s8046_s7 + $0x70] sm:$0xff] %v6655_v6   ;;  %v4963_v43 = vmax.f32 %v4931_v31, 0.0 }
 0x2ca   : > { %v6660_v27 = vpack.c.bf16 %v4963_v43, %v4962_v26 }
 0x2cc   : > { %6739 = vst [vmem:[%s8046_s7 + $0x78] sm:$0xff] %v6660_v27  }
 0x2cd   : > { %7741 = shalt.err (!%p7738_p7)
}
 0x2ce   : > { %s7742_s15 = scalar_lea.hbm %s8924_s10, 2048  ;;  %s7746_s11 = scalar_lea.hbm %s9045_s9, 16384 }
 0x2cf   : > { %p7743_p9 = scmp.ne.s32.totalorder %s8924_s10, %s7742_s15  ;;  %p7747_p2 = scmp.lt.s32.totalorder %s8924_s10, %s9045_s9 }
 0x2d0   : > { %p7748_p4 = scmp.lt.s32.totalorder %s7746_s11, %s7742_s15 }
 0x2d1   : > { %p7744_p10 = pnand %p7743_p9, %p9046_p3 }
 0x2d2   : > { %p7749_p11 = por %p7748_p4, %p7747_p2 }
 0x2d3   : > { %p7745_p12 = pneg %p7744_p10 }
 0x2d5   : > { %p7750_p1 = pnand %p7749_p11, %p7745_p12 }
 0x2d7   : > { %7753 = shalt.err (!%p7750_p1)
}
 0x2d8   : > { %s7860_s23 = smov 64   ;;  %s7861_s6 = smov 4  }
 0x2d9   : > { %7282 = dma.vmem_to_hbm [thread:$0]  (%p9046_p3), %s8926_s8, 2048, %s8924_s10, %s8931_s13, %s7860_s23, %s7860_s23, %s7861_s6  }
 0x2da PF: > { %s9047_s12 = sld [smem:[#allocation13_spill]]  ;;  %p7299_p0 = scmp.ge.s32.totalorder %s7852_s25, 2 }
 0x2db   : > { %s9048_s21 = sld [smem:[#allocation16_spill]] }
 0x2e0   : > { %s5156_s22 = sand.u32 1, %s9047_s12  }
 0x2e1   : > { %p9049_p13 = scmp.ne.s32.totalorder %s9048_s21, 0  ;;  %s5157_s5 = scalar_lea.sflag [#allocation6], %s5156_s22 }
 0x2e3   : > { %p7293_p5 = pnand %p7299_p0, %p9049_p13 }
 0x2e5   : > { %p7294_p6 = pneg %p7293_p5 }
 0x2e7   : > { %7807 = dma.done.wait (%p7294_p6), %s5157_s5, 2048  }
 0x2e8   : > { %7809 = vsyncadd (%p7294_p6), %s5157_s5, 4294965248  ;;  %s21_s25 = sadd.s32 1, %s7852_s25   ;;  %s9050_s21 = sld [smem:[#allocation14_spill]] }
 0x2e9   : > { %p18_p8 = scmp.ge.s32.totalorder %s21_s25, 10   ;;  %s9051_s23 = sld [smem:[#allocation17_spill]] }
 0x2ea   : > { %s9052_s4 = sld [smem:[#allocation18_spill]]  ;;  %s9053_s15 = smov %s7816_s16 }
 0x2eb   : > { %s9054_s16 = smov %s7820_s17  ;;  %s9055_s17 = smov %s8010_s18 }
 0x2ec   : > { %s9056_s18 = smov %s7828_s19  ;;  %s9057_s19 = smov %s7832_s20 }
 0x2ed   : > { %s9058_s20 = smov %s8005_s29  ;;  %s9059_s22 = smov %s7848_s24 }
 0x2ee   :  { %20 = sbr.rel (!%p18_p8) target bundleno = 13 (0xd), region = 93 }
 0x2f0   : > { %s9060_s24 = smov %s9052_s4 }
 0x2f3   :  { %5162 = vsyncpa [#allocation5], 1 }
 0x2f4   :  { %5164 = vsyncpa [#allocation5 + $0x1], 1 }
 0x2f5   :  { %5165 = vsyncpa [#allocation8], 1 }
 0x2f6   :  { %5166 = vsyncpa [#allocation6], 1 }
 0x2f7   :  { %5168 = vsyncpa [#allocation6 + $0x1], 1 }

</bundles_post_ra>
